<compile_context>
chip_gen: v7x
topology: tpu7x:2x2x1
jax: 0.10.0
libtpu: 0.0.40
codegen_flags: <defaults>
</compile_context>

<pallas_src>
import functools

import jax
import jax.numpy as jnp
from jax.experimental import pallas as pl
from jax.experimental.pallas import tpu as pltpu  # noqa: F401


def _round_up(x, m):
    return (x + m - 1) // m * m


# ------------------------------ Fused model kernel ----------------------------

def _fused_lstm_kernel(x_ref, t_ref, lstm_ref, fc_ref, out_ref, *,
                       num_layers, hidden_dim, input_dim, layer_row_offsets):
    """Entire LSTMModel forward in one kernel invocation (no grid).

    lstm_ref: (R, 4H) packed [w_ih; w_hh; bias] per layer (row-padded to x8).
    fc_ref:   (H+3, O) packed [W_fc[:H]; W_fc[H:H+2]; b_fc].
    """
    H = hidden_dim
    B, S, _ = x_ref.shape

    pack = lstm_ref[...]          # all LSTM weights, one DMA'd block
    fc = fc_ref[...]              # packed FC block
    x = x_ref[...]                # (B, S, D) batch-first, as in PyTorch

    # Layer-0 input, time-major (S*B, D): row s*B + b.  Time-major keeps every
    # per-step slice a contiguous row block and lets the next layer's input be
    # a plain concat of the per-step h's (no reordering, no VMEM scratch).
    xs = jnp.concatenate([x[:, s, :] for s in range(S)], axis=0)

    h = None
    for layer in range(num_layers):
        d_in = input_dim if layer == 0 else H
        r0 = layer_row_offsets[layer]
        last_layer = layer == num_layers - 1

        # Per-gate weight column blocks so every gate's pre-activation lands at
        # lane offset 0 (no XLU lane rotates on the serial recurrence chain),
        # plus the hoisted input projection: 4 batched MXU matmuls covering all
        # timesteps, off the critical path.
        w_hh_g, gx_g = [], []
        for g in range(4):
            cols = slice(g * H, (g + 1) * H)
            w_ih = pack[r0:r0 + d_in, cols]                        # (d_in, H)
            w_hh_g.append(pack[r0 + d_in:r0 + d_in + H, cols])     # (H, H)
            bias = pack[r0 + d_in + H:r0 + d_in + H + 1, cols]     # (1, H)
            gx_g.append(
                jnp.dot(xs, w_ih, preferred_element_type=jnp.float32) + bias)

        h = jnp.zeros((B, H), jnp.float32)
        c = jnp.zeros((B, H), jnp.float32)
        outs = []
        # Small static S -> full trace-time unroll of the recurrence.
        for s in range(S):
            rows = slice(s * B, (s + 1) * B)
            i_t = jax.nn.sigmoid(gx_g[0][rows] + jnp.dot(
                h, w_hh_g[0], preferred_element_type=jnp.float32))
            f_t = jax.nn.sigmoid(gx_g[1][rows] + jnp.dot(
                h, w_hh_g[1], preferred_element_type=jnp.float32))
            g_t = jnp.tanh(gx_g[2][rows] + jnp.dot(
                h, w_hh_g[2], preferred_element_type=jnp.float32))
            o_t = jax.nn.sigmoid(gx_g[3][rows] + jnp.dot(
                h, w_hh_g[3], preferred_element_type=jnp.float32))
            c = f_t * c + i_t * g_t
            h = o_t * jnp.tanh(c)
            if not last_layer:
                outs.append(h)

        if not last_layer:
            # Inter-layer sequence stays in vregs, time-major (S*B, H).
            xs = jnp.concatenate(outs, axis=0)

    # Fused FC: concat([h_last, t], -1) @ W + b == h @ W[:H] + t @ W[H:H+2] + b
    w_h = fc[:H, :]
    w_t = fc[H:H + 2, :]
    b_fc = fc[H + 2:H + 3, :]
    out_ref[...] = (jnp.dot(h, w_h, preferred_element_type=jnp.float32)
                    + jnp.dot(t_ref[...], w_t, preferred_element_type=jnp.float32)
                    + b_fc)


# ------------------------------ Param packing / wrapper ------------------------

def pack_params(params, dtype=jnp.float32):
    """Pack all LSTM weights into ONE (R, 4H) array and FC weights+bias into
    ONE (H+3, O) array.  Each layer block is row-padded to a multiple of 8 so
    in-kernel row-slice boundaries are sublane-tile aligned."""
    blocks, offsets, r = [], [], 0
    for (w_ih, w_hh, b) in params["lstm"]:
        blk = jnp.concatenate([w_ih, w_hh, b], axis=0)         # (d_in+H+1, 4H)
        pad = _round_up(blk.shape[0], 8) - blk.shape[0]
        if pad:
            blk = jnp.pad(blk, ((0, pad), (0, 0)))
        offsets.append(r)
        r += blk.shape[0]
        blocks.append(blk)
    lstm_pack = jnp.concatenate(blocks, axis=0).astype(dtype)
    fc_pack = jnp.concatenate(
        [params["fc_w"], params["fc_b"].reshape(1, -1)], axis=0).astype(dtype)
    return lstm_pack, fc_pack, tuple(offsets)


def lstm_model_forward(x_bsd, t, params, input_dim, hidden_dim):
    """x_bsd: (B, S, input_dim) batch-first (like PyTorch), t: (B, 2) -> (B, O)."""
    B, S, _ = x_bsd.shape
    H = hidden_dim
    O = params["fc_w"].shape[1]
    num_layers = len(params["lstm"])
    assert num_layers >= 1, "num_layers must be >= 1"

    # NOTE(v6e/v7x): use dtype=jnp.bfloat16 once 4H >= 256 (keep f32 math).
    lstm_pack, fc_pack, offsets = pack_params(params, dtype=jnp.float32)

    kernel = functools.partial(
        _fused_lstm_kernel, num_layers=num_layers, hidden_dim=H,
        input_dim=input_dim, layer_row_offsets=offsets)

    # No grid: all operands fit comfortably in VMEM at these shapes; default
    # BlockSpecs (full-array blocks) give 4 whole-array DMAs + 1 output DMA.
    return pl.pallas_call(
        kernel,
        out_shape=jax.ShapeDtypeStruct((B, O), jnp.float32),
    )(x_bsd, t, lstm_pack, fc_pack)


# ----------------------------- Param construction -----------------------------

def init_params(key, input_dim, hidden_dim, output_dim, num_layers):
    H = hidden_dim
    k = 1.0 / jnp.sqrt(H)
    params = {"lstm": []}
    for layer in range(num_layers):
        d_in = input_dim if layer == 0 else H
        key, k1, k2, k3, k4 = jax.random.split(key, 5)
        w_ih = jax.random.uniform(k1, (d_in, 4 * H), jnp.float32, -k, k)
        w_hh = jax.random.uniform(k2, (H, 4 * H), jnp.float32, -k, k)
        b_ih = jax.random.uniform(k3, (4 * H,), jnp.float32, -k, k)
        b_hh = jax.random.uniform(k4, (4 * H,), jnp.float32, -k, k)
        bias = (b_ih + b_hh).reshape(1, 4 * H)
        params["lstm"].append((w_ih, w_hh, bias))
    key, k5, k6 = jax.random.split(key, 3)
    kf = 1.0 / jnp.sqrt(H + 2)
    params["fc_w"] = jax.random.uniform(k5, (H + 2, output_dim), jnp.float32, -kf, kf)
    params["fc_b"] = jax.random.uniform(k6, (output_dim,), jnp.float32, -kf, kf)
    return params


# ------------------------------ Pure-JAX reference -----------------------------

def ref_forward(x_bsd, t, params, hidden_dim):
    B, S, _ = x_bsd.shape
    H = hidden_dim
    inp = x_bsd
    for (w_ih, w_hh, b) in params["lstm"]:
        h = jnp.zeros((B, H), jnp.float32)
        c = jnp.zeros((B, H), jnp.float32)
        outs = []
        for s in range(S):
            gates = inp[:, s] @ w_ih + h @ w_hh + b[0]
            i = jax.nn.sigmoid(gates[:, :H])
            f = jax.nn.sigmoid(gates[:, H:2 * H])
            g = jnp.tanh(gates[:, 2 * H:3 * H])
            o = jax.nn.sigmoid(gates[:, 3 * H:])
            c = f * c + i * g
            h = o * jnp.tanh(c)
            outs.append(h)
        inp = jnp.stack(outs, axis=1)
    comb = jnp.concatenate([inp[:, -1], t], axis=-1)
    return comb @ params["fc_w"] + params["fc_b"]


# ------------------------------------ main -------------------------------------

if __name__ == "__main__":
    INPUT_DIM, HIDDEN_DIM, OUTPUT_DIM, NUM_LAYERS = 16, 32, 4, 2
    B, S = 2, 8

    key = jax.random.PRNGKey(0)
    key, kx, kt = jax.random.split(key, 3)
    x = jax.random.normal(kx, (B, S, INPUT_DIM), jnp.float32)   # batch-first
    t = jax.random.normal(kt, (B, 2), jnp.float32)

    params = init_params(key, INPUT_DIM, HIDDEN_DIM, OUTPUT_DIM, NUM_LAYERS)

    out = lstm_model_forward(x, t, params, INPUT_DIM, HIDDEN_DIM)
    out = jax.block_until_ready(out)

    ref = ref_forward(x, t, params, HIDDEN_DIM)
    assert out.shape == (B, OUTPUT_DIM)
    assert jnp.allclose(out, ref, atol=1e-5, rtol=1e-5), (out, ref)

    print("KERNEL_OK")
</pallas_src>

<mosaic_0001>
module attributes {stable_mosaic.version = 11 : i64} {
  func.func @_fused_lstm_kernel(%arg0: memref<2x8x16xf32, #tpu.memory_space<vmem>>, %arg1: memref<2x2xf32, #tpu.memory_space<vmem>>, %arg2: memref<128x128xf32, #tpu.memory_space<vmem>>, %arg3: memref<35x4xf32, #tpu.memory_space<vmem>>, %arg4: memref<2x4xf32, #tpu.memory_space<vmem>>) attributes {dimension_semantics = [], scalar_prefetch = 0 : i64, scratch_operands = 0 : i64, tpu.core_type = #tpu.core_type<tc>} {
    %c0 = arith.constant 0 : index
    %c0_0 = arith.constant 0 : index
    %0 = vector.load %arg2[%c0, %c0_0] : memref<128x128xf32, #tpu.memory_space<vmem>>, vector<128x128xf32>
    %c0_1 = arith.constant 0 : index
    %c0_2 = arith.constant 0 : index
    %1 = vector.load %arg3[%c0_1, %c0_2] : memref<35x4xf32, #tpu.memory_space<vmem>>, vector<35x4xf32>
    %c0_3 = arith.constant 0 : index
    %c0_4 = arith.constant 0 : index
    %c0_5 = arith.constant 0 : index
    %2 = vector.load %arg0[%c0_3, %c0_4, %c0_5] : memref<2x8x16xf32, #tpu.memory_space<vmem>>, vector<2x8x16xf32>
    %3 = vector.extract_strided_slice %2 {offsets = [0, 0, 0], sizes = [2, 1, 16], strides = [1, 1, 1]} : vector<2x8x16xf32> to vector<2x1x16xf32>
    %4 = vector.shape_cast %3 : vector<2x1x16xf32> to vector<2x16xf32>
    %5 = vector.extract_strided_slice %2 {offsets = [0, 1, 0], sizes = [2, 1, 16], strides = [1, 1, 1]} : vector<2x8x16xf32> to vector<2x1x16xf32>
    %6 = vector.shape_cast %5 : vector<2x1x16xf32> to vector<2x16xf32>
    %7 = vector.extract_strided_slice %2 {offsets = [0, 2, 0], sizes = [2, 1, 16], strides = [1, 1, 1]} : vector<2x8x16xf32> to vector<2x1x16xf32>
    %8 = vector.shape_cast %7 : vector<2x1x16xf32> to vector<2x16xf32>
    %9 = vector.extract_strided_slice %2 {offsets = [0, 3, 0], sizes = [2, 1, 16], strides = [1, 1, 1]} : vector<2x8x16xf32> to vector<2x1x16xf32>
    %10 = vector.shape_cast %9 : vector<2x1x16xf32> to vector<2x16xf32>
    %11 = vector.extract_strided_slice %2 {offsets = [0, 4, 0], sizes = [2, 1, 16], strides = [1, 1, 1]} : vector<2x8x16xf32> to vector<2x1x16xf32>
    %12 = vector.shape_cast %11 : vector<2x1x16xf32> to vector<2x16xf32>
    %13 = vector.extract_strided_slice %2 {offsets = [0, 5, 0], sizes = [2, 1, 16], strides = [1, 1, 1]} : vector<2x8x16xf32> to vector<2x1x16xf32>
    %14 = vector.shape_cast %13 : vector<2x1x16xf32> to vector<2x16xf32>
    %15 = vector.extract_strided_slice %2 {offsets = [0, 6, 0], sizes = [2, 1, 16], strides = [1, 1, 1]} : vector<2x8x16xf32> to vector<2x1x16xf32>
    %16 = vector.shape_cast %15 : vector<2x1x16xf32> to vector<2x16xf32>
    %17 = vector.extract_strided_slice %2 {offsets = [0, 7, 0], sizes = [2, 1, 16], strides = [1, 1, 1]} : vector<2x8x16xf32> to vector<2x1x16xf32>
    %18 = vector.shape_cast %17 : vector<2x1x16xf32> to vector<2x16xf32>
    %19 = tpu.concatenate %4, %6, %8, %10, %12, %14, %16, %18 in 0 : vector<2x16xf32>, vector<2x16xf32>, vector<2x16xf32>, vector<2x16xf32>, vector<2x16xf32>, vector<2x16xf32>, vector<2x16xf32>, vector<2x16xf32> -> vector<16x16xf32>
    %20 = vector.extract_strided_slice %0 {offsets = [0, 0], sizes = [16, 32], strides = [1, 1]} : vector<128x128xf32> to vector<16x32xf32>
    %21 = vector.extract_strided_slice %0 {offsets = [16, 0], sizes = [32, 32], strides = [1, 1]} : vector<128x128xf32> to vector<32x32xf32>
    %22 = vector.extract_strided_slice %0 {offsets = [48, 0], sizes = [1, 32], strides = [1, 1]} : vector<128x128xf32> to vector<1x32xf32>
    %cst = arith.constant dense<0.000000e+00> : vector<16x32xf32>
    %23 = tpu.matmul %19, %20, %cst {dimension_numbers = #tpu.dot_dimension_numbers<[1], [0], [0], [1], [0, 0, 1, 1], [], []>} : vector<16x16xf32>, vector<16x32xf32>, vector<16x32xf32> -> vector<16x32xf32>
    %24 = vector.broadcast %22 : vector<1x32xf32> to vector<16x32xf32>
    %25 = arith.addf %23, %24 : vector<16x32xf32>
    %26 = vector.extract_strided_slice %0 {offsets = [0, 32], sizes = [16, 32], strides = [1, 1]} : vector<128x128xf32> to vector<16x32xf32>
    %27 = vector.extract_strided_slice %0 {offsets = [16, 32], sizes = [32, 32], strides = [1, 1]} : vector<128x128xf32> to vector<32x32xf32>
    %28 = vector.extract_strided_slice %0 {offsets = [48, 32], sizes = [1, 32], strides = [1, 1]} : vector<128x128xf32> to vector<1x32xf32>
    %cst_6 = arith.constant dense<0.000000e+00> : vector<16x32xf32>
    %29 = tpu.matmul %19, %26, %cst_6 {dimension_numbers = #tpu.dot_dimension_numbers<[1], [0], [0], [1], [0, 0, 1, 1], [], []>} : vector<16x16xf32>, vector<16x32xf32>, vector<16x32xf32> -> vector<16x32xf32>
    %30 = vector.broadcast %28 : vector<1x32xf32> to vector<16x32xf32>
    %31 = arith.addf %29, %30 : vector<16x32xf32>
    %32 = vector.extract_strided_slice %0 {offsets = [0, 64], sizes = [16, 32], strides = [1, 1]} : vector<128x128xf32> to vector<16x32xf32>
    %33 = vector.extract_strided_slice %0 {offsets = [16, 64], sizes = [32, 32], strides = [1, 1]} : vector<128x128xf32> to vector<32x32xf32>
    %34 = vector.extract_strided_slice %0 {offsets = [48, 64], sizes = [1, 32], strides = [1, 1]} : vector<128x128xf32> to vector<1x32xf32>
    %cst_7 = arith.constant dense<0.000000e+00> : vector<16x32xf32>
    %35 = tpu.matmul %19, %32, %cst_7 {dimension_numbers = #tpu.dot_dimension_numbers<[1], [0], [0], [1], [0, 0, 1, 1], [], []>} : vector<16x16xf32>, vector<16x32xf32>, vector<16x32xf32> -> vector<16x32xf32>
    %36 = vector.broadcast %34 : vector<1x32xf32> to vector<16x32xf32>
    %37 = arith.addf %35, %36 : vector<16x32xf32>
    %38 = vector.extract_strided_slice %0 {offsets = [0, 96], sizes = [16, 32], strides = [1, 1]} : vector<128x128xf32> to vector<16x32xf32>
    %39 = vector.extract_strided_slice %0 {offsets = [16, 96], sizes = [32, 32], strides = [1, 1]} : vector<128x128xf32> to vector<32x32xf32>
    %40 = vector.extract_strided_slice %0 {offsets = [48, 96], sizes = [1, 32], strides = [1, 1]} : vector<128x128xf32> to vector<1x32xf32>
    %cst_8 = arith.constant dense<0.000000e+00> : vector<16x32xf32>
    %41 = tpu.matmul %19, %38, %cst_8 {dimension_numbers = #tpu.dot_dimension_numbers<[1], [0], [0], [1], [0, 0, 1, 1], [], []>} : vector<16x16xf32>, vector<16x32xf32>, vector<16x32xf32> -> vector<16x32xf32>
    %42 = vector.broadcast %40 : vector<1x32xf32> to vector<16x32xf32>
    %43 = arith.addf %41, %42 : vector<16x32xf32>
    %cst_9 = arith.constant 0.000000e+00 : f32
    %44 = vector.broadcast %cst_9 : f32 to vector<2x32xf32>
    %cst_10 = arith.constant 0.000000e+00 : f32
    %45 = vector.broadcast %cst_10 : f32 to vector<2x32xf32>
    %46 = vector.extract_strided_slice %25 {offsets = [0, 0], sizes = [2, 32], strides = [1, 1]} : vector<16x32xf32> to vector<2x32xf32>
    %cst_11 = arith.constant dense<0.000000e+00> : vector<2x32xf32>
    %47 = tpu.matmul %44, %21, %cst_11 {dimension_numbers = #tpu.dot_dimension_numbers<[1], [0], [0], [1], [0, 0, 1, 1], [], []>} : vector<2x32xf32>, vector<32x32xf32>, vector<2x32xf32> -> vector<2x32xf32>
    %48 = arith.addf %46, %47 : vector<2x32xf32>
    %49 = arith.negf %48 : vector<2x32xf32>
    %50 = math.exp %49 : vector<2x32xf32>
    %cst_12 = arith.constant 1.000000e+00 : f32
    %51 = vector.broadcast %cst_12 : f32 to vector<2x32xf32>
    %52 = arith.addf %51, %50 : vector<2x32xf32>
    %53 = arith.divf %51, %52 : vector<2x32xf32>
    %54 = vector.extract_strided_slice %31 {offsets = [0, 0], sizes = [2, 32], strides = [1, 1]} : vector<16x32xf32> to vector<2x32xf32>
    %cst_13 = arith.constant dense<0.000000e+00> : vector<2x32xf32>
    %55 = tpu.matmul %44, %27, %cst_13 {dimension_numbers = #tpu.dot_dimension_numbers<[1], [0], [0], [1], [0, 0, 1, 1], [], []>} : vector<2x32xf32>, vector<32x32xf32>, vector<2x32xf32> -> vector<2x32xf32>
    %56 = arith.addf %54, %55 : vector<2x32xf32>
    %57 = arith.negf %56 : vector<2x32xf32>
    %58 = math.exp %57 : vector<2x32xf32>
    %cst_14 = arith.constant 1.000000e+00 : f32
    %59 = vector.broadcast %cst_14 : f32 to vector<2x32xf32>
    %60 = arith.addf %59, %58 : vector<2x32xf32>
    %61 = arith.divf %59, %60 : vector<2x32xf32>
    %62 = vector.extract_strided_slice %37 {offsets = [0, 0], sizes = [2, 32], strides = [1, 1]} : vector<16x32xf32> to vector<2x32xf32>
    %cst_15 = arith.constant dense<0.000000e+00> : vector<2x32xf32>
    %63 = tpu.matmul %44, %33, %cst_15 {dimension_numbers = #tpu.dot_dimension_numbers<[1], [0], [0], [1], [0, 0, 1, 1], [], []>} : vector<2x32xf32>, vector<32x32xf32>, vector<2x32xf32> -> vector<2x32xf32>
    %64 = arith.addf %62, %63 : vector<2x32xf32>
    %65 = math.tanh %64 : vector<2x32xf32>
    %66 = vector.extract_strided_slice %43 {offsets = [0, 0], sizes = [2, 32], strides = [1, 1]} : vector<16x32xf32> to vector<2x32xf32>
    %cst_16 = arith.constant dense<0.000000e+00> : vector<2x32xf32>
    %67 = tpu.matmul %44, %39, %cst_16 {dimension_numbers = #tpu.dot_dimension_numbers<[1], [0], [0], [1], [0, 0, 1, 1], [], []>} : vector<2x32xf32>, vector<32x32xf32>, vector<2x32xf32> -> vector<2x32xf32>
    %68 = arith.addf %66, %67 : vector<2x32xf32>
    %69 = arith.negf %68 : vector<2x32xf32>
    %70 = math.exp %69 : vector<2x32xf32>
    %cst_17 = arith.constant 1.000000e+00 : f32
    %71 = vector.broadcast %cst_17 : f32 to vector<2x32xf32>
    %72 = arith.addf %71, %70 : vector<2x32xf32>
    %73 = arith.divf %71, %72 : vector<2x32xf32>
    %74 = arith.mulf %61, %45 : vector<2x32xf32>
    %75 = arith.mulf %53, %65 : vector<2x32xf32>
    %76 = arith.addf %74, %75 : vector<2x32xf32>
    %77 = math.tanh %76 : vector<2x32xf32>
    %78 = arith.mulf %73, %77 : vector<2x32xf32>
    %79 = vector.extract_strided_slice %25 {offsets = [2, 0], sizes = [2, 32], strides = [1, 1]} : vector<16x32xf32> to vector<2x32xf32>
    %cst_18 = arith.constant dense<0.000000e+00> : vector<2x32xf32>
    %80 = tpu.matmul %78, %21, %cst_18 {dimension_numbers = #tpu.dot_dimension_numbers<[1], [0], [0], [1], [0, 0, 1, 1], [], []>} : vector<2x32xf32>, vector<32x32xf32>, vector<2x32xf32> -> vector<2x32xf32>
    %81 = arith.addf %79, %80 : vector<2x32xf32>
    %82 = arith.negf %81 : vector<2x32xf32>
    %83 = math.exp %82 : vector<2x32xf32>
    %cst_19 = arith.constant 1.000000e+00 : f32
    %84 = vector.broadcast %cst_19 : f32 to vector<2x32xf32>
    %85 = arith.addf %84, %83 : vector<2x32xf32>
    %86 = arith.divf %84, %85 : vector<2x32xf32>
    %87 = vector.extract_strided_slice %31 {offsets = [2, 0], sizes = [2, 32], strides = [1, 1]} : vector<16x32xf32> to vector<2x32xf32>
    %cst_20 = arith.constant dense<0.000000e+00> : vector<2x32xf32>
    %88 = tpu.matmul %78, %27, %cst_20 {dimension_numbers = #tpu.dot_dimension_numbers<[1], [0], [0], [1], [0, 0, 1, 1], [], []>} : vector<2x32xf32>, vector<32x32xf32>, vector<2x32xf32> -> vector<2x32xf32>
    %89 = arith.addf %87, %88 : vector<2x32xf32>
    %90 = arith.negf %89 : vector<2x32xf32>
    %91 = math.exp %90 : vector<2x32xf32>
    %cst_21 = arith.constant 1.000000e+00 : f32
    %92 = vector.broadcast %cst_21 : f32 to vector<2x32xf32>
    %93 = arith.addf %92, %91 : vector<2x32xf32>
    %94 = arith.divf %92, %93 : vector<2x32xf32>
    %95 = vector.extract_strided_slice %37 {offsets = [2, 0], sizes = [2, 32], strides = [1, 1]} : vector<16x32xf32> to vector<2x32xf32>
    %cst_22 = arith.constant dense<0.000000e+00> : vector<2x32xf32>
    %96 = tpu.matmul %78, %33, %cst_22 {dimension_numbers = #tpu.dot_dimension_numbers<[1], [0], [0], [1], [0, 0, 1, 1], [], []>} : vector<2x32xf32>, vector<32x32xf32>, vector<2x32xf32> -> vector<2x32xf32>
    %97 = arith.addf %95, %96 : vector<2x32xf32>
    %98 = math.tanh %97 : vector<2x32xf32>
    %99 = vector.extract_strided_slice %43 {offsets = [2, 0], sizes = [2, 32], strides = [1, 1]} : vector<16x32xf32> to vector<2x32xf32>
    %cst_23 = arith.constant dense<0.000000e+00> : vector<2x32xf32>
    %100 = tpu.matmul %78, %39, %cst_23 {dimension_numbers = #tpu.dot_dimension_numbers<[1], [0], [0], [1], [0, 0, 1, 1], [], []>} : vector<2x32xf32>, vector<32x32xf32>, vector<2x32xf32> -> vector<2x32xf32>
    %101 = arith.addf %99, %100 : vector<2x32xf32>
    %102 = arith.negf %101 : vector<2x32xf32>
    %103 = math.exp %102 : vector<2x32xf32>
    %cst_24 = arith.constant 1.000000e+00 : f32
    %104 = vector.broadcast %cst_24 : f32 to vector<2x32xf32>
    %105 = arith.addf %104, %103 : vector<2x32xf32>
    %106 = arith.divf %104, %105 : vector<2x32xf32>
    %107 = arith.mulf %94, %76 : vector<2x32xf32>
    %108 = arith.mulf %86, %98 : vector<2x32xf32>
    %109 = arith.addf %107, %108 : vector<2x32xf32>
    %110 = math.tanh %109 : vector<2x32xf32>
    %111 = arith.mulf %106, %110 : vector<2x32xf32>
    %112 = vector.extract_strided_slice %25 {offsets = [4, 0], sizes = [2, 32], strides = [1, 1]} : vector<16x32xf32> to vector<2x32xf32>
    %cst_25 = arith.constant dense<0.000000e+00> : vector<2x32xf32>
    %113 = tpu.matmul %111, %21, %cst_25 {dimension_numbers = #tpu.dot_dimension_numbers<[1], [0], [0], [1], [0, 0, 1, 1], [], []>} : vector<2x32xf32>, vector<32x32xf32>, vector<2x32xf32> -> vector<2x32xf32>
    %114 = arith.addf %112, %113 : vector<2x32xf32>
    %115 = arith.negf %114 : vector<2x32xf32>
    %116 = math.exp %115 : vector<2x32xf32>
    %cst_26 = arith.constant 1.000000e+00 : f32
    %117 = vector.broadcast %cst_26 : f32 to vector<2x32xf32>
    %118 = arith.addf %117, %116 : vector<2x32xf32>
    %119 = arith.divf %117, %118 : vector<2x32xf32>
    %120 = vector.extract_strided_slice %31 {offsets = [4, 0], sizes = [2, 32], strides = [1, 1]} : vector<16x32xf32> to vector<2x32xf32>
    %cst_27 = arith.constant dense<0.000000e+00> : vector<2x32xf32>
    %121 = tpu.matmul %111, %27, %cst_27 {dimension_numbers = #tpu.dot_dimension_numbers<[1], [0], [0], [1], [0, 0, 1, 1], [], []>} : vector<2x32xf32>, vector<32x32xf32>, vector<2x32xf32> -> vector<2x32xf32>
    %122 = arith.addf %120, %121 : vector<2x32xf32>
    %123 = arith.negf %122 : vector<2x32xf32>
    %124 = math.exp %123 : vector<2x32xf32>
    %cst_28 = arith.constant 1.000000e+00 : f32
    %125 = vector.broadcast %cst_28 : f32 to vector<2x32xf32>
    %126 = arith.addf %125, %124 : vector<2x32xf32>
    %127 = arith.divf %125, %126 : vector<2x32xf32>
    %128 = vector.extract_strided_slice %37 {offsets = [4, 0], sizes = [2, 32], strides = [1, 1]} : vector<16x32xf32> to vector<2x32xf32>
    %cst_29 = arith.constant dense<0.000000e+00> : vector<2x32xf32>
    %129 = tpu.matmul %111, %33, %cst_29 {dimension_numbers = #tpu.dot_dimension_numbers<[1], [0], [0], [1], [0, 0, 1, 1], [], []>} : vector<2x32xf32>, vector<32x32xf32>, vector<2x32xf32> -> vector<2x32xf32>
    %130 = arith.addf %128, %129 : vector<2x32xf32>
    %131 = math.tanh %130 : vector<2x32xf32>
    %132 = vector.extract_strided_slice %43 {offsets = [4, 0], sizes = [2, 32], strides = [1, 1]} : vector<16x32xf32> to vector<2x32xf32>
    %cst_30 = arith.constant dense<0.000000e+00> : vector<2x32xf32>
    %133 = tpu.matmul %111, %39, %cst_30 {dimension_numbers = #tpu.dot_dimension_numbers<[1], [0], [0], [1], [0, 0, 1, 1], [], []>} : vector<2x32xf32>, vector<32x32xf32>, vector<2x32xf32> -> vector<2x32xf32>
    %134 = arith.addf %132, %133 : vector<2x32xf32>
    %135 = arith.negf %134 : vector<2x32xf32>
    %136 = math.exp %135 : vector<2x32xf32>
    %cst_31 = arith.constant 1.000000e+00 : f32
    %137 = vector.broadcast %cst_31 : f32 to vector<2x32xf32>
    %138 = arith.addf %137, %136 : vector<2x32xf32>
    %139 = arith.divf %137, %138 : vector<2x32xf32>
    %140 = arith.mulf %127, %109 : vector<2x32xf32>
    %141 = arith.mulf %119, %131 : vector<2x32xf32>
    %142 = arith.addf %140, %141 : vector<2x32xf32>
    %143 = math.tanh %142 : vector<2x32xf32>
    %144 = arith.mulf %139, %143 : vector<2x32xf32>
    %145 = vector.extract_strided_slice %25 {offsets = [6, 0], sizes = [2, 32], strides = [1, 1]} : vector<16x32xf32> to vector<2x32xf32>
    %cst_32 = arith.constant dense<0.000000e+00> : vector<2x32xf32>
    %146 = tpu.matmul %144, %21, %cst_32 {dimension_numbers = #tpu.dot_dimension_numbers<[1], [0], [0], [1], [0, 0, 1, 1], [], []>} : vector<2x32xf32>, vector<32x32xf32>, vector<2x32xf32> -> vector<2x32xf32>
    %147 = arith.addf %145, %146 : vector<2x32xf32>
    %148 = arith.negf %147 : vector<2x32xf32>
    %149 = math.exp %148 : vector<2x32xf32>
    %cst_33 = arith.constant 1.000000e+00 : f32
    %150 = vector.broadcast %cst_33 : f32 to vector<2x32xf32>
    %151 = arith.addf %150, %149 : vector<2x32xf32>
    %152 = arith.divf %150, %151 : vector<2x32xf32>
    %153 = vector.extract_strided_slice %31 {offsets = [6, 0], sizes = [2, 32], strides = [1, 1]} : vector<16x32xf32> to vector<2x32xf32>
    %cst_34 = arith.constant dense<0.000000e+00> : vector<2x32xf32>
    %154 = tpu.matmul %144, %27, %cst_34 {dimension_numbers = #tpu.dot_dimension_numbers<[1], [0], [0], [1], [0, 0, 1, 1], [], []>} : vector<2x32xf32>, vector<32x32xf32>, vector<2x32xf32> -> vector<2x32xf32>
    %155 = arith.addf %153, %154 : vector<2x32xf32>
    %156 = arith.negf %155 : vector<2x32xf32>
    %157 = math.exp %156 : vector<2x32xf32>
    %cst_35 = arith.constant 1.000000e+00 : f32
    %158 = vector.broadcast %cst_35 : f32 to vector<2x32xf32>
    %159 = arith.addf %158, %157 : vector<2x32xf32>
    %160 = arith.divf %158, %159 : vector<2x32xf32>
    %161 = vector.extract_strided_slice %37 {offsets = [6, 0], sizes = [2, 32], strides = [1, 1]} : vector<16x32xf32> to vector<2x32xf32>
    %cst_36 = arith.constant dense<0.000000e+00> : vector<2x32xf32>
    %162 = tpu.matmul %144, %33, %cst_36 {dimension_numbers = #tpu.dot_dimension_numbers<[1], [0], [0], [1], [0, 0, 1, 1], [], []>} : vector<2x32xf32>, vector<32x32xf32>, vector<2x32xf32> -> vector<2x32xf32>
    %163 = arith.addf %161, %162 : vector<2x32xf32>
    %164 = math.tanh %163 : vector<2x32xf32>
    %165 = vector.extract_strided_slice %43 {offsets = [6, 0], sizes = [2, 32], strides = [1, 1]} : vector<16x32xf32> to vector<2x32xf32>
    %cst_37 = arith.constant dense<0.000000e+00> : vector<2x32xf32>
    %166 = tpu.matmul %144, %39, %cst_37 {dimension_numbers = #tpu.dot_dimension_numbers<[1], [0], [0], [1], [0, 0, 1, 1], [], []>} : vector<2x32xf32>, vector<32x32xf32>, vector<2x32xf32> -> vector<2x32xf32>
    %167 = arith.addf %165, %166 : vector<2x32xf32>
    %168 = arith.negf %167 : vector<2x32xf32>
    %169 = math.exp %168 : vector<2x32xf32>
    %cst_38 = arith.constant 1.000000e+00 : f32
    %170 = vector.broadcast %cst_38 : f32 to vector<2x32xf32>
    %171 = arith.addf %170, %169 : vector<2x32xf32>
    %172 = arith.divf %170, %171 : vector<2x32xf32>
    %173 = arith.mulf %160, %142 : vector<2x32xf32>
    %174 = arith.mulf %152, %164 : vector<2x32xf32>
    %175 = arith.addf %173, %174 : vector<2x32xf32>
    %176 = math.tanh %175 : vector<2x32xf32>
    %177 = arith.mulf %172, %176 : vector<2x32xf32>
    %178 = vector.extract_strided_slice %25 {offsets = [8, 0], sizes = [2, 32], strides = [1, 1]} : vector<16x32xf32> to vector<2x32xf32>
    %cst_39 = arith.constant dense<0.000000e+00> : vector<2x32xf32>
    %179 = tpu.matmul %177, %21, %cst_39 {dimension_numbers = #tpu.dot_dimension_numbers<[1], [0], [0], [1], [0, 0, 1, 1], [], []>} : vector<2x32xf32>, vector<32x32xf32>, vector<2x32xf32> -> vector<2x32xf32>
    %180 = arith.addf %178, %179 : vector<2x32xf32>
    %181 = arith.negf %180 : vector<2x32xf32>
    %182 = math.exp %181 : vector<2x32xf32>
    %cst_40 = arith.constant 1.000000e+00 : f32
    %183 = vector.broadcast %cst_40 : f32 to vector<2x32xf32>
    %184 = arith.addf %183, %182 : vector<2x32xf32>
    %185 = arith.divf %183, %184 : vector<2x32xf32>
    %186 = vector.extract_strided_slice %31 {offsets = [8, 0], sizes = [2, 32], strides = [1, 1]} : vector<16x32xf32> to vector<2x32xf32>
    %cst_41 = arith.constant dense<0.000000e+00> : vector<2x32xf32>
    %187 = tpu.matmul %177, %27, %cst_41 {dimension_numbers = #tpu.dot_dimension_numbers<[1], [0], [0], [1], [0, 0, 1, 1], [], []>} : vector<2x32xf32>, vector<32x32xf32>, vector<2x32xf32> -> vector<2x32xf32>
    %188 = arith.addf %186, %187 : vector<2x32xf32>
    %189 = arith.negf %188 : vector<2x32xf32>
    %190 = math.exp %189 : vector<2x32xf32>
    %cst_42 = arith.constant 1.000000e+00 : f32
    %191 = vector.broadcast %cst_42 : f32 to vector<2x32xf32>
    %192 = arith.addf %191, %190 : vector<2x32xf32>
    %193 = arith.divf %191, %192 : vector<2x32xf32>
    %194 = vector.extract_strided_slice %37 {offsets = [8, 0], sizes = [2, 32], strides = [1, 1]} : vector<16x32xf32> to vector<2x32xf32>
    %cst_43 = arith.constant dense<0.000000e+00> : vector<2x32xf32>
    %195 = tpu.matmul %177, %33, %cst_43 {dimension_numbers = #tpu.dot_dimension_numbers<[1], [0], [0], [1], [0, 0, 1, 1], [], []>} : vector<2x32xf32>, vector<32x32xf32>, vector<2x32xf32> -> vector<2x32xf32>
    %196 = arith.addf %194, %195 : vector<2x32xf32>
    %197 = math.tanh %196 : vector<2x32xf32>
    %198 = vector.extract_strided_slice %43 {offsets = [8, 0], sizes = [2, 32], strides = [1, 1]} : vector<16x32xf32> to vector<2x32xf32>
    %cst_44 = arith.constant dense<0.000000e+00> : vector<2x32xf32>
    %199 = tpu.matmul %177, %39, %cst_44 {dimension_numbers = #tpu.dot_dimension_numbers<[1], [0], [0], [1], [0, 0, 1, 1], [], []>} : vector<2x32xf32>, vector<32x32xf32>, vector<2x32xf32> -> vector<2x32xf32>
    %200 = arith.addf %198, %199 : vector<2x32xf32>
    %201 = arith.negf %200 : vector<2x32xf32>
    %202 = math.exp %201 : vector<2x32xf32>
    %cst_45 = arith.constant 1.000000e+00 : f32
    %203 = vector.broadcast %cst_45 : f32 to vector<2x32xf32>
    %204 = arith.addf %203, %202 : vector<2x32xf32>
    %205 = arith.divf %203, %204 : vector<2x32xf32>
    %206 = arith.mulf %193, %175 : vector<2x32xf32>
    %207 = arith.mulf %185, %197 : vector<2x32xf32>
    %208 = arith.addf %206, %207 : vector<2x32xf32>
    %209 = math.tanh %208 : vector<2x32xf32>
    %210 = arith.mulf %205, %209 : vector<2x32xf32>
    %211 = vector.extract_strided_slice %25 {offsets = [10, 0], sizes = [2, 32], strides = [1, 1]} : vector<16x32xf32> to vector<2x32xf32>
    %cst_46 = arith.constant dense<0.000000e+00> : vector<2x32xf32>
    %212 = tpu.matmul %210, %21, %cst_46 {dimension_numbers = #tpu.dot_dimension_numbers<[1], [0], [0], [1], [0, 0, 1, 1], [], []>} : vector<2x32xf32>, vector<32x32xf32>, vector<2x32xf32> -> vector<2x32xf32>
    %213 = arith.addf %211, %212 : vector<2x32xf32>
    %214 = arith.negf %213 : vector<2x32xf32>
    %215 = math.exp %214 : vector<2x32xf32>
    %cst_47 = arith.constant 1.000000e+00 : f32
    %216 = vector.broadcast %cst_47 : f32 to vector<2x32xf32>
    %217 = arith.addf %216, %215 : vector<2x32xf32>
    %218 = arith.divf %216, %217 : vector<2x32xf32>
    %219 = vector.extract_strided_slice %31 {offsets = [10, 0], sizes = [2, 32], strides = [1, 1]} : vector<16x32xf32> to vector<2x32xf32>
    %cst_48 = arith.constant dense<0.000000e+00> : vector<2x32xf32>
    %220 = tpu.matmul %210, %27, %cst_48 {dimension_numbers = #tpu.dot_dimension_numbers<[1], [0], [0], [1], [0, 0, 1, 1], [], []>} : vector<2x32xf32>, vector<32x32xf32>, vector<2x32xf32> -> vector<2x32xf32>
    %221 = arith.addf %219, %220 : vector<2x32xf32>
    %222 = arith.negf %221 : vector<2x32xf32>
    %223 = math.exp %222 : vector<2x32xf32>
    %cst_49 = arith.constant 1.000000e+00 : f32
    %224 = vector.broadcast %cst_49 : f32 to vector<2x32xf32>
    %225 = arith.addf %224, %223 : vector<2x32xf32>
    %226 = arith.divf %224, %225 : vector<2x32xf32>
    %227 = vector.extract_strided_slice %37 {offsets = [10, 0], sizes = [2, 32], strides = [1, 1]} : vector<16x32xf32> to vector<2x32xf32>
    %cst_50 = arith.constant dense<0.000000e+00> : vector<2x32xf32>
    %228 = tpu.matmul %210, %33, %cst_50 {dimension_numbers = #tpu.dot_dimension_numbers<[1], [0], [0], [1], [0, 0, 1, 1], [], []>} : vector<2x32xf32>, vector<32x32xf32>, vector<2x32xf32> -> vector<2x32xf32>
    %229 = arith.addf %227, %228 : vector<2x32xf32>
    %230 = math.tanh %229 : vector<2x32xf32>
    %231 = vector.extract_strided_slice %43 {offsets = [10, 0], sizes = [2, 32], strides = [1, 1]} : vector<16x32xf32> to vector<2x32xf32>
    %cst_51 = arith.constant dense<0.000000e+00> : vector<2x32xf32>
    %232 = tpu.matmul %210, %39, %cst_51 {dimension_numbers = #tpu.dot_dimension_numbers<[1], [0], [0], [1], [0, 0, 1, 1], [], []>} : vector<2x32xf32>, vector<32x32xf32>, vector<2x32xf32> -> vector<2x32xf32>
    %233 = arith.addf %231, %232 : vector<2x32xf32>
    %234 = arith.negf %233 : vector<2x32xf32>
    %235 = math.exp %234 : vector<2x32xf32>
    %cst_52 = arith.constant 1.000000e+00 : f32
    %236 = vector.broadcast %cst_52 : f32 to vector<2x32xf32>
    %237 = arith.addf %236, %235 : vector<2x32xf32>
    %238 = arith.divf %236, %237 : vector<2x32xf32>
    %239 = arith.mulf %226, %208 : vector<2x32xf32>
    %240 = arith.mulf %218, %230 : vector<2x32xf32>
    %241 = arith.addf %239, %240 : vector<2x32xf32>
    %242 = math.tanh %241 : vector<2x32xf32>
    %243 = arith.mulf %238, %242 : vector<2x32xf32>
    %244 = vector.extract_strided_slice %25 {offsets = [12, 0], sizes = [2, 32], strides = [1, 1]} : vector<16x32xf32> to vector<2x32xf32>
    %cst_53 = arith.constant dense<0.000000e+00> : vector<2x32xf32>
    %245 = tpu.matmul %243, %21, %cst_53 {dimension_numbers = #tpu.dot_dimension_numbers<[1], [0], [0], [1], [0, 0, 1, 1], [], []>} : vector<2x32xf32>, vector<32x32xf32>, vector<2x32xf32> -> vector<2x32xf32>
    %246 = arith.addf %244, %245 : vector<2x32xf32>
    %247 = arith.negf %246 : vector<2x32xf32>
    %248 = math.exp %247 : vector<2x32xf32>
    %cst_54 = arith.constant 1.000000e+00 : f32
    %249 = vector.broadcast %cst_54 : f32 to vector<2x32xf32>
    %250 = arith.addf %249, %248 : vector<2x32xf32>
    %251 = arith.divf %249, %250 : vector<2x32xf32>
    %252 = vector.extract_strided_slice %31 {offsets = [12, 0], sizes = [2, 32], strides = [1, 1]} : vector<16x32xf32> to vector<2x32xf32>
    %cst_55 = arith.constant dense<0.000000e+00> : vector<2x32xf32>
    %253 = tpu.matmul %243, %27, %cst_55 {dimension_numbers = #tpu.dot_dimension_numbers<[1], [0], [0], [1], [0, 0, 1, 1], [], []>} : vector<2x32xf32>, vector<32x32xf32>, vector<2x32xf32> -> vector<2x32xf32>
    %254 = arith.addf %252, %253 : vector<2x32xf32>
    %255 = arith.negf %254 : vector<2x32xf32>
    %256 = math.exp %255 : vector<2x32xf32>
    %cst_56 = arith.constant 1.000000e+00 : f32
    %257 = vector.broadcast %cst_56 : f32 to vector<2x32xf32>
    %258 = arith.addf %257, %256 : vector<2x32xf32>
    %259 = arith.divf %257, %258 : vector<2x32xf32>
    %260 = vector.extract_strided_slice %37 {offsets = [12, 0], sizes = [2, 32], strides = [1, 1]} : vector<16x32xf32> to vector<2x32xf32>
    %cst_57 = arith.constant dense<0.000000e+00> : vector<2x32xf32>
    %261 = tpu.matmul %243, %33, %cst_57 {dimension_numbers = #tpu.dot_dimension_numbers<[1], [0], [0], [1], [0, 0, 1, 1], [], []>} : vector<2x32xf32>, vector<32x32xf32>, vector<2x32xf32> -> vector<2x32xf32>
    %262 = arith.addf %260, %261 : vector<2x32xf32>
    %263 = math.tanh %262 : vector<2x32xf32>
    %264 = vector.extract_strided_slice %43 {offsets = [12, 0], sizes = [2, 32], strides = [1, 1]} : vector<16x32xf32> to vector<2x32xf32>
    %cst_58 = arith.constant dense<0.000000e+00> : vector<2x32xf32>
    %265 = tpu.matmul %243, %39, %cst_58 {dimension_numbers = #tpu.dot_dimension_numbers<[1], [0], [0], [1], [0, 0, 1, 1], [], []>} : vector<2x32xf32>, vector<32x32xf32>, vector<2x32xf32> -> vector<2x32xf32>
    %266 = arith.addf %264, %265 : vector<2x32xf32>
    %267 = arith.negf %266 : vector<2x32xf32>
    %268 = math.exp %267 : vector<2x32xf32>
    %cst_59 = arith.constant 1.000000e+00 : f32
    %269 = vector.broadcast %cst_59 : f32 to vector<2x32xf32>
    %270 = arith.addf %269, %268 : vector<2x32xf32>
    %271 = arith.divf %269, %270 : vector<2x32xf32>
    %272 = arith.mulf %259, %241 : vector<2x32xf32>
    %273 = arith.mulf %251, %263 : vector<2x32xf32>
    %274 = arith.addf %272, %273 : vector<2x32xf32>
    %275 = math.tanh %274 : vector<2x32xf32>
    %276 = arith.mulf %271, %275 : vector<2x32xf32>
    %277 = vector.extract_strided_slice %25 {offsets = [14, 0], sizes = [2, 32], strides = [1, 1]} : vector<16x32xf32> to vector<2x32xf32>
    %cst_60 = arith.constant dense<0.000000e+00> : vector<2x32xf32>
    %278 = tpu.matmul %276, %21, %cst_60 {dimension_numbers = #tpu.dot_dimension_numbers<[1], [0], [0], [1], [0, 0, 1, 1], [], []>} : vector<2x32xf32>, vector<32x32xf32>, vector<2x32xf32> -> vector<2x32xf32>
    %279 = arith.addf %277, %278 : vector<2x32xf32>
    %280 = arith.negf %279 : vector<2x32xf32>
    %281 = math.exp %280 : vector<2x32xf32>
    %cst_61 = arith.constant 1.000000e+00 : f32
    %282 = vector.broadcast %cst_61 : f32 to vector<2x32xf32>
    %283 = arith.addf %282, %281 : vector<2x32xf32>
    %284 = arith.divf %282, %283 : vector<2x32xf32>
    %285 = vector.extract_strided_slice %31 {offsets = [14, 0], sizes = [2, 32], strides = [1, 1]} : vector<16x32xf32> to vector<2x32xf32>
    %cst_62 = arith.constant dense<0.000000e+00> : vector<2x32xf32>
    %286 = tpu.matmul %276, %27, %cst_62 {dimension_numbers = #tpu.dot_dimension_numbers<[1], [0], [0], [1], [0, 0, 1, 1], [], []>} : vector<2x32xf32>, vector<32x32xf32>, vector<2x32xf32> -> vector<2x32xf32>
    %287 = arith.addf %285, %286 : vector<2x32xf32>
    %288 = arith.negf %287 : vector<2x32xf32>
    %289 = math.exp %288 : vector<2x32xf32>
    %cst_63 = arith.constant 1.000000e+00 : f32
    %290 = vector.broadcast %cst_63 : f32 to vector<2x32xf32>
    %291 = arith.addf %290, %289 : vector<2x32xf32>
    %292 = arith.divf %290, %291 : vector<2x32xf32>
    %293 = vector.extract_strided_slice %37 {offsets = [14, 0], sizes = [2, 32], strides = [1, 1]} : vector<16x32xf32> to vector<2x32xf32>
    %cst_64 = arith.constant dense<0.000000e+00> : vector<2x32xf32>
    %294 = tpu.matmul %276, %33, %cst_64 {dimension_numbers = #tpu.dot_dimension_numbers<[1], [0], [0], [1], [0, 0, 1, 1], [], []>} : vector<2x32xf32>, vector<32x32xf32>, vector<2x32xf32> -> vector<2x32xf32>
    %295 = arith.addf %293, %294 : vector<2x32xf32>
    %296 = math.tanh %295 : vector<2x32xf32>
    %297 = vector.extract_strided_slice %43 {offsets = [14, 0], sizes = [2, 32], strides = [1, 1]} : vector<16x32xf32> to vector<2x32xf32>
    %cst_65 = arith.constant dense<0.000000e+00> : vector<2x32xf32>
    %298 = tpu.matmul %276, %39, %cst_65 {dimension_numbers = #tpu.dot_dimension_numbers<[1], [0], [0], [1], [0, 0, 1, 1], [], []>} : vector<2x32xf32>, vector<32x32xf32>, vector<2x32xf32> -> vector<2x32xf32>
    %299 = arith.addf %297, %298 : vector<2x32xf32>
    %300 = arith.negf %299 : vector<2x32xf32>
    %301 = math.exp %300 : vector<2x32xf32>
    %cst_66 = arith.constant 1.000000e+00 : f32
    %302 = vector.broadcast %cst_66 : f32 to vector<2x32xf32>
    %303 = arith.addf %302, %301 : vector<2x32xf32>
    %304 = arith.divf %302, %303 : vector<2x32xf32>
    %305 = arith.mulf %292, %274 : vector<2x32xf32>
    %306 = arith.mulf %284, %296 : vector<2x32xf32>
    %307 = arith.addf %305, %306 : vector<2x32xf32>
    %308 = math.tanh %307 : vector<2x32xf32>
    %309 = arith.mulf %304, %308 : vector<2x32xf32>
    %310 = tpu.concatenate %78, %111, %144, %177, %210, %243, %276, %309 in 0 : vector<2x32xf32>, vector<2x32xf32>, vector<2x32xf32>, vector<2x32xf32>, vector<2x32xf32>, vector<2x32xf32>, vector<2x32xf32>, vector<2x32xf32> -> vector<16x32xf32>
    %311 = vector.extract_strided_slice %0 {offsets = [56, 0], sizes = [32, 32], strides = [1, 1]} : vector<128x128xf32> to vector<32x32xf32>
    %312 = vector.extract_strided_slice %0 {offsets = [88, 0], sizes = [32, 32], strides = [1, 1]} : vector<128x128xf32> to vector<32x32xf32>
    %313 = vector.extract_strided_slice %0 {offsets = [120, 0], sizes = [1, 32], strides = [1, 1]} : vector<128x128xf32> to vector<1x32xf32>
    %cst_67 = arith.constant dense<0.000000e+00> : vector<16x32xf32>
    %314 = tpu.matmul %310, %311, %cst_67 {dimension_numbers = #tpu.dot_dimension_numbers<[1], [0], [0], [1], [0, 0, 1, 1], [], []>} : vector<16x32xf32>, vector<32x32xf32>, vector<16x32xf32> -> vector<16x32xf32>
    %315 = vector.broadcast %313 : vector<1x32xf32> to vector<16x32xf32>
    %316 = arith.addf %314, %315 : vector<16x32xf32>
    %317 = vector.extract_strided_slice %0 {offsets = [56, 32], sizes = [32, 32], strides = [1, 1]} : vector<128x128xf32> to vector<32x32xf32>
    %318 = vector.extract_strided_slice %0 {offsets = [88, 32], sizes = [32, 32], strides = [1, 1]} : vector<128x128xf32> to vector<32x32xf32>
    %319 = vector.extract_strided_slice %0 {offsets = [120, 32], sizes = [1, 32], strides = [1, 1]} : vector<128x128xf32> to vector<1x32xf32>
    %cst_68 = arith.constant dense<0.000000e+00> : vector<16x32xf32>
    %320 = tpu.matmul %310, %317, %cst_68 {dimension_numbers = #tpu.dot_dimension_numbers<[1], [0], [0], [1], [0, 0, 1, 1], [], []>} : vector<16x32xf32>, vector<32x32xf32>, vector<16x32xf32> -> vector<16x32xf32>
    %321 = vector.broadcast %319 : vector<1x32xf32> to vector<16x32xf32>
    %322 = arith.addf %320, %321 : vector<16x32xf32>
    %323 = vector.extract_strided_slice %0 {offsets = [56, 64], sizes = [32, 32], strides = [1, 1]} : vector<128x128xf32> to vector<32x32xf32>
    %324 = vector.extract_strided_slice %0 {offsets = [88, 64], sizes = [32, 32], strides = [1, 1]} : vector<128x128xf32> to vector<32x32xf32>
    %325 = vector.extract_strided_slice %0 {offsets = [120, 64], sizes = [1, 32], strides = [1, 1]} : vector<128x128xf32> to vector<1x32xf32>
    %cst_69 = arith.constant dense<0.000000e+00> : vector<16x32xf32>
    %326 = tpu.matmul %310, %323, %cst_69 {dimension_numbers = #tpu.dot_dimension_numbers<[1], [0], [0], [1], [0, 0, 1, 1], [], []>} : vector<16x32xf32>, vector<32x32xf32>, vector<16x32xf32> -> vector<16x32xf32>
    %327 = vector.broadcast %325 : vector<1x32xf32> to vector<16x32xf32>
    %328 = arith.addf %326, %327 : vector<16x32xf32>
    %329 = vector.extract_strided_slice %0 {offsets = [56, 96], sizes = [32, 32], strides = [1, 1]} : vector<128x128xf32> to vector<32x32xf32>
    %330 = vector.extract_strided_slice %0 {offsets = [88, 96], sizes = [32, 32], strides = [1, 1]} : vector<128x128xf32> to vector<32x32xf32>
    %331 = vector.extract_strided_slice %0 {offsets = [120, 96], sizes = [1, 32], strides = [1, 1]} : vector<128x128xf32> to vector<1x32xf32>
    %cst_70 = arith.constant dense<0.000000e+00> : vector<16x32xf32>
    %332 = tpu.matmul %310, %329, %cst_70 {dimension_numbers = #tpu.dot_dimension_numbers<[1], [0], [0], [1], [0, 0, 1, 1], [], []>} : vector<16x32xf32>, vector<32x32xf32>, vector<16x32xf32> -> vector<16x32xf32>
    %333 = vector.broadcast %331 : vector<1x32xf32> to vector<16x32xf32>
    %334 = arith.addf %332, %333 : vector<16x32xf32>
    %cst_71 = arith.constant 0.000000e+00 : f32
    %335 = vector.broadcast %cst_71 : f32 to vector<2x32xf32>
    %cst_72 = arith.constant 0.000000e+00 : f32
    %336 = vector.broadcast %cst_72 : f32 to vector<2x32xf32>
    %337 = vector.extract_strided_slice %316 {offsets = [0, 0], sizes = [2, 32], strides = [1, 1]} : vector<16x32xf32> to vector<2x32xf32>
    %cst_73 = arith.constant dense<0.000000e+00> : vector<2x32xf32>
    %338 = tpu.matmul %335, %312, %cst_73 {dimension_numbers = #tpu.dot_dimension_numbers<[1], [0], [0], [1], [0, 0, 1, 1], [], []>} : vector<2x32xf32>, vector<32x32xf32>, vector<2x32xf32> -> vector<2x32xf32>
    %339 = arith.addf %337, %338 : vector<2x32xf32>
    %340 = arith.negf %339 : vector<2x32xf32>
    %341 = math.exp %340 : vector<2x32xf32>
    %cst_74 = arith.constant 1.000000e+00 : f32
    %342 = vector.broadcast %cst_74 : f32 to vector<2x32xf32>
    %343 = arith.addf %342, %341 : vector<2x32xf32>
    %344 = arith.divf %342, %343 : vector<2x32xf32>
    %345 = vector.extract_strided_slice %322 {offsets = [0, 0], sizes = [2, 32], strides = [1, 1]} : vector<16x32xf32> to vector<2x32xf32>
    %cst_75 = arith.constant dense<0.000000e+00> : vector<2x32xf32>
    %346 = tpu.matmul %335, %318, %cst_75 {dimension_numbers = #tpu.dot_dimension_numbers<[1], [0], [0], [1], [0, 0, 1, 1], [], []>} : vector<2x32xf32>, vector<32x32xf32>, vector<2x32xf32> -> vector<2x32xf32>
    %347 = arith.addf %345, %346 : vector<2x32xf32>
    %348 = arith.negf %347 : vector<2x32xf32>
    %349 = math.exp %348 : vector<2x32xf32>
    %cst_76 = arith.constant 1.000000e+00 : f32
    %350 = vector.broadcast %cst_76 : f32 to vector<2x32xf32>
    %351 = arith.addf %350, %349 : vector<2x32xf32>
    %352 = arith.divf %350, %351 : vector<2x32xf32>
    %353 = vector.extract_strided_slice %328 {offsets = [0, 0], sizes = [2, 32], strides = [1, 1]} : vector<16x32xf32> to vector<2x32xf32>
    %cst_77 = arith.constant dense<0.000000e+00> : vector<2x32xf32>
    %354 = tpu.matmul %335, %324, %cst_77 {dimension_numbers = #tpu.dot_dimension_numbers<[1], [0], [0], [1], [0, 0, 1, 1], [], []>} : vector<2x32xf32>, vector<32x32xf32>, vector<2x32xf32> -> vector<2x32xf32>
    %355 = arith.addf %353, %354 : vector<2x32xf32>
    %356 = math.tanh %355 : vector<2x32xf32>
    %357 = vector.extract_strided_slice %334 {offsets = [0, 0], sizes = [2, 32], strides = [1, 1]} : vector<16x32xf32> to vector<2x32xf32>
    %cst_78 = arith.constant dense<0.000000e+00> : vector<2x32xf32>
    %358 = tpu.matmul %335, %330, %cst_78 {dimension_numbers = #tpu.dot_dimension_numbers<[1], [0], [0], [1], [0, 0, 1, 1], [], []>} : vector<2x32xf32>, vector<32x32xf32>, vector<2x32xf32> -> vector<2x32xf32>
    %359 = arith.addf %357, %358 : vector<2x32xf32>
    %360 = arith.negf %359 : vector<2x32xf32>
    %361 = math.exp %360 : vector<2x32xf32>
    %cst_79 = arith.constant 1.000000e+00 : f32
    %362 = vector.broadcast %cst_79 : f32 to vector<2x32xf32>
    %363 = arith.addf %362, %361 : vector<2x32xf32>
    %364 = arith.divf %362, %363 : vector<2x32xf32>
    %365 = arith.mulf %352, %336 : vector<2x32xf32>
    %366 = arith.mulf %344, %356 : vector<2x32xf32>
    %367 = arith.addf %365, %366 : vector<2x32xf32>
    %368 = math.tanh %367 : vector<2x32xf32>
    %369 = arith.mulf %364, %368 : vector<2x32xf32>
    %370 = vector.extract_strided_slice %316 {offsets = [2, 0], sizes = [2, 32], strides = [1, 1]} : vector<16x32xf32> to vector<2x32xf32>
    %cst_80 = arith.constant dense<0.000000e+00> : vector<2x32xf32>
    %371 = tpu.matmul %369, %312, %cst_80 {dimension_numbers = #tpu.dot_dimension_numbers<[1], [0], [0], [1], [0, 0, 1, 1], [], []>} : vector<2x32xf32>, vector<32x32xf32>, vector<2x32xf32> -> vector<2x32xf32>
    %372 = arith.addf %370, %371 : vector<2x32xf32>
    %373 = arith.negf %372 : vector<2x32xf32>
    %374 = math.exp %373 : vector<2x32xf32>
    %cst_81 = arith.constant 1.000000e+00 : f32
    %375 = vector.broadcast %cst_81 : f32 to vector<2x32xf32>
    %376 = arith.addf %375, %374 : vector<2x32xf32>
    %377 = arith.divf %375, %376 : vector<2x32xf32>
    %378 = vector.extract_strided_slice %322 {offsets = [2, 0], sizes = [2, 32], strides = [1, 1]} : vector<16x32xf32> to vector<2x32xf32>
    %cst_82 = arith.constant dense<0.000000e+00> : vector<2x32xf32>
    %379 = tpu.matmul %369, %318, %cst_82 {dimension_numbers = #tpu.dot_dimension_numbers<[1], [0], [0], [1], [0, 0, 1, 1], [], []>} : vector<2x32xf32>, vector<32x32xf32>, vector<2x32xf32> -> vector<2x32xf32>
    %380 = arith.addf %378, %379 : vector<2x32xf32>
    %381 = arith.negf %380 : vector<2x32xf32>
    %382 = math.exp %381 : vector<2x32xf32>
    %cst_83 = arith.constant 1.000000e+00 : f32
    %383 = vector.broadcast %cst_83 : f32 to vector<2x32xf32>
    %384 = arith.addf %383, %382 : vector<2x32xf32>
    %385 = arith.divf %383, %384 : vector<2x32xf32>
    %386 = vector.extract_strided_slice %328 {offsets = [2, 0], sizes = [2, 32], strides = [1, 1]} : vector<16x32xf32> to vector<2x32xf32>
    %cst_84 = arith.constant dense<0.000000e+00> : vector<2x32xf32>
    %387 = tpu.matmul %369, %324, %cst_84 {dimension_numbers = #tpu.dot_dimension_numbers<[1], [0], [0], [1], [0, 0, 1, 1], [], []>} : vector<2x32xf32>, vector<32x32xf32>, vector<2x32xf32> -> vector<2x32xf32>
    %388 = arith.addf %386, %387 : vector<2x32xf32>
    %389 = math.tanh %388 : vector<2x32xf32>
    %390 = vector.extract_strided_slice %334 {offsets = [2, 0], sizes = [2, 32], strides = [1, 1]} : vector<16x32xf32> to vector<2x32xf32>
    %cst_85 = arith.constant dense<0.000000e+00> : vector<2x32xf32>
    %391 = tpu.matmul %369, %330, %cst_85 {dimension_numbers = #tpu.dot_dimension_numbers<[1], [0], [0], [1], [0, 0, 1, 1], [], []>} : vector<2x32xf32>, vector<32x32xf32>, vector<2x32xf32> -> vector<2x32xf32>
    %392 = arith.addf %390, %391 : vector<2x32xf32>
    %393 = arith.negf %392 : vector<2x32xf32>
    %394 = math.exp %393 : vector<2x32xf32>
    %cst_86 = arith.constant 1.000000e+00 : f32
    %395 = vector.broadcast %cst_86 : f32 to vector<2x32xf32>
    %396 = arith.addf %395, %394 : vector<2x32xf32>
    %397 = arith.divf %395, %396 : vector<2x32xf32>
    %398 = arith.mulf %385, %367 : vector<2x32xf32>
    %399 = arith.mulf %377, %389 : vector<2x32xf32>
    %400 = arith.addf %398, %399 : vector<2x32xf32>
    %401 = math.tanh %400 : vector<2x32xf32>
    %402 = arith.mulf %397, %401 : vector<2x32xf32>
    %403 = vector.extract_strided_slice %316 {offsets = [4, 0], sizes = [2, 32], strides = [1, 1]} : vector<16x32xf32> to vector<2x32xf32>
    %cst_87 = arith.constant dense<0.000000e+00> : vector<2x32xf32>
    %404 = tpu.matmul %402, %312, %cst_87 {dimension_numbers = #tpu.dot_dimension_numbers<[1], [0], [0], [1], [0, 0, 1, 1], [], []>} : vector<2x32xf32>, vector<32x32xf32>, vector<2x32xf32> -> vector<2x32xf32>
    %405 = arith.addf %403, %404 : vector<2x32xf32>
    %406 = arith.negf %405 : vector<2x32xf32>
    %407 = math.exp %406 : vector<2x32xf32>
    %cst_88 = arith.constant 1.000000e+00 : f32
    %408 = vector.broadcast %cst_88 : f32 to vector<2x32xf32>
    %409 = arith.addf %408, %407 : vector<2x32xf32>
    %410 = arith.divf %408, %409 : vector<2x32xf32>
    %411 = vector.extract_strided_slice %322 {offsets = [4, 0], sizes = [2, 32], strides = [1, 1]} : vector<16x32xf32> to vector<2x32xf32>
    %cst_89 = arith.constant dense<0.000000e+00> : vector<2x32xf32>
    %412 = tpu.matmul %402, %318, %cst_89 {dimension_numbers = #tpu.dot_dimension_numbers<[1], [0], [0], [1], [0, 0, 1, 1], [], []>} : vector<2x32xf32>, vector<32x32xf32>, vector<2x32xf32> -> vector<2x32xf32>
    %413 = arith.addf %411, %412 : vector<2x32xf32>
    %414 = arith.negf %413 : vector<2x32xf32>
    %415 = math.exp %414 : vector<2x32xf32>
    %cst_90 = arith.constant 1.000000e+00 : f32
    %416 = vector.broadcast %cst_90 : f32 to vector<2x32xf32>
    %417 = arith.addf %416, %415 : vector<2x32xf32>
    %418 = arith.divf %416, %417 : vector<2x32xf32>
    %419 = vector.extract_strided_slice %328 {offsets = [4, 0], sizes = [2, 32], strides = [1, 1]} : vector<16x32xf32> to vector<2x32xf32>
    %cst_91 = arith.constant dense<0.000000e+00> : vector<2x32xf32>
    %420 = tpu.matmul %402, %324, %cst_91 {dimension_numbers = #tpu.dot_dimension_numbers<[1], [0], [0], [1], [0, 0, 1, 1], [], []>} : vector<2x32xf32>, vector<32x32xf32>, vector<2x32xf32> -> vector<2x32xf32>
    %421 = arith.addf %419, %420 : vector<2x32xf32>
    %422 = math.tanh %421 : vector<2x32xf32>
    %423 = vector.extract_strided_slice %334 {offsets = [4, 0], sizes = [2, 32], strides = [1, 1]} : vector<16x32xf32> to vector<2x32xf32>
    %cst_92 = arith.constant dense<0.000000e+00> : vector<2x32xf32>
    %424 = tpu.matmul %402, %330, %cst_92 {dimension_numbers = #tpu.dot_dimension_numbers<[1], [0], [0], [1], [0, 0, 1, 1], [], []>} : vector<2x32xf32>, vector<32x32xf32>, vector<2x32xf32> -> vector<2x32xf32>
    %425 = arith.addf %423, %424 : vector<2x32xf32>
    %426 = arith.negf %425 : vector<2x32xf32>
    %427 = math.exp %426 : vector<2x32xf32>
    %cst_93 = arith.constant 1.000000e+00 : f32
    %428 = vector.broadcast %cst_93 : f32 to vector<2x32xf32>
    %429 = arith.addf %428, %427 : vector<2x32xf32>
    %430 = arith.divf %428, %429 : vector<2x32xf32>
    %431 = arith.mulf %418, %400 : vector<2x32xf32>
    %432 = arith.mulf %410, %422 : vector<2x32xf32>
    %433 = arith.addf %431, %432 : vector<2x32xf32>
    %434 = math.tanh %433 : vector<2x32xf32>
    %435 = arith.mulf %430, %434 : vector<2x32xf32>
    %436 = vector.extract_strided_slice %316 {offsets = [6, 0], sizes = [2, 32], strides = [1, 1]} : vector<16x32xf32> to vector<2x32xf32>
    %cst_94 = arith.constant dense<0.000000e+00> : vector<2x32xf32>
    %437 = tpu.matmul %435, %312, %cst_94 {dimension_numbers = #tpu.dot_dimension_numbers<[1], [0], [0], [1], [0, 0, 1, 1], [], []>} : vector<2x32xf32>, vector<32x32xf32>, vector<2x32xf32> -> vector<2x32xf32>
    %438 = arith.addf %436, %437 : vector<2x32xf32>
    %439 = arith.negf %438 : vector<2x32xf32>
    %440 = math.exp %439 : vector<2x32xf32>
    %cst_95 = arith.constant 1.000000e+00 : f32
    %441 = vector.broadcast %cst_95 : f32 to vector<2x32xf32>
    %442 = arith.addf %441, %440 : vector<2x32xf32>
    %443 = arith.divf %441, %442 : vector<2x32xf32>
    %444 = vector.extract_strided_slice %322 {offsets = [6, 0], sizes = [2, 32], strides = [1, 1]} : vector<16x32xf32> to vector<2x32xf32>
    %cst_96 = arith.constant dense<0.000000e+00> : vector<2x32xf32>
    %445 = tpu.matmul %435, %318, %cst_96 {dimension_numbers = #tpu.dot_dimension_numbers<[1], [0], [0], [1], [0, 0, 1, 1], [], []>} : vector<2x32xf32>, vector<32x32xf32>, vector<2x32xf32> -> vector<2x32xf32>
    %446 = arith.addf %444, %445 : vector<2x32xf32>
    %447 = arith.negf %446 : vector<2x32xf32>
    %448 = math.exp %447 : vector<2x32xf32>
    %cst_97 = arith.constant 1.000000e+00 : f32
    %449 = vector.broadcast %cst_97 : f32 to vector<2x32xf32>
    %450 = arith.addf %449, %448 : vector<2x32xf32>
    %451 = arith.divf %449, %450 : vector<2x32xf32>
    %452 = vector.extract_strided_slice %328 {offsets = [6, 0], sizes = [2, 32], strides = [1, 1]} : vector<16x32xf32> to vector<2x32xf32>
    %cst_98 = arith.constant dense<0.000000e+00> : vector<2x32xf32>
    %453 = tpu.matmul %435, %324, %cst_98 {dimension_numbers = #tpu.dot_dimension_numbers<[1], [0], [0], [1], [0, 0, 1, 1], [], []>} : vector<2x32xf32>, vector<32x32xf32>, vector<2x32xf32> -> vector<2x32xf32>
    %454 = arith.addf %452, %453 : vector<2x32xf32>
    %455 = math.tanh %454 : vector<2x32xf32>
    %456 = vector.extract_strided_slice %334 {offsets = [6, 0], sizes = [2, 32], strides = [1, 1]} : vector<16x32xf32> to vector<2x32xf32>
    %cst_99 = arith.constant dense<0.000000e+00> : vector<2x32xf32>
    %457 = tpu.matmul %435, %330, %cst_99 {dimension_numbers = #tpu.dot_dimension_numbers<[1], [0], [0], [1], [0, 0, 1, 1], [], []>} : vector<2x32xf32>, vector<32x32xf32>, vector<2x32xf32> -> vector<2x32xf32>
    %458 = arith.addf %456, %457 : vector<2x32xf32>
    %459 = arith.negf %458 : vector<2x32xf32>
    %460 = math.exp %459 : vector<2x32xf32>
    %cst_100 = arith.constant 1.000000e+00 : f32
    %461 = vector.broadcast %cst_100 : f32 to vector<2x32xf32>
    %462 = arith.addf %461, %460 : vector<2x32xf32>
    %463 = arith.divf %461, %462 : vector<2x32xf32>
    %464 = arith.mulf %451, %433 : vector<2x32xf32>
    %465 = arith.mulf %443, %455 : vector<2x32xf32>
    %466 = arith.addf %464, %465 : vector<2x32xf32>
    %467 = math.tanh %466 : vector<2x32xf32>
    %468 = arith.mulf %463, %467 : vector<2x32xf32>
    %469 = vector.extract_strided_slice %316 {offsets = [8, 0], sizes = [2, 32], strides = [1, 1]} : vector<16x32xf32> to vector<2x32xf32>
    %cst_101 = arith.constant dense<0.000000e+00> : vector<2x32xf32>
    %470 = tpu.matmul %468, %312, %cst_101 {dimension_numbers = #tpu.dot_dimension_numbers<[1], [0], [0], [1], [0, 0, 1, 1], [], []>} : vector<2x32xf32>, vector<32x32xf32>, vector<2x32xf32> -> vector<2x32xf32>
    %471 = arith.addf %469, %470 : vector<2x32xf32>
    %472 = arith.negf %471 : vector<2x32xf32>
    %473 = math.exp %472 : vector<2x32xf32>
    %cst_102 = arith.constant 1.000000e+00 : f32
    %474 = vector.broadcast %cst_102 : f32 to vector<2x32xf32>
    %475 = arith.addf %474, %473 : vector<2x32xf32>
    %476 = arith.divf %474, %475 : vector<2x32xf32>
    %477 = vector.extract_strided_slice %322 {offsets = [8, 0], sizes = [2, 32], strides = [1, 1]} : vector<16x32xf32> to vector<2x32xf32>
    %cst_103 = arith.constant dense<0.000000e+00> : vector<2x32xf32>
    %478 = tpu.matmul %468, %318, %cst_103 {dimension_numbers = #tpu.dot_dimension_numbers<[1], [0], [0], [1], [0, 0, 1, 1], [], []>} : vector<2x32xf32>, vector<32x32xf32>, vector<2x32xf32> -> vector<2x32xf32>
    %479 = arith.addf %477, %478 : vector<2x32xf32>
    %480 = arith.negf %479 : vector<2x32xf32>
    %481 = math.exp %480 : vector<2x32xf32>
    %cst_104 = arith.constant 1.000000e+00 : f32
    %482 = vector.broadcast %cst_104 : f32 to vector<2x32xf32>
    %483 = arith.addf %482, %481 : vector<2x32xf32>
    %484 = arith.divf %482, %483 : vector<2x32xf32>
    %485 = vector.extract_strided_slice %328 {offsets = [8, 0], sizes = [2, 32], strides = [1, 1]} : vector<16x32xf32> to vector<2x32xf32>
    %cst_105 = arith.constant dense<0.000000e+00> : vector<2x32xf32>
    %486 = tpu.matmul %468, %324, %cst_105 {dimension_numbers = #tpu.dot_dimension_numbers<[1], [0], [0], [1], [0, 0, 1, 1], [], []>} : vector<2x32xf32>, vector<32x32xf32>, vector<2x32xf32> -> vector<2x32xf32>
    %487 = arith.addf %485, %486 : vector<2x32xf32>
    %488 = math.tanh %487 : vector<2x32xf32>
    %489 = vector.extract_strided_slice %334 {offsets = [8, 0], sizes = [2, 32], strides = [1, 1]} : vector<16x32xf32> to vector<2x32xf32>
    %cst_106 = arith.constant dense<0.000000e+00> : vector<2x32xf32>
    %490 = tpu.matmul %468, %330, %cst_106 {dimension_numbers = #tpu.dot_dimension_numbers<[1], [0], [0], [1], [0, 0, 1, 1], [], []>} : vector<2x32xf32>, vector<32x32xf32>, vector<2x32xf32> -> vector<2x32xf32>
    %491 = arith.addf %489, %490 : vector<2x32xf32>
    %492 = arith.negf %491 : vector<2x32xf32>
    %493 = math.exp %492 : vector<2x32xf32>
    %cst_107 = arith.constant 1.000000e+00 : f32
    %494 = vector.broadcast %cst_107 : f32 to vector<2x32xf32>
    %495 = arith.addf %494, %493 : vector<2x32xf32>
    %496 = arith.divf %494, %495 : vector<2x32xf32>
    %497 = arith.mulf %484, %466 : vector<2x32xf32>
    %498 = arith.mulf %476, %488 : vector<2x32xf32>
    %499 = arith.addf %497, %498 : vector<2x32xf32>
    %500 = math.tanh %499 : vector<2x32xf32>
    %501 = arith.mulf %496, %500 : vector<2x32xf32>
    %502 = vector.extract_strided_slice %316 {offsets = [10, 0], sizes = [2, 32], strides = [1, 1]} : vector<16x32xf32> to vector<2x32xf32>
    %cst_108 = arith.constant dense<0.000000e+00> : vector<2x32xf32>
    %503 = tpu.matmul %501, %312, %cst_108 {dimension_numbers = #tpu.dot_dimension_numbers<[1], [0], [0], [1], [0, 0, 1, 1], [], []>} : vector<2x32xf32>, vector<32x32xf32>, vector<2x32xf32> -> vector<2x32xf32>
    %504 = arith.addf %502, %503 : vector<2x32xf32>
    %505 = arith.negf %504 : vector<2x32xf32>
    %506 = math.exp %505 : vector<2x32xf32>
    %cst_109 = arith.constant 1.000000e+00 : f32
    %507 = vector.broadcast %cst_109 : f32 to vector<2x32xf32>
    %508 = arith.addf %507, %506 : vector<2x32xf32>
    %509 = arith.divf %507, %508 : vector<2x32xf32>
    %510 = vector.extract_strided_slice %322 {offsets = [10, 0], sizes = [2, 32], strides = [1, 1]} : vector<16x32xf32> to vector<2x32xf32>
    %cst_110 = arith.constant dense<0.000000e+00> : vector<2x32xf32>
    %511 = tpu.matmul %501, %318, %cst_110 {dimension_numbers = #tpu.dot_dimension_numbers<[1], [0], [0], [1], [0, 0, 1, 1], [], []>} : vector<2x32xf32>, vector<32x32xf32>, vector<2x32xf32> -> vector<2x32xf32>
    %512 = arith.addf %510, %511 : vector<2x32xf32>
    %513 = arith.negf %512 : vector<2x32xf32>
    %514 = math.exp %513 : vector<2x32xf32>
    %cst_111 = arith.constant 1.000000e+00 : f32
    %515 = vector.broadcast %cst_111 : f32 to vector<2x32xf32>
    %516 = arith.addf %515, %514 : vector<2x32xf32>
    %517 = arith.divf %515, %516 : vector<2x32xf32>
    %518 = vector.extract_strided_slice %328 {offsets = [10, 0], sizes = [2, 32], strides = [1, 1]} : vector<16x32xf32> to vector<2x32xf32>
    %cst_112 = arith.constant dense<0.000000e+00> : vector<2x32xf32>
    %519 = tpu.matmul %501, %324, %cst_112 {dimension_numbers = #tpu.dot_dimension_numbers<[1], [0], [0], [1], [0, 0, 1, 1], [], []>} : vector<2x32xf32>, vector<32x32xf32>, vector<2x32xf32> -> vector<2x32xf32>
    %520 = arith.addf %518, %519 : vector<2x32xf32>
    %521 = math.tanh %520 : vector<2x32xf32>
    %522 = vector.extract_strided_slice %334 {offsets = [10, 0], sizes = [2, 32], strides = [1, 1]} : vector<16x32xf32> to vector<2x32xf32>
    %cst_113 = arith.constant dense<0.000000e+00> : vector<2x32xf32>
    %523 = tpu.matmul %501, %330, %cst_113 {dimension_numbers = #tpu.dot_dimension_numbers<[1], [0], [0], [1], [0, 0, 1, 1], [], []>} : vector<2x32xf32>, vector<32x32xf32>, vector<2x32xf32> -> vector<2x32xf32>
    %524 = arith.addf %522, %523 : vector<2x32xf32>
    %525 = arith.negf %524 : vector<2x32xf32>
    %526 = math.exp %525 : vector<2x32xf32>
    %cst_114 = arith.constant 1.000000e+00 : f32
    %527 = vector.broadcast %cst_114 : f32 to vector<2x32xf32>
    %528 = arith.addf %527, %526 : vector<2x32xf32>
    %529 = arith.divf %527, %528 : vector<2x32xf32>
    %530 = arith.mulf %517, %499 : vector<2x32xf32>
    %531 = arith.mulf %509, %521 : vector<2x32xf32>
    %532 = arith.addf %530, %531 : vector<2x32xf32>
    %533 = math.tanh %532 : vector<2x32xf32>
    %534 = arith.mulf %529, %533 : vector<2x32xf32>
    %535 = vector.extract_strided_slice %316 {offsets = [12, 0], sizes = [2, 32], strides = [1, 1]} : vector<16x32xf32> to vector<2x32xf32>
    %cst_115 = arith.constant dense<0.000000e+00> : vector<2x32xf32>
    %536 = tpu.matmul %534, %312, %cst_115 {dimension_numbers = #tpu.dot_dimension_numbers<[1], [0], [0], [1], [0, 0, 1, 1], [], []>} : vector<2x32xf32>, vector<32x32xf32>, vector<2x32xf32> -> vector<2x32xf32>
    %537 = arith.addf %535, %536 : vector<2x32xf32>
    %538 = arith.negf %537 : vector<2x32xf32>
    %539 = math.exp %538 : vector<2x32xf32>
    %cst_116 = arith.constant 1.000000e+00 : f32
    %540 = vector.broadcast %cst_116 : f32 to vector<2x32xf32>
    %541 = arith.addf %540, %539 : vector<2x32xf32>
    %542 = arith.divf %540, %541 : vector<2x32xf32>
    %543 = vector.extract_strided_slice %322 {offsets = [12, 0], sizes = [2, 32], strides = [1, 1]} : vector<16x32xf32> to vector<2x32xf32>
    %cst_117 = arith.constant dense<0.000000e+00> : vector<2x32xf32>
    %544 = tpu.matmul %534, %318, %cst_117 {dimension_numbers = #tpu.dot_dimension_numbers<[1], [0], [0], [1], [0, 0, 1, 1], [], []>} : vector<2x32xf32>, vector<32x32xf32>, vector<2x32xf32> -> vector<2x32xf32>
    %545 = arith.addf %543, %544 : vector<2x32xf32>
    %546 = arith.negf %545 : vector<2x32xf32>
    %547 = math.exp %546 : vector<2x32xf32>
    %cst_118 = arith.constant 1.000000e+00 : f32
    %548 = vector.broadcast %cst_118 : f32 to vector<2x32xf32>
    %549 = arith.addf %548, %547 : vector<2x32xf32>
    %550 = arith.divf %548, %549 : vector<2x32xf32>
    %551 = vector.extract_strided_slice %328 {offsets = [12, 0], sizes = [2, 32], strides = [1, 1]} : vector<16x32xf32> to vector<2x32xf32>
    %cst_119 = arith.constant dense<0.000000e+00> : vector<2x32xf32>
    %552 = tpu.matmul %534, %324, %cst_119 {dimension_numbers = #tpu.dot_dimension_numbers<[1], [0], [0], [1], [0, 0, 1, 1], [], []>} : vector<2x32xf32>, vector<32x32xf32>, vector<2x32xf32> -> vector<2x32xf32>
    %553 = arith.addf %551, %552 : vector<2x32xf32>
    %554 = math.tanh %553 : vector<2x32xf32>
    %555 = vector.extract_strided_slice %334 {offsets = [12, 0], sizes = [2, 32], strides = [1, 1]} : vector<16x32xf32> to vector<2x32xf32>
    %cst_120 = arith.constant dense<0.000000e+00> : vector<2x32xf32>
    %556 = tpu.matmul %534, %330, %cst_120 {dimension_numbers = #tpu.dot_dimension_numbers<[1], [0], [0], [1], [0, 0, 1, 1], [], []>} : vector<2x32xf32>, vector<32x32xf32>, vector<2x32xf32> -> vector<2x32xf32>
    %557 = arith.addf %555, %556 : vector<2x32xf32>
    %558 = arith.negf %557 : vector<2x32xf32>
    %559 = math.exp %558 : vector<2x32xf32>
    %cst_121 = arith.constant 1.000000e+00 : f32
    %560 = vector.broadcast %cst_121 : f32 to vector<2x32xf32>
    %561 = arith.addf %560, %559 : vector<2x32xf32>
    %562 = arith.divf %560, %561 : vector<2x32xf32>
    %563 = arith.mulf %550, %532 : vector<2x32xf32>
    %564 = arith.mulf %542, %554 : vector<2x32xf32>
    %565 = arith.addf %563, %564 : vector<2x32xf32>
    %566 = math.tanh %565 : vector<2x32xf32>
    %567 = arith.mulf %562, %566 : vector<2x32xf32>
    %568 = vector.extract_strided_slice %316 {offsets = [14, 0], sizes = [2, 32], strides = [1, 1]} : vector<16x32xf32> to vector<2x32xf32>
    %cst_122 = arith.constant dense<0.000000e+00> : vector<2x32xf32>
    %569 = tpu.matmul %567, %312, %cst_122 {dimension_numbers = #tpu.dot_dimension_numbers<[1], [0], [0], [1], [0, 0, 1, 1], [], []>} : vector<2x32xf32>, vector<32x32xf32>, vector<2x32xf32> -> vector<2x32xf32>
    %570 = arith.addf %568, %569 : vector<2x32xf32>
    %571 = arith.negf %570 : vector<2x32xf32>
    %572 = math.exp %571 : vector<2x32xf32>
    %cst_123 = arith.constant 1.000000e+00 : f32
    %573 = vector.broadcast %cst_123 : f32 to vector<2x32xf32>
    %574 = arith.addf %573, %572 : vector<2x32xf32>
    %575 = arith.divf %573, %574 : vector<2x32xf32>
    %576 = vector.extract_strided_slice %322 {offsets = [14, 0], sizes = [2, 32], strides = [1, 1]} : vector<16x32xf32> to vector<2x32xf32>
    %cst_124 = arith.constant dense<0.000000e+00> : vector<2x32xf32>
    %577 = tpu.matmul %567, %318, %cst_124 {dimension_numbers = #tpu.dot_dimension_numbers<[1], [0], [0], [1], [0, 0, 1, 1], [], []>} : vector<2x32xf32>, vector<32x32xf32>, vector<2x32xf32> -> vector<2x32xf32>
    %578 = arith.addf %576, %577 : vector<2x32xf32>
    %579 = arith.negf %578 : vector<2x32xf32>
    %580 = math.exp %579 : vector<2x32xf32>
    %cst_125 = arith.constant 1.000000e+00 : f32
    %581 = vector.broadcast %cst_125 : f32 to vector<2x32xf32>
    %582 = arith.addf %581, %580 : vector<2x32xf32>
    %583 = arith.divf %581, %582 : vector<2x32xf32>
    %584 = vector.extract_strided_slice %328 {offsets = [14, 0], sizes = [2, 32], strides = [1, 1]} : vector<16x32xf32> to vector<2x32xf32>
    %cst_126 = arith.constant dense<0.000000e+00> : vector<2x32xf32>
    %585 = tpu.matmul %567, %324, %cst_126 {dimension_numbers = #tpu.dot_dimension_numbers<[1], [0], [0], [1], [0, 0, 1, 1], [], []>} : vector<2x32xf32>, vector<32x32xf32>, vector<2x32xf32> -> vector<2x32xf32>
    %586 = arith.addf %584, %585 : vector<2x32xf32>
    %587 = math.tanh %586 : vector<2x32xf32>
    %588 = vector.extract_strided_slice %334 {offsets = [14, 0], sizes = [2, 32], strides = [1, 1]} : vector<16x32xf32> to vector<2x32xf32>
    %cst_127 = arith.constant dense<0.000000e+00> : vector<2x32xf32>
    %589 = tpu.matmul %567, %330, %cst_127 {dimension_numbers = #tpu.dot_dimension_numbers<[1], [0], [0], [1], [0, 0, 1, 1], [], []>} : vector<2x32xf32>, vector<32x32xf32>, vector<2x32xf32> -> vector<2x32xf32>
    %590 = arith.addf %588, %589 : vector<2x32xf32>
    %591 = arith.negf %590 : vector<2x32xf32>
    %592 = math.exp %591 : vector<2x32xf32>
    %cst_128 = arith.constant 1.000000e+00 : f32
    %593 = vector.broadcast %cst_128 : f32 to vector<2x32xf32>
    %594 = arith.addf %593, %592 : vector<2x32xf32>
    %595 = arith.divf %593, %594 : vector<2x32xf32>
    %596 = arith.mulf %583, %565 : vector<2x32xf32>
    %597 = arith.mulf %575, %587 : vector<2x32xf32>
    %598 = arith.addf %596, %597 : vector<2x32xf32>
    %599 = math.tanh %598 : vector<2x32xf32>
    %600 = arith.mulf %595, %599 : vector<2x32xf32>
    %601 = vector.extract_strided_slice %1 {offsets = [0, 0], sizes = [32, 4], strides = [1, 1]} : vector<35x4xf32> to vector<32x4xf32>
    %602 = vector.extract_strided_slice %1 {offsets = [32, 0], sizes = [2, 4], strides = [1, 1]} : vector<35x4xf32> to vector<2x4xf32>
    %603 = vector.extract_strided_slice %1 {offsets = [34, 0], sizes = [1, 4], strides = [1, 1]} : vector<35x4xf32> to vector<1x4xf32>
    %cst_129 = arith.constant dense<0.000000e+00> : vector<2x4xf32>
    %604 = tpu.matmul %600, %601, %cst_129 {dimension_numbers = #tpu.dot_dimension_numbers<[1], [0], [0], [1], [0, 0, 1, 1], [], []>} : vector<2x32xf32>, vector<32x4xf32>, vector<2x4xf32> -> vector<2x4xf32>
    %c0_130 = arith.constant 0 : index
    %c0_131 = arith.constant 0 : index
    %605 = vector.load %arg1[%c0_130, %c0_131] : memref<2x2xf32, #tpu.memory_space<vmem>>, vector<2x2xf32>
    %cst_132 = arith.constant dense<0.000000e+00> : vector<2x4xf32>
    %606 = tpu.matmul %605, %602, %cst_132 {dimension_numbers = #tpu.dot_dimension_numbers<[1], [0], [0], [1], [0, 0, 1, 1], [], []>} : vector<2x2xf32>, vector<2x4xf32>, vector<2x4xf32> -> vector<2x4xf32>
    %607 = arith.addf %604, %606 : vector<2x4xf32>
    %608 = vector.broadcast %603 : vector<1x4xf32> to vector<2x4xf32>
    %609 = arith.addf %607, %608 : vector<2x4xf32>
    %c0_133 = arith.constant 0 : index
    %c0_134 = arith.constant 0 : index
    %610 = vector.load %arg4[%c0_133, %c0_134] : memref<2x4xf32, #tpu.memory_space<vmem>>, vector<2x4xf32>
    tpu.vector_store %arg4[%c0_133, %c0_134], %609 {strides = array<i32>} : memref<2x4xf32, #tpu.memory_space<vmem>>, vector<2x4xf32>,
    return
  }
}

</mosaic_0001>

<bundles_post_ra>
// kernel: tpu_custom_call.1
= control target key start
LH: loop header
LB: loop body
LE: loop exit
PB: predicated region body
PF: predicated region fallthrough
CT: control target
= control target key end

     0   :  { %9 = vsyncpa [#allocation3], 0  ;;  %s9271_s0 = inlined_call_operand.vmem [shape: f32[2,8,16], index: 0, kind: input, shape index: {}]   ;;  %s9272_s1 = inlined_call_operand.vmem [shape: f32[2,2], index: 1, kind: input, shape index: {}]   ;;  %s9273_s2 = inlined_call_operand.hbm [shape: f32[128,128], index: 2, kind: input, shape index: {}]   ;;  %s9274_s3 = inlined_call_operand.vmem [shape: f32[35,4], index: 3, kind: input, shape index: {}]   ;;  %s9275_s4 = inlined_call_operand.hbm [shape: f32[2,4], index: 4, kind: output, shape index: {}]  }
   0x1   :  { %10 = vsyncpa [#allocation4], 0  ;;  %s8370_s15 = smov [#allocation2]   ;;  %s8322_s19 = scalar_lea.hbm %s9273_s2, 2048 }
   0x2   :  { %s20_s16 = sshll.u32 %s8370_s15, 4  ;;  %p8323_p0 = scmp.ne.s32.totalorder %s9273_s2, %s8322_s19  ;;  %s21_s16 = int_to_ptr.vmem [resolvable:$true] %s20_s16 }
   0x3   :  { %p8326_p1 = scmp.lt.u32.totalorder %s8322_s19, %s9273_s2 }
   0x5   :  { %p8328_p2 = pnand %p8326_p1, %p8323_p0 }
   0x7   :  { %8331 = shalt.err (!%p8328_p2)
}
   0x8   :  { %s8332_s24 = scalar_lea.vmem %s21_s16, 2048  ;;  %p8337_p4 = scmp.lt.s32.totalorder %s21_s16, %s21_s16 }
   0x9   :  { %p8333_p3 = scmp.ne.s32.totalorder %s21_s16, %s8332_s24  ;;  %p8338_p5 = scmp.lt.s32.totalorder %s8332_s24, %s8332_s24 }
   0xb   :  { %p8339_p6 = por %p8338_p5, %p8337_p4 }
   0xd   :  { %p8340_p7 = pnand %p8339_p6, %p8333_p3 }
   0xf   :  { %8343 = shalt.err (!%p8340_p7)
}
  0x10   :  { %s8371_s25 = smov 128   ;;  %s8372_s26 = smov 8  }
  0x11   :  { %26 = dma.hbm_to_vmem [thread:$0]  %s9273_s2, 2048, %s21_s16, [#allocation3], %s8371_s25, %s8371_s25, %s8372_s26  }
  0x12   :  { %8366 = dma.done.wait [#allocation3], 2048  }
  0x13   :  { %8367 = vsyncadd [#allocation3], 4294965248  ;;  %vm58_vm0 = vcmask 1041409   ;;  %vm63_vm1 = vcmask 1043459   ;;  %v32_v0 = vld [vmem:[#allocation2] sm:$0xff]  ;;  %v33_v1 = vld [vmem:[#allocation2 + $0x8] sm:$0xff]  ;;  %v100_v42 = vlaneseq }
  0x14   :  { %v34_v2 = vld [vmem:[#allocation2 + $0x10] sm:$0xff]  ;;  %vm68_vm2 = vcmask 1045509   ;;  %vm73_vm3 = vcmask 1047559   ;;  %vm91_vm4 = vcmask 1041408   ;;  %v7961_v3 = vpack.i.bf16 %v33_v1, %v32_v0  ;;  %v35_v4 = vld [vmem:[#allocation2 + $0x18] sm:$0xff]  ;;  %v36_v5 = vld [vmem:[#allocation2 + $0x20] sm:$0xff] }
  0x15   :  { %v37_v6 = vld [vmem:[#allocation2 + $0x28] sm:$0xff]  ;;  %v7513_v7 = vpack.c.bf16 %v33_v1, %v32_v0  ;;  %vm93_vm5 = vcmask 1043456   ;;  %v8417_v8 = vpack.c.bf16 %v35_v4, %v34_v2  ;;  %v53_v10 = vld [vmem:[%s9271_s0] sm:$0xff]  ;;  %vm95_vm6 = vcmask 1045504   ;;  %s8373_s6 = smov 96   ;;  %s8374_s7 = smov 32  }
  0x16   :  { %v8419_v9 = vpack.c.bf16 %v37_v6, %v36_v5  ;;  %v54_v11 = vld [vmem:[%s9271_s0 + $0x8] sm:$0xff]  ;;  %vm104_vm7 = vcmask 130048   ;;  %7962 = vrot.lane.b32.xlu0 %v7961_v3, %s8373_s6  ;;  %7972 = vrot.lane.b32.xlu1 %v7961_v3, %s8374_s7  ;;  %v7976_v12 = vpack.i.bf16 %v35_v4, %v34_v2  ;;  %v7981_v13 = vpack.i.bf16 %v37_v6, %v36_v5  ;;  %s8375_s0 = smov 64   ;;  %v38_v44 = vld [vmem:[#allocation2 + $0x30] sm:$0xff] }
  0x17   :  { %v57_v14 = vrot.slane %v54_v11, 7  ;;  %7514 = vmatprep.subr.bf16.mxu0 %v7513_v7  ;;  %v61_v15 = vrot.slane %v53_v10, 7  ;;  %v62_v16 = vrot.slane %v54_v11, 6  ;;  %v66_v17 = vrot.slane %v53_v10, 6 }
  0x18   :  { %7516 = vmatpush3.bf16.msra.mxu0 %v7513_v7  ;;  %v67_v19 = vrot.slane %v54_v11, 5  ;;  %v71_v20 = vrot.slane %v53_v10, 5  ;;  %v72_v21 = vrot.slane %v54_v11, 4  ;;  %v76_v23 = vrot.slane %v53_v10, 4 }
  0x19   :  { %v59_v18 = vsel %vm58_vm0, %v57_v14, %v53_v10  ;;  %v64_v22 = vsel %vm63_vm1, %v62_v16, %v61_v15  ;;  %v77_v24 = vrot.slane %v54_v11, 3  ;;  %v80_v25 = vrot.slane %v53_v10, 3 }
  0x1a   :  { %7967 = vrot.lane.b32.xlu0 %v7961_v3, %s8375_s0  ;;  %7977 = vrot.lane.b32.xlu1 %v7976_v12, %s8373_s6  ;;  %v69_v26 = vsel %vm68_vm2, %v67_v19, %v66_v17  ;;  %v74_v27 = vsel %vm73_vm3, %v72_v21, %v71_v20  ;;  %v92_v28 = vsel %vm91_vm4, %v59_v18, %v64_v22  ;;  %v81_v29 = vrot.slane %v54_v11, 2 }
  0x1b   :  { %v94_v30 = vsel %vm93_vm5, %v92_v28, %v69_v26  ;;  %v78_v31 = vsel %vm58_vm0, %v77_v24, %v76_v23  ;;  %v84_v32 = vrot.slane %v53_v10, 2  ;;  %v85_v33 = vrot.slane %v54_v11, 1 }
  0x1c   :  { %v96_v34 = vsel %vm95_vm6, %v94_v30, %v74_v27  ;;  %v82_v35 = vsel %vm63_vm1, %v81_v29, %v80_v25  ;;  %v88_v36 = vrot.slane %v53_v10, 1  ;;  %v8454_v43 = vshrl.u32 %v100_v42, 7 }
  0x1d   :  { %6725 = vmatprep.mubr.msk.f32.mxu0 %vm104_vm7, %v96_v34  ;;  %6732 = vmatprep.mubr.msk.f32.mxu1 %vm104_vm7, %v96_v34  ;;  %v86_v37 = vsel %vm68_vm2, %v85_v33, %v84_v32  ;;  %v97_v38 = vsel %vm91_vm4, %v78_v31, %v82_v35  ;;  %v8376_v3 = vmov 0.0|0.0   ;;  %vm8377_vm8 = vmmov 0  }
  0x1e   :  { %7982 = vrot.lane.b32.xlu0 %v7981_v13, %s8373_s6  ;;  %7987 = vrot.lane.b32.xlu1 %v7976_v12, %s8375_s0  ;;  %v89_v39 = vsel %vm73_vm3, %v54_v11, %v88_v36  ;;  %v98_v40 = vsel %vm93_vm5, %v97_v38, %v86_v37  ;;  %v102_v45 = vsub.s32 0, %v8454_v43  ;;  %vm441_vm9 = vcmask 261120  }
  0x1f   :  { %v99_v41 = vsel %vm95_vm6, %v98_v40, %v89_v39  ;;  %vm6058_vm10 = vcmask 15360   ;;  %vm6214_vm11 = vcmask 25600  }
  0x20   :  { %6726 = vmatmul.mubr.msk.f32.vlgmr.msra.gmra.mrb[0].mxu0 %vm104_vm7, %v99_v41  ;;  %v8459_v46 = vrot.slane %v38_v44, %v102_v45 }
  0x21   :  { %6739 = vmatprep.mubr.msk.f32.mxu0 %vm104_vm7, %v96_v34 }
  0x22   :  { %7992 = vrot.lane.b32.xlu0 %v7976_v12, %s8374_s7  ;;  %7997 = vrot.lane.b32.xlu1 %v7981_v13, %s8375_s0 }
  0x26   :  { %8002 = vrot.lane.b32.xlu0 %v7981_v13, %s8374_s7  ;;  %195 = vrot.lane.b32.xlu1 %v8459_v46, %s8373_s6  ;;  %v8378_v13 = vmov 0.0  }
  0x2a   :  { %279 = vrot.lane.b32.xlu0 %v8459_v46, %s8375_s0  ;;  %363 = vrot.lane.b32.xlu1 %v8459_v46, %s8374_s7 }
  0x88   :  { %v7963_v47 = vpop.permute.xlu0 %7962  ;;  %v7973_v48 = vpop.permute.xlu1 %7972 }
  0x89   :  { %v7965_v49 = vunpack.i.h.bf16 %v7963_v47  ;;  %v7964_v50 = vunpack.i.l.bf16 %v7963_v47  ;;  %v7975_v51 = vunpack.i.h.bf16 %v7973_v48  ;;  %v7974_v52 = vunpack.i.l.bf16 %v7973_v48 }
  0x8b   :  { %v7525_v53 = vpack.c.bf16 %v7975_v51, %v7974_v52  ;;  %v7517_v54 = vpack.c.bf16 %v7965_v49, %v7964_v50 }
  0x8c   :  { %v7968_v55 = vpop.permute.xlu0 %7967  ;;  %v7978_v56 = vpop.permute.xlu1 %7977 }
  0x8d   :  { %v7970_v57 = vunpack.i.h.bf16 %v7968_v55  ;;  %v7969_v58 = vunpack.i.l.bf16 %v7968_v55  ;;  %7518 = vmatprep.subr.bf16.mxu1 %v7517_v54  ;;  %v7980_v59 = vunpack.i.h.bf16 %v7978_v56  ;;  %v7979_v60 = vunpack.i.l.bf16 %v7978_v56 }
  0x8e   :  { %7520 = vmatpush3.bf16.msra.mxu1 %v7517_v54 }
  0x8f   :  { %v7521_v61 = vpack.c.bf16 %v7970_v57, %v7969_v58  ;;  %7526 = vmatprep.subr.bf16.mxu1 %v7525_v53  ;;  %v8468_v0 = vpack.c.bf16 %v7980_v59, %v7979_v60 }
  0x90   :  { %v7983_v62 = vpop.permute.xlu0 %7982  ;;  %v7988_v63 = vpop.permute.xlu1 %7987 }
  0x91   :  { %6733 = vmatmul.mubr.msk.f32.vlgmr.msra.gmra.mrb[0].mxu1 %vm104_vm7, %v99_v41  ;;  %7522 = vmatprep.subr.bf16.mxu0 %v7521_v61  ;;  %v7985_v1 = vunpack.i.h.bf16 %v7983_v62  ;;  %v7984_v2 = vunpack.i.l.bf16 %v7983_v62  ;;  %v7990_v5 = vunpack.i.h.bf16 %v7988_v63  ;;  %v7989_v6 = vunpack.i.l.bf16 %v7988_v63 }
  0x92   :  { %7524 = vmatpush3.bf16.msra.mxu0 %v7521_v61  ;;  %7528 = vmatpush3.bf16.msra.mxu1 %v7525_v53 }
  0x93   :  { %6746 = vmatprep.mubr.msk.f32.mxu1 %vm104_vm7, %v96_v34  ;;  %7529 = vmatprep.subr.bf16.mxu0 %v8376_v3  ;;  %v8475_v7 = vpack.c.bf16 %v7985_v1, %v7984_v2  ;;  %v8485_v15 = vpack.c.bf16 %v7990_v5, %v7989_v6 }
  0x94   :  { %7535 = vmatprep.subr.bf16.mxu1 %v8376_v3  ;;  %v7993_v4 = vpop.permute.xlu0 %7992  ;;  %v7998_v12 = vpop.permute.xlu1 %7997 }
  0x95   :  { %6740 = vmatmul.mubr.msk.f32.vlgmr.msra.gmra.mrb[2].mxu0 %vm104_vm7, %v99_v41  ;;  %6747 = vmatmul.mubr.msk.f32.vlgmr.msra.gmra.mrb[2].mxu1 %vm104_vm7, %v99_v41  ;;  %v7995_v10 = vunpack.i.h.bf16 %v7993_v4  ;;  %v7994_v11 = vunpack.i.l.bf16 %v7993_v4  ;;  %v8000_v16 = vunpack.i.h.bf16 %v7998_v12  ;;  %v7999_v18 = vunpack.i.l.bf16 %v7998_v12 }
  0x96   :  { %7531 = vmatpush3.bf16.msra.mxu0 %v8417_v8  ;;  %7537 = vmatpush3.bf16.msra.mxu1 %v8468_v0 }
  0x97   :  { %7532 = vmatprep.subr.bf16.mxu0 %v8376_v3  ;;  %7538 = vmatprep.subr.bf16.mxu1 %v8376_v3  ;;  %v8487_v17 = vpack.c.bf16 %v7995_v10, %v7994_v11  ;;  %v8495_v21 = vpack.c.bf16 %v8000_v16, %v7999_v18 }
  0x98   :  { %6757 = vmatprep.mubr.msk.f32.mxu0 %vm8377_vm8, %v8378_v13  ;;  %6768 = vmatprep.mubr.msk.f32.mxu1 %vm8377_vm8, %v8378_v13  ;;  %v8003_v14 = vpop.permute.xlu0 %8002  ;;  %v8533_v31 = vpop.permute.xlu1 %195 }
  0x99   :  { %v8005_v19 = vunpack.i.h.bf16 %v8003_v14  ;;  %v8004_v20 = vunpack.i.l.bf16 %v8003_v14 }
  0x9a   :  { %7534 = vmatpush3.bf16.msra.mxu0 %v8419_v9  ;;  %7540 = vmatpush3.bf16.msra.mxu1 %v8475_v7 }
  0x9b   :  { %7541 = vmatprep.subr.bf16.mxu0 %v8376_v3  ;;  %7547 = vmatprep.subr.bf16.mxu1 %v8376_v3  ;;  %v8497_v22 = vpack.c.bf16 %v8005_v19, %v8004_v20 }
  0x9c   :  { %v8543_v42 = vpop.permute.xlu1 %363  ;;  %v8545_v44 = vpop.permute.xlu0 %279 }
  0x9d   :  { %6758 = vmatmul.mubr.f32.vlgmr.msra.gmra.mrb[4].mxu0 %v8378_v13  ;;  %6769 = vmatmul.mubr.f32.vlgmr.msra.gmra.mrb[4].mxu1 %v8378_v13 }
  0x9e   :  { %7543 = vmatpush3.bf16.msra.mxu0 %v8485_v15  ;;  %7549 = vmatpush3.bf16.msra.mxu1 %v8487_v17 }
  0x9f   :  { %7544 = vmatprep.subr.bf16.mxu0 %v8376_v3  ;;  %7550 = vmatprep.subr.bf16.mxu1 %v8376_v3 }
  0xa0   :  { %6779 = vmatprep.mubr.msk.f32.mxu0 %vm8377_vm8, %v8378_v13  ;;  %6790 = vmatprep.mubr.msk.f32.mxu1 %vm8377_vm8, %v8378_v13 }
  0xa2   :  { %7546 = vmatpush3.bf16.msra.mxu0 %v8495_v21  ;;  %7552 = vmatpush3.bf16.msra.mxu1 %v8497_v22 }
  0xa3   :  { %7559 = vmatprep.subr.bf16.mxu1 %v8376_v3  ;;  %7553 = vmatprep.subr.bf16.mxu0 %v8376_v3 }
  0xa5   :  { %6780 = vmatmul.mubr.f32.vlgmr.msra.gmra.mrb[6].mxu0 %v8378_v13  ;;  %6791 = vmatmul.mubr.f32.vlgmr.msra.gmra.mrb[6].mxu1 %v8378_v13 }
  0xa6   :  { %7561 = vmatpush3.bf16.msra.mxu1 %v8468_v0  ;;  %7555 = vmatpush3.bf16.msra.mxu0 %v8417_v8 }
  0xa7   :  { %7562 = vmatprep.subr.bf16.mxu1 %v8376_v3  ;;  %7556 = vmatprep.subr.bf16.mxu0 %v8376_v3 }
  0xa8   :  { %6801 = vmatprep.mubr.msk.f32.mxu0 %vm8377_vm8, %v8378_v13  ;;  %6812 = vmatprep.mubr.msk.f32.mxu1 %vm8377_vm8, %v8378_v13 }
  0xaa   :  { %7564 = vmatpush3.bf16.msra.mxu1 %v8475_v7  ;;  %7558 = vmatpush3.bf16.msra.mxu0 %v8419_v9 }
  0xab   :  { %7565 = vmatprep.subr.bf16.mxu0 %v8376_v3  ;;  %7571 = vmatprep.subr.bf16.mxu1 %v8376_v3 }
  0xf3   :  { %v8525_v23 = vpop.f32.mrb[0].mxu0 }
  0xf4   :  { %v177_v24 = vpop.f32.mrb[1].mxu0 }
  0xf5   :  { %v8536_v32 = vadd.f32 %v177_v24, %v8459_v46 }
 0x164   :  { %v8527_v25 = vpop.f32.mrb[0].mxu1 }
 0x165   :  { %v264_v26 = vpop.f32.mrb[1].mxu1 }
 0x166   :  { %v8539_v33 = vadd.f32 %v264_v26, %v8533_v31 }
 0x168   :  { %v8529_v27 = vpop.f32.mrb[2].mxu0  ;;  %v8531_v28 = vpop.f32.mrb[2].mxu1 }
 0x169   :  { %v348_v29 = vpop.f32.mrb[3].mxu0  ;;  %v432_v30 = vpop.f32.mrb[3].mxu1 }
 0x16a   :  { %v8548_v47 = vadd.f32 %v432_v30, %v8543_v42  ;;  %v8552_v53 = vadd.f32 %v348_v29, %v8545_v44 }
 0x170   :  { %v511_v34 = vpop.f32.mrb[4].mxu0  ;;  %v604_v35 = vpop.f32.mrb[4].mxu1 }
 0x171   :  { %v515_v36 = vadd.f32 %v511_v34, %v8536_v32  ;;  %v608_v37 = vadd.f32 %v604_v35, %v8539_v33  ;;  %v6759_v38 = vpop.f32.mrb[5].mxu0  ;;  %v6770_v39 = vpop.f32.mrb[5].mxu1 }
 0x173   :  { %v6239_v40 = vmul.f32 -1.442695, %v515_v36  ;;  %v6240_v41 = vmul.f32 -1.442695, %v608_v37 }
 0x175   :  { %8066 = vpow2.f32 %v6239_v40 }
 0x176   :  { %8068 = vpow2.f32 %v6240_v41 }
 0x178   :  { %v693_v48 = vpop.f32.mrb[6].mxu0  ;;  %v777_v49 = vpop.f32.mrb[6].mxu1 }
 0x179   :  { %v781_v50 = vadd.f32 %v777_v49, %v8548_v47  ;;  %v6781_v51 = vpop.f32.mrb[7].mxu0  ;;  %v6792_v52 = vpop.f32.mrb[7].mxu1  ;;  %v697_v55 = vadd.f32 %v693_v48, %v8552_v53 }
 0x17b   :  { %v6241_v54 = vmul.f32 -1.442695, %v781_v50 }
 0x17d   :  { %8070 = vpow2.f32 %v6241_v54 }
 0x17e   :  { %8072 = vtanh.f32 %v697_v55 }
 0x17f   :  { %v8067_v56 = vpop.eup %8066 }
 0x180   :  { %v8069_v57 = vpop.eup %8068  ;;  %v519_v58 = vadd.f32 1.0, %v8067_v56 }
 0x181   :  { %v612_v59 = vadd.f32 1.0, %v8069_v57 }
 0x182   :  { %8074 = vrcp.f32 %v519_v58 }
 0x183   :  { %8076 = vrcp.f32 %v612_v59 }
 0x187   :  { %v8071_v60 = vpop.eup %8070 }
 0x188   :  { %v8073_v61 = vpop.eup %8072  ;;  %v785_v2 = vadd.f32 1.0, %v8071_v60 }
 0x18a   :  { %8078 = vrcp.f32 %v785_v2 }
 0x18c   :  { %v8075_v62 = vpop.eup %8074 }
 0x18d   :  { %v8077_v63 = vpop.eup %8076  ;;  %v789_v1 = vmul.f32 %v8075_v62, %v8073_v61 }
 0x18e   :  { %v788_v4 = vmul.f32 0.0, %v8077_v63 }
 0x190   :  { %v8555_v5 = vadd.f32 %v789_v1, %v788_v4 }
 0x192   :  { %8080 = vtanh.f32 %v8555_v5  ;;  %v1112_v57 = vrot.slane %v8555_v5, 6 }
 0x194   :  { %v8079_v6 = vpop.eup %8078 }
 0x19c   :  { %v8081_v10 = vpop.eup %8080 }
 0x19d   :  { %v8558_v11 = vmul.f32 %v8081_v10, %v8079_v6 }
 0x19f   :  { %6802 = vmatmul.mubr.msk.f32.vlgmr.msra.gmra.mrb[8].mxu0 %vm441_vm9, %v8558_v11  ;;  %6813 = vmatmul.mubr.msk.f32.vlgmr.msra.gmra.mrb[8].mxu1 %vm441_vm9, %v8558_v11 }
 0x1a0   :  { %7567 = vmatpush3.bf16.msra.mxu0 %v8485_v15  ;;  %7573 = vmatpush3.bf16.msra.mxu1 %v8487_v17 }
 0x1a1   :  { %7568 = vmatprep.subr.bf16.mxu0 %v8376_v3  ;;  %7574 = vmatprep.subr.bf16.mxu1 %v8376_v3 }
 0x1a2   :  { %6823 = vmatprep.mubr.msk.f32.mxu0 %vm8377_vm8, %v8378_v13  ;;  %6834 = vmatprep.mubr.msk.f32.mxu1 %vm8377_vm8, %v8378_v13 }
 0x1a4   :  { %7570 = vmatpush3.bf16.msra.mxu0 %v8495_v21  ;;  %7576 = vmatpush3.bf16.msra.mxu1 %v8497_v22 }
 0x1a5   :  { %7583 = vmatprep.subr.bf16.mxu1 %v8376_v3  ;;  %7577 = vmatprep.subr.bf16.mxu0 %v8376_v3 }
 0x1a7   :  { %6824 = vmatmul.mubr.msk.f32.vlgmr.msra.gmra.mrb[10].mxu0 %vm441_vm9, %v8558_v11  ;;  %6835 = vmatmul.mubr.msk.f32.vlgmr.msra.gmra.mrb[10].mxu1 %vm441_vm9, %v8558_v11 }
 0x1a8   :  { %7585 = vmatpush3.bf16.msra.mxu1 %v8468_v0  ;;  %7579 = vmatpush3.bf16.msra.mxu0 %v8417_v8 }
 0x1a9   :  { %7586 = vmatprep.subr.bf16.mxu1 %v8376_v3  ;;  %7580 = vmatprep.subr.bf16.mxu0 %v8376_v3 }
 0x1aa   :  { %6845 = vmatprep.mubr.msk.f32.mxu0 %vm8377_vm8, %v8378_v13  ;;  %6856 = vmatprep.mubr.msk.f32.mxu1 %vm8377_vm8, %v8378_v13 }
 0x1ac   :  { %7588 = vmatpush3.bf16.msra.mxu1 %v8475_v7  ;;  %7582 = vmatpush3.bf16.msra.mxu0 %v8419_v9 }
 0x1ad   :  { %7589 = vmatprep.subr.bf16.mxu0 %v8376_v3  ;;  %7595 = vmatprep.subr.bf16.mxu1 %v8376_v3 }
 0x272   :  { %v862_v12 = vpop.f32.mrb[8].mxu0  ;;  %v942_v14 = vpop.f32.mrb[8].mxu1 }
 0x273   :  { %v867_v16 = vrot.slane %v862_v12, 6  ;;  %v947_v18 = vrot.slane %v942_v14, 6  ;;  %v6803_v19 = vpop.f32.mrb[9].mxu0  ;;  %v6814_v20 = vpop.f32.mrb[9].mxu1 }
 0x275   :  { %v869_v24 = vadd.f32 %v867_v16, %v8536_v32  ;;  %v949_v26 = vadd.f32 %v947_v18, %v8539_v33 }
 0x277   :  { %v6243_v29 = vmul.f32 -1.442695, %v869_v24  ;;  %v6245_v30 = vmul.f32 -1.442695, %v949_v26 }
 0x279   :  { %8082 = vpow2.f32 %v6243_v29 }
 0x27a   :  { %8084 = vpow2.f32 %v6245_v30  ;;  %v1022_v34 = vpop.f32.mrb[10].mxu0  ;;  %v1097_v35 = vpop.f32.mrb[10].mxu1 }
 0x27b   :  { %v1102_v36 = vrot.slane %v1097_v35, 6  ;;  %v6825_v37 = vpop.f32.mrb[11].mxu0  ;;  %v6836_v38 = vpop.f32.mrb[11].mxu1  ;;  %v1027_v39 = vrot.slane %v1022_v34, 6 }
 0x27d   :  { %v1104_v40 = vadd.f32 %v1102_v36, %v8548_v47  ;;  %v1029_v48 = vadd.f32 %v1027_v39, %v8552_v53 }
 0x27f   :  { %v6248_v41 = vmul.f32 -1.442695, %v1104_v40 }
 0x281   :  { %8086 = vpow2.f32 %v6248_v41 }
 0x282   :  { %8088 = vtanh.f32 %v1029_v48 }
 0x283   :  { %v8083_v49 = vpop.eup %8082 }
 0x284   :  { %v8085_v50 = vpop.eup %8084  ;;  %v873_v51 = vadd.f32 1.0, %v8083_v49 }
 0x285   :  { %v953_v52 = vadd.f32 1.0, %v8085_v50 }
 0x286   :  { %8090 = vrcp.f32 %v873_v51 }
 0x287   :  { %8092 = vrcp.f32 %v953_v52 }
 0x28b   :  { %v8087_v54 = vpop.eup %8086 }
 0x28c   :  { %v8089_v55 = vpop.eup %8088  ;;  %v1108_v60 = vadd.f32 1.0, %v8087_v54 }
 0x28e   :  { %8094 = vrcp.f32 %v1108_v60 }
 0x290   :  { %v8091_v56 = vpop.eup %8090 }
 0x291   :  { %v8093_v58 = vpop.eup %8092  ;;  %v1115_v59 = vmul.f32 %v8091_v56, %v8089_v55 }
 0x292   :  { %v1114_v61 = vmul.f32 %v8093_v58, %v1112_v57 }
 0x294   :  { %v8597_v62 = vadd.f32 %v1115_v59, %v1114_v61 }
 0x296   :  { %8096 = vtanh.f32 %v8597_v62  ;;  %v1439_v54 = vrot.slane %v8597_v62, 6 }
 0x298   :  { %v8095_v63 = vpop.eup %8094 }
 0x2a0   :  { %v8097_v1 = vpop.eup %8096 }
 0x2a1   :  { %v8600_v2 = vmul.f32 %v8097_v1, %v8095_v63 }
 0x2a3   :  { %v1120_v4 = vrot.slane %v8600_v2, 2  ;;  %v3068_v1 = vsel %vm91_vm4, %v8558_v11, %v8600_v2 }
 0x2a5   :  { %6846 = vmatmul.mubr.msk.f32.vlgmr.msra.gmra.mrb[12].mxu0 %vm441_vm9, %v1120_v4  ;;  %6857 = vmatmul.mubr.msk.f32.vlgmr.msra.gmra.mrb[12].mxu1 %vm441_vm9, %v1120_v4 }
 0x2a6   :  { %7591 = vmatpush3.bf16.msra.mxu0 %v8485_v15  ;;  %7597 = vmatpush3.bf16.msra.mxu1 %v8487_v17 }
 0x2a7   :  { %7592 = vmatprep.subr.bf16.mxu0 %v8376_v3  ;;  %7598 = vmatprep.subr.bf16.mxu1 %v8376_v3 }
 0x2a8   :  { %6867 = vmatprep.mubr.msk.f32.mxu0 %vm8377_vm8, %v8378_v13  ;;  %6878 = vmatprep.mubr.msk.f32.mxu1 %vm8377_vm8, %v8378_v13 }
 0x2aa   :  { %7594 = vmatpush3.bf16.msra.mxu0 %v8495_v21  ;;  %7600 = vmatpush3.bf16.msra.mxu1 %v8497_v22 }
 0x2ab   :  { %7607 = vmatprep.subr.bf16.mxu1 %v8376_v3  ;;  %7601 = vmatprep.subr.bf16.mxu0 %v8376_v3 }
 0x2ad   :  { %6868 = vmatmul.mubr.msk.f32.vlgmr.msra.gmra.mrb[14].mxu0 %vm441_vm9, %v1120_v4  ;;  %6879 = vmatmul.mubr.msk.f32.vlgmr.msra.gmra.mrb[14].mxu1 %vm441_vm9, %v1120_v4 }
 0x2ae   :  { %7609 = vmatpush3.bf16.msra.mxu1 %v8468_v0  ;;  %7603 = vmatpush3.bf16.msra.mxu0 %v8417_v8 }
 0x2af   :  { %7610 = vmatprep.subr.bf16.mxu1 %v8376_v3  ;;  %7604 = vmatprep.subr.bf16.mxu0 %v8376_v3 }
 0x2b0   :  { %6889 = vmatprep.mubr.msk.f32.mxu0 %vm8377_vm8, %v8378_v13  ;;  %6900 = vmatprep.mubr.msk.f32.mxu1 %vm8377_vm8, %v8378_v13 }
 0x2b2   :  { %7612 = vmatpush3.bf16.msra.mxu1 %v8475_v7  ;;  %7606 = vmatpush3.bf16.msra.mxu0 %v8419_v9 }
 0x2b3   :  { %7613 = vmatprep.subr.bf16.mxu0 %v8376_v3  ;;  %7619 = vmatprep.subr.bf16.mxu1 %v8376_v3 }
 0x378   :  { %v1189_v5 = vpop.f32.mrb[12].mxu0  ;;  %v1269_v6 = vpop.f32.mrb[12].mxu1 }
 0x379   :  { %v1194_v10 = vrot.slane %v1189_v5, 4  ;;  %v1274_v12 = vrot.slane %v1269_v6, 4  ;;  %v6847_v14 = vpop.f32.mrb[13].mxu0  ;;  %v6858_v16 = vpop.f32.mrb[13].mxu1 }
 0x37b   :  { %v1196_v18 = vadd.f32 %v1194_v10, %v8536_v32  ;;  %v1276_v19 = vadd.f32 %v1274_v12, %v8539_v33 }
 0x37d   :  { %v6250_v20 = vmul.f32 -1.442695, %v1196_v18  ;;  %v6252_v24 = vmul.f32 -1.442695, %v1276_v19 }
 0x37f   :  { %8098 = vpow2.f32 %v6250_v20 }
 0x380   :  { %8100 = vpow2.f32 %v6252_v24  ;;  %v1349_v26 = vpop.f32.mrb[14].mxu0  ;;  %v1424_v29 = vpop.f32.mrb[14].mxu1 }
 0x381   :  { %v1429_v30 = vrot.slane %v1424_v29, 4  ;;  %v6869_v34 = vpop.f32.mrb[15].mxu0  ;;  %v6880_v35 = vpop.f32.mrb[15].mxu1  ;;  %v1354_v36 = vrot.slane %v1349_v26, 4 }
 0x383   :  { %v1431_v37 = vadd.f32 %v1429_v30, %v8548_v47  ;;  %v1356_v39 = vadd.f32 %v1354_v36, %v8552_v53 }
 0x385   :  { %v6255_v38 = vmul.f32 -1.442695, %v1431_v37 }
 0x387   :  { %8102 = vpow2.f32 %v6255_v38 }
 0x388   :  { %8104 = vtanh.f32 %v1356_v39 }
 0x389   :  { %v8099_v40 = vpop.eup %8098 }
 0x38a   :  { %v8101_v41 = vpop.eup %8100  ;;  %v1200_v48 = vadd.f32 1.0, %v8099_v40 }
 0x38b   :  { %v1280_v49 = vadd.f32 1.0, %v8101_v41 }
 0x38c   :  { %8106 = vrcp.f32 %v1200_v48 }
 0x38d   :  { %8108 = vrcp.f32 %v1280_v49 }
 0x391   :  { %v8103_v50 = vpop.eup %8102 }
 0x392   :  { %v8105_v51 = vpop.eup %8104  ;;  %v1435_v57 = vadd.f32 1.0, %v8103_v50 }
 0x394   :  { %8110 = vrcp.f32 %v1435_v57 }
 0x396   :  { %v8107_v52 = vpop.eup %8106 }
 0x397   :  { %v8109_v55 = vpop.eup %8108  ;;  %v1442_v56 = vmul.f32 %v8107_v52, %v8105_v51 }
 0x398   :  { %v1441_v58 = vmul.f32 %v8109_v55, %v1439_v54 }
 0x39a   :  { %v8636_v59 = vadd.f32 %v1442_v56, %v1441_v58 }
 0x39c   :  { %8112 = vtanh.f32 %v8636_v59  ;;  %v1766_v49 = vrot.slane %v8636_v59, 6  ;;  %v8715_v59 = vadd.f32 %v8525_v23, %v8459_v46  ;;  %v8725_v46 = vadd.f32 %v8531_v28, %v8543_v42 }
 0x39e   :  { %v8111_v60 = vpop.eup %8110 }
 0x3a6   :  { %v8113_v61 = vpop.eup %8112 }
 0x3a7   :  { %v1445_v63 = vmul.f32 %v8113_v61, %v8111_v60  ;;  %v8719_v60 = vadd.f32 %v8527_v25, %v8533_v31 }
 0x3a9   :  { %v1447_v4 = vrot.slane %v1445_v63, 4  ;;  %v8643_v5 = vsel %vm93_vm5, %v3068_v1, %v1445_v63 }
 0x3ab   :  { %6890 = vmatmul.mubr.msk.f32.vlgmr.msra.gmra.mrb[16].mxu0 %vm441_vm9, %v1447_v4  ;;  %6901 = vmatmul.mubr.msk.f32.vlgmr.msra.gmra.mrb[16].mxu1 %vm441_vm9, %v1447_v4 }
 0x3ac   :  { %7615 = vmatpush3.bf16.msra.mxu0 %v8485_v15  ;;  %7621 = vmatpush3.bf16.msra.mxu1 %v8487_v17 }
 0x3ad   :  { %7616 = vmatprep.subr.bf16.mxu0 %v8376_v3  ;;  %7622 = vmatprep.subr.bf16.mxu1 %v8376_v3 }
 0x3ae   :  { %6911 = vmatprep.mubr.msk.f32.mxu0 %vm8377_vm8, %v8378_v13  ;;  %6922 = vmatprep.mubr.msk.f32.mxu1 %vm8377_vm8, %v8378_v13 }
 0x3b0   :  { %7618 = vmatpush3.bf16.msra.mxu0 %v8495_v21  ;;  %7624 = vmatpush3.bf16.msra.mxu1 %v8497_v22 }
 0x3b1   :  { %7631 = vmatprep.subr.bf16.mxu1 %v8376_v3  ;;  %7625 = vmatprep.subr.bf16.mxu0 %v8376_v3 }
 0x3b3   :  { %6912 = vmatmul.mubr.msk.f32.vlgmr.msra.gmra.mrb[18].mxu0 %vm441_vm9, %v1447_v4  ;;  %6923 = vmatmul.mubr.msk.f32.vlgmr.msra.gmra.mrb[18].mxu1 %vm441_vm9, %v1447_v4 }
 0x3b4   :  { %7633 = vmatpush3.bf16.msra.mxu1 %v8468_v0  ;;  %7627 = vmatpush3.bf16.msra.mxu0 %v8417_v8 }
 0x3b5   :  { %7634 = vmatprep.subr.bf16.mxu1 %v8376_v3  ;;  %7628 = vmatprep.subr.bf16.mxu0 %v8376_v3 }
 0x3b6   :  { %6933 = vmatprep.mubr.msk.f32.mxu0 %vm8377_vm8, %v8378_v13  ;;  %6944 = vmatprep.mubr.msk.f32.mxu1 %vm8377_vm8, %v8378_v13 }
 0x3b8   :  { %7636 = vmatpush3.bf16.msra.mxu1 %v8475_v7  ;;  %7630 = vmatpush3.bf16.msra.mxu0 %v8419_v9 }
 0x3b9   :  { %7637 = vmatprep.subr.bf16.mxu0 %v8376_v3  ;;  %7643 = vmatprep.subr.bf16.mxu1 %v8376_v3 }
 0x47e   :  { %v1516_v11 = vpop.f32.mrb[16].mxu0  ;;  %v1596_v62 = vpop.f32.mrb[16].mxu1 }
 0x47f   :  { %v1521_v2 = vrot.slane %v1516_v11, 2  ;;  %v1601_v6 = vrot.slane %v1596_v62, 2  ;;  %v6891_v10 = vpop.f32.mrb[17].mxu0  ;;  %v6902_v12 = vpop.f32.mrb[17].mxu1 }
 0x480   :  { %v8730_v12 = vadd.f32 %v8529_v27, %v8545_v44 }
 0x481   :  { %v1523_v14 = vadd.f32 %v1521_v2, %v8536_v32  ;;  %v1603_v16 = vadd.f32 %v1601_v6, %v8539_v33 }
 0x483   :  { %v6257_v18 = vmul.f32 -1.442695, %v1523_v14  ;;  %v6259_v19 = vmul.f32 -1.442695, %v1603_v16 }
 0x485   :  { %8114 = vpow2.f32 %v6257_v18 }
 0x486   :  { %8116 = vpow2.f32 %v6259_v19  ;;  %v1676_v20 = vpop.f32.mrb[18].mxu0  ;;  %v1751_v24 = vpop.f32.mrb[18].mxu1 }
 0x487   :  { %v1756_v26 = vrot.slane %v1751_v24, 2  ;;  %v6913_v29 = vpop.f32.mrb[19].mxu0  ;;  %v6924_v30 = vpop.f32.mrb[19].mxu1  ;;  %v1681_v34 = vrot.slane %v1676_v20, 2 }
 0x489   :  { %v1758_v35 = vadd.f32 %v1756_v26, %v8548_v47  ;;  %v1683_v37 = vadd.f32 %v1681_v34, %v8552_v53 }
 0x48b   :  { %v6262_v36 = vmul.f32 -1.442695, %v1758_v35 }
 0x48d   :  { %8118 = vpow2.f32 %v6262_v36 }
 0x48e   :  { %8120 = vtanh.f32 %v1683_v37 }
 0x48f   :  { %v8115_v38 = vpop.eup %8114 }
 0x490   :  { %v8117_v39 = vpop.eup %8116  ;;  %v1527_v32 = vadd.f32 1.0, %v8115_v38 }
 0x491   :  { %v1607_v33 = vadd.f32 1.0, %v8117_v39 }
 0x492   :  { %8122 = vrcp.f32 %v1527_v32 }
 0x493   :  { %8124 = vrcp.f32 %v1607_v33 }
 0x497   :  { %v8119_v40 = vpop.eup %8118 }
 0x498   :  { %v8121_v41 = vpop.eup %8120  ;;  %v1762_v52 = vadd.f32 1.0, %v8119_v40 }
 0x49a   :  { %8126 = vrcp.f32 %v1762_v52 }
 0x49c   :  { %v8123_v48 = vpop.eup %8122 }
 0x49d   :  { %v8125_v50 = vpop.eup %8124  ;;  %v1769_v51 = vmul.f32 %v8123_v48, %v8121_v41 }
 0x49e   :  { %v1768_v47 = vmul.f32 %v8125_v50, %v1766_v49 }
 0x4a0   :  { %v8678_v54 = vadd.f32 %v1769_v51, %v1768_v47 }
 0x4a2   :  { %8128 = vtanh.f32 %v8678_v54  ;;  %v2081_v29 = vrot.slane %v8678_v54, 6 }
 0x4a4   :  { %v8127_v53 = vpop.eup %8126 }
 0x4ac   :  { %v8129_v55 = vpop.eup %8128 }
 0x4ad   :  { %v1772_v56 = vmul.f32 %v8129_v55, %v8127_v53 }
 0x4af   :  { %v1774_v57 = vrot.slane %v1772_v56, 6  ;;  %v8683_v58 = vsel %vm95_vm6, %v8643_v5, %v1772_v56 }
 0x4b1   :  { %6934 = vmatmul.mubr.msk.f32.vlgmr.msra.gmra.mrb[20].mxu0 %vm441_vm9, %v1774_v57  ;;  %6945 = vmatmul.mubr.msk.f32.vlgmr.msra.gmra.mrb[20].mxu1 %vm441_vm9, %v1774_v57 }
 0x4b2   :  { %7639 = vmatpush3.bf16.msra.mxu0 %v8485_v15  ;;  %7645 = vmatpush3.bf16.msra.mxu1 %v8487_v17 }
 0x4b3   :  { %7640 = vmatprep.subr.bf16.mxu0 %v8376_v3  ;;  %7646 = vmatprep.subr.bf16.mxu1 %v8376_v3 }
 0x4b4   :  { %6955 = vmatprep.mubr.msk.f32.mxu0 %vm8377_vm8, %v8378_v13  ;;  %6966 = vmatprep.mubr.msk.f32.mxu1 %vm8377_vm8, %v8378_v13 }
 0x4b6   :  { %7642 = vmatpush3.bf16.msra.mxu0 %v8495_v21  ;;  %7648 = vmatpush3.bf16.msra.mxu1 %v8497_v22 }
 0x4b7   :  { %7655 = vmatprep.subr.bf16.mxu1 %v8376_v3  ;;  %7649 = vmatprep.subr.bf16.mxu0 %v8376_v3 }
 0x4b9   :  { %6956 = vmatmul.mubr.msk.f32.vlgmr.msra.gmra.mrb[22].mxu0 %vm441_vm9, %v1774_v57  ;;  %6967 = vmatmul.mubr.msk.f32.vlgmr.msra.gmra.mrb[22].mxu1 %vm441_vm9, %v1774_v57 }
 0x4ba   :  { %7657 = vmatpush3.bf16.msra.mxu1 %v8468_v0  ;;  %7651 = vmatpush3.bf16.msra.mxu0 %v8417_v8 }
 0x4bb   :  { %7658 = vmatprep.subr.bf16.mxu1 %v8376_v3  ;;  %7652 = vmatprep.subr.bf16.mxu0 %v8376_v3 }
 0x4bc   :  { %6977 = vmatprep.mubr.msk.f32.mxu0 %vm8377_vm8, %v8378_v13  ;;  %6988 = vmatprep.mubr.msk.f32.mxu1 %vm8377_vm8, %v8378_v13 }
 0x4be   :  { %7660 = vmatpush3.bf16.msra.mxu1 %v8475_v7  ;;  %7654 = vmatpush3.bf16.msra.mxu0 %v8419_v9 }
 0x4bf   :  { %7661 = vmatprep.subr.bf16.mxu0 %v8376_v3  ;;  %7667 = vmatprep.subr.bf16.mxu1 %v8376_v3 }
 0x584   :  { %v1843_v61 = vpop.f32.mrb[20].mxu0  ;;  %v1920_v63 = vpop.f32.mrb[20].mxu1 }
 0x585   :  { %v1847_v1 = vadd.f32 %v1843_v61, %v8715_v59  ;;  %v1924_v4 = vadd.f32 %v1920_v63, %v8719_v60  ;;  %v6935_v5 = vpop.f32.mrb[21].mxu0  ;;  %v6946_v11 = vpop.f32.mrb[21].mxu1 }
 0x587   :  { %v6264_v62 = vmul.f32 -1.442695, %v1847_v1  ;;  %v6266_v2 = vmul.f32 -1.442695, %v1924_v4 }
 0x589   :  { %8130 = vpow2.f32 %v6264_v62 }
 0x58a   :  { %8132 = vpow2.f32 %v6266_v2 }
 0x58c   :  { %v1997_v23 = vpop.f32.mrb[22].mxu0  ;;  %v2069_v6 = vpop.f32.mrb[22].mxu1 }
 0x58d   :  { %v2073_v25 = vadd.f32 %v2069_v6, %v8725_v46  ;;  %v6957_v31 = vpop.f32.mrb[23].mxu0  ;;  %v6968_v10 = vpop.f32.mrb[23].mxu1  ;;  %v2001_v16 = vadd.f32 %v1997_v23, %v8730_v12 }
 0x58f   :  { %v6269_v14 = vmul.f32 -1.442695, %v2073_v25 }
 0x591   :  { %8134 = vpow2.f32 %v6269_v14 }
 0x592   :  { %8136 = vtanh.f32 %v2001_v16 }
 0x593   :  { %v8131_v18 = vpop.eup %8130 }
 0x594   :  { %v8133_v19 = vpop.eup %8132  ;;  %v1851_v20 = vadd.f32 1.0, %v8131_v18 }
 0x595   :  { %v1928_v24 = vadd.f32 1.0, %v8133_v19 }
 0x596   :  { %8138 = vrcp.f32 %v1851_v20 }
 0x597   :  { %8140 = vrcp.f32 %v1928_v24 }
 0x59b   :  { %v8135_v28 = vpop.eup %8134 }
 0x59c   :  { %v8137_v42 = vpop.eup %8136  ;;  %v2077_v27 = vadd.f32 1.0, %v8135_v28 }
 0x59e   :  { %8142 = vrcp.f32 %v2077_v27  ;;  %v46_v27 = vld [vmem:[#allocation2 + $0x70] sm:$0xff] }
 0x5a0   :  { %v8139_v26 = vpop.eup %8138 }
 0x5a1   :  { %v8141_v30 = vpop.eup %8140  ;;  %v2084_v34 = vmul.f32 %v8139_v26, %v8137_v42  ;;  %v8814_v42 = vld [vmem:[#allocation2 + $0x48] sm:$0xff] }
 0x5a2   :  { %v2083_v44 = vmul.f32 %v8141_v30, %v2081_v29  ;;  %v8818_v29 = vld [vmem:[#allocation2 + $0x50] sm:$0xff]  ;;  %v43_v30 = vld [vmem:[#allocation2 + $0x58] sm:$0xff] }
 0x5a4   :  { %v8734_v35 = vadd.f32 %v2084_v34, %v2083_v44  ;;  %v45_v34 = vld [vmem:[#allocation2 + $0x68] sm:$0xff] }
 0x5a6   :  { %8144 = vtanh.f32 %v8734_v35  ;;  %v2407_v25 = vrot.slane %v8734_v35, 6  ;;  %v8825_v35 = vpack.c.bf16 %v46_v27, %v45_v34 }
 0x5a8   :  { %v8143_v36 = vpop.eup %8142 }
 0x5b0   :  { %v8145_v37 = vpop.eup %8144 }
 0x5b1   :  { %v8737_v38 = vmul.f32 %v8145_v37, %v8143_v36  ;;  %v8041_v37 = vpack.i.bf16 %v46_v27, %v45_v34 }
 0x5b3   :  { %6978 = vmatmul.mubr.msk.f32.vlgmr.msra.gmra.mrb[24].mxu0 %vm441_vm9, %v8737_v38  ;;  %6989 = vmatmul.mubr.msk.f32.vlgmr.msra.gmra.mrb[24].mxu1 %vm441_vm9, %v8737_v38 }
 0x5b4   :  { %7663 = vmatpush3.bf16.msra.mxu0 %v8485_v15  ;;  %7669 = vmatpush3.bf16.msra.mxu1 %v8487_v17 }
 0x5b5   :  { %7664 = vmatprep.subr.bf16.mxu0 %v8376_v3  ;;  %7670 = vmatprep.subr.bf16.mxu1 %v8376_v3 }
 0x5b6   :  { %6999 = vmatprep.mubr.msk.f32.mxu0 %vm8377_vm8, %v8378_v13  ;;  %7010 = vmatprep.mubr.msk.f32.mxu1 %vm8377_vm8, %v8378_v13 }
 0x5b8   :  { %7666 = vmatpush3.bf16.msra.mxu0 %v8495_v21  ;;  %7672 = vmatpush3.bf16.msra.mxu1 %v8497_v22 }
 0x5b9   :  { %7679 = vmatprep.subr.bf16.mxu1 %v8376_v3  ;;  %7673 = vmatprep.subr.bf16.mxu0 %v8376_v3 }
 0x5bb   :  { %7000 = vmatmul.mubr.msk.f32.vlgmr.msra.gmra.mrb[26].mxu0 %vm441_vm9, %v8737_v38  ;;  %7011 = vmatmul.mubr.msk.f32.vlgmr.msra.gmra.mrb[26].mxu1 %vm441_vm9, %v8737_v38 }
 0x5bc   :  { %7681 = vmatpush3.bf16.msra.mxu1 %v8468_v0  ;;  %7675 = vmatpush3.bf16.msra.mxu0 %v8417_v8 }
 0x5bd   :  { %7682 = vmatprep.subr.bf16.mxu1 %v8376_v3  ;;  %7676 = vmatprep.subr.bf16.mxu0 %v8376_v3 }
 0x5be   :  { %7021 = vmatprep.mubr.msk.f32.mxu0 %vm8377_vm8, %v8378_v13  ;;  %7032 = vmatprep.mubr.msk.f32.mxu1 %vm8377_vm8, %v8378_v13 }
 0x5c0   :  { %7684 = vmatpush3.bf16.msra.mxu1 %v8475_v7  ;;  %7678 = vmatpush3.bf16.msra.mxu0 %v8419_v9 }
 0x5c1   :  { %7685 = vmatprep.subr.bf16.mxu0 %v8376_v3  ;;  %7691 = vmatprep.subr.bf16.mxu1 %v8376_v3 }
 0x686   :  { %v2157_v39 = vpop.f32.mrb[24].mxu0  ;;  %v2237_v32 = vpop.f32.mrb[24].mxu1 }
 0x687   :  { %v2162_v33 = vrot.slane %v2157_v39, 6  ;;  %v2242_v40 = vrot.slane %v2237_v32, 6  ;;  %v6979_v41 = vpop.f32.mrb[25].mxu0  ;;  %v6990_v48 = vpop.f32.mrb[25].mxu1 }
 0x689   :  { %v2164_v49 = vadd.f32 %v2162_v33, %v8715_v59  ;;  %v2244_v50 = vadd.f32 %v2242_v40, %v8719_v60 }
 0x68b   :  { %v6271_v51 = vmul.f32 -1.442695, %v2164_v49  ;;  %v6273_v52 = vmul.f32 -1.442695, %v2244_v50 }
 0x68d   :  { %8146 = vpow2.f32 %v6271_v51 }
 0x68e   :  { %8148 = vpow2.f32 %v6273_v52  ;;  %v2317_v47 = vpop.f32.mrb[26].mxu0  ;;  %v2392_v54 = vpop.f32.mrb[26].mxu1 }
 0x68f   :  { %v2397_v53 = vrot.slane %v2392_v54, 6  ;;  %v7001_v55 = vpop.f32.mrb[27].mxu0  ;;  %v7012_v56 = vpop.f32.mrb[27].mxu1  ;;  %v2322_v57 = vrot.slane %v2317_v47, 6 }
 0x691   :  { %v2399_v61 = vadd.f32 %v2397_v53, %v8725_v46  ;;  %v2324_v1 = vadd.f32 %v2322_v57, %v8730_v12 }
 0x693   :  { %v6276_v63 = vmul.f32 -1.442695, %v2399_v61 }
 0x695   :  { %8150 = vpow2.f32 %v6276_v63 }
 0x696   :  { %8152 = vtanh.f32 %v2324_v1 }
 0x697   :  { %v8147_v4 = vpop.eup %8146 }
 0x698   :  { %v8149_v5 = vpop.eup %8148  ;;  %v2168_v11 = vadd.f32 1.0, %v8147_v4 }
 0x699   :  { %v2248_v62 = vadd.f32 1.0, %v8149_v5 }
 0x69a   :  { %8154 = vrcp.f32 %v2168_v11 }
 0x69b   :  { %8156 = vrcp.f32 %v2248_v62 }
 0x69f   :  { %v8151_v2 = vpop.eup %8150 }
 0x6a0   :  { %v8153_v23 = vpop.eup %8152  ;;  %v2403_v14 = vadd.f32 1.0, %v8151_v2 }
 0x6a2   :  { %8158 = vrcp.f32 %v2403_v14 }
 0x6a4   :  { %v8155_v6 = vpop.eup %8154 }
 0x6a5   :  { %v8157_v31 = vpop.eup %8156  ;;  %v2410_v10 = vmul.f32 %v8155_v6, %v8153_v23 }
 0x6a6   :  { %v2409_v16 = vmul.f32 %v8157_v31, %v2407_v25 }
 0x6a8   :  { %v8776_v18 = vadd.f32 %v2410_v10, %v2409_v16 }
 0x6aa   :  { %8160 = vtanh.f32 %v8776_v18  ;;  %v2734_v25 = vrot.slane %v8776_v18, 6 }
 0x6ac   :  { %v8159_v19 = vpop.eup %8158 }
 0x6b4   :  { %v8161_v20 = vpop.eup %8160 }
 0x6b5   :  { %v8779_v24 = vmul.f32 %v8161_v20, %v8159_v19 }
 0x6b7   :  { %v2415_v28 = vrot.slane %v8779_v24, 2 }
 0x6b9   :  { %7022 = vmatmul.mubr.msk.f32.vlgmr.msra.gmra.mrb[28].mxu0 %vm441_vm9, %v2415_v28  ;;  %7033 = vmatmul.mubr.msk.f32.vlgmr.msra.gmra.mrb[28].mxu1 %vm441_vm9, %v2415_v28 }
 0x6ba   :  { %7687 = vmatpush3.bf16.msra.mxu0 %v8485_v15  ;;  %7693 = vmatpush3.bf16.msra.mxu1 %v8487_v17 }
 0x6bb   :  { %7688 = vmatprep.subr.bf16.mxu0 %v8376_v3  ;;  %7694 = vmatprep.subr.bf16.mxu1 %v8376_v3 }
 0x6bc   :  { %7043 = vmatprep.mubr.msk.f32.mxu0 %vm8377_vm8, %v8378_v13  ;;  %7054 = vmatprep.mubr.msk.f32.mxu1 %vm8377_vm8, %v8378_v13 }
 0x6be   :  { %7690 = vmatpush3.bf16.msra.mxu0 %v8495_v21  ;;  %7696 = vmatpush3.bf16.msra.mxu1 %v8497_v22 }
 0x6bf   :  { %7703 = vmatprep.subr.bf16.mxu1 %v8376_v3  ;;  %7697 = vmatprep.subr.bf16.mxu0 %v8376_v3 }
 0x6c1   :  { %7044 = vmatmul.mubr.msk.f32.vlgmr.msra.gmra.mrb[30].mxu0 %vm441_vm9, %v2415_v28  ;;  %7055 = vmatmul.mubr.msk.f32.vlgmr.msra.gmra.mrb[30].mxu1 %vm441_vm9, %v2415_v28 }
 0x6c2   :  { %7705 = vmatpush3.bf16.msra.mxu1 %v8468_v0  ;;  %7699 = vmatpush3.bf16.msra.mxu0 %v8417_v8  ;;  %v8810_v0 = vld [vmem:[#allocation2 + $0x38] sm:$0xff]  ;;  %v8812_v8 = vld [vmem:[#allocation2 + $0x40] sm:$0xff] }
 0x6c3   :  { %7706 = vmatprep.subr.bf16.mxu1 %v8376_v3  ;;  %7700 = vmatprep.subr.bf16.mxu0 %v8376_v3  ;;  %v8006_v26 = vpack.i.bf16 %v8812_v8, %v8810_v0 }
 0x6c4   :  { %7065 = vmatprep.mubr.msk.f32.mxu0 %vm8377_vm8, %v8378_v13  ;;  %7076 = vmatprep.mubr.msk.f32.mxu1 %vm8377_vm8, %v8378_v13 }
 0x6c5   :  { %8007 = vrot.lane.b32.xlu0 %v8006_v26, %s8373_s6 }
 0x6c6   :  { %7708 = vmatpush3.bf16.msra.mxu1 %v8475_v7  ;;  %7702 = vmatpush3.bf16.msra.mxu0 %v8419_v9  ;;  %v8011_v7 = vpack.i.bf16 %v8818_v29, %v8814_v42  ;;  %v44_v9 = vld [vmem:[#allocation2 + $0x60] sm:$0xff] }
 0x6c7   :  { %7709 = vmatprep.subr.bf16.mxu0 %v8376_v3  ;;  %7715 = vmatprep.subr.bf16.mxu1 %v8376_v3  ;;  %v8823_v44 = vpack.c.bf16 %v44_v9, %v43_v30  ;;  %v8036_v36 = vpack.i.bf16 %v44_v9, %v43_v30  ;;  %v3071_v30 = vsel %vm91_vm4, %v8737_v38, %v8779_v24 }
 0x6c8   :  { %8012 = vrot.lane.b32.xlu1 %v8011_v7, %s8373_s6  ;;  %v7721_v24 = vpack.c.bf16 %v8812_v8, %v8810_v0  ;;  %v47_v8 = vld [vmem:[#allocation2 + $0x78] sm:$0xff] }
 0x6c9   :  { %8017 = vrot.lane.b32.xlu0 %v8006_v26, %s8375_s0 }
 0x6cc   :  { %8022 = vrot.lane.b32.xlu1 %v8006_v26, %s8374_s7 }
 0x6cd   :  { %8027 = vrot.lane.b32.xlu0 %v8011_v7, %s8375_s0 }
 0x6d0   :  { %8032 = vrot.lane.b32.xlu1 %v8011_v7, %s8374_s7 }
 0x6d1   :  { %8037 = vrot.lane.b32.xlu0 %v8036_v36, %s8373_s6 }
 0x6d4   :  { %8042 = vrot.lane.b32.xlu1 %v8041_v37, %s8373_s6 }
 0x6d5   :  { %8047 = vrot.lane.b32.xlu0 %v8036_v36, %s8375_s0 }
 0x6d8   :  { %8052 = vrot.lane.b32.xlu1 %v8036_v36, %s8374_s7 }
 0x6d9   :  { %8057 = vrot.lane.b32.xlu0 %v8041_v37, %s8375_s0 }
 0x6dc   :  { %8062 = vrot.lane.b32.xlu1 %v8041_v37, %s8374_s7 }
 0x73a   :  { %v8013_v18 = vpop.permute.xlu1 %8012 }
 0x73b   :  { %v8014_v34 = vunpack.i.l.bf16 %v8013_v18 }
 0x78c   :  { %v2484_v39 = vpop.f32.mrb[28].mxu0  ;;  %v2564_v32 = vpop.f32.mrb[28].mxu1 }
 0x78d   :  { %v2489_v33 = vrot.slane %v2484_v39, 4  ;;  %v2569_v40 = vrot.slane %v2564_v32, 4  ;;  %v7023_v41 = vpop.f32.mrb[29].mxu0  ;;  %v7034_v48 = vpop.f32.mrb[29].mxu1 }
 0x78e   :  { %v8023_v39 = vpop.permute.xlu1 %8022 }
 0x78f   :  { %v2491_v49 = vadd.f32 %v2489_v33, %v8715_v59  ;;  %v2571_v50 = vadd.f32 %v2569_v40, %v8719_v60  ;;  %v8025_v40 = vunpack.i.h.bf16 %v8023_v39  ;;  %v8024_v41 = vunpack.i.l.bf16 %v8023_v39 }
 0x791   :  { %v6278_v51 = vmul.f32 -1.442695, %v2491_v49  ;;  %v6280_v52 = vmul.f32 -1.442695, %v2571_v50  ;;  %v8876_v0 = vpack.c.bf16 %v8025_v40, %v8024_v41 }
 0x793   :  { %8162 = vpow2.f32 %v6278_v51 }
 0x794   :  { %8164 = vpow2.f32 %v6280_v52  ;;  %v2644_v47 = vpop.f32.mrb[30].mxu0  ;;  %v2719_v54 = vpop.f32.mrb[30].mxu1 }
 0x795   :  { %v2724_v53 = vrot.slane %v2719_v54, 4  ;;  %v7045_v55 = vpop.f32.mrb[31].mxu0  ;;  %v7056_v56 = vpop.f32.mrb[31].mxu1  ;;  %v2649_v57 = vrot.slane %v2644_v47, 4 }
 0x797   :  { %v2726_v61 = vadd.f32 %v2724_v53, %v8725_v46  ;;  %v2651_v1 = vadd.f32 %v2649_v57, %v8730_v12 }
 0x799   :  { %v6283_v63 = vmul.f32 -1.442695, %v2726_v61 }
 0x79b   :  { %8166 = vpow2.f32 %v6283_v63 }
 0x79c   :  { %8168 = vtanh.f32 %v2651_v1 }
 0x79d   :  { %v8163_v4 = vpop.eup %8162 }
 0x79e   :  { %v8165_v5 = vpop.eup %8164  ;;  %v2495_v11 = vadd.f32 1.0, %v8163_v4 }
 0x79f   :  { %v2575_v62 = vadd.f32 1.0, %v8165_v5 }
 0x7a0   :  { %8170 = vrcp.f32 %v2495_v11 }
 0x7a1   :  { %8172 = vrcp.f32 %v2575_v62 }
 0x7a5   :  { %v8167_v2 = vpop.eup %8166 }
 0x7a6   :  { %v8169_v23 = vpop.eup %8168  ;;  %v2730_v14 = vadd.f32 1.0, %v8167_v2 }
 0x7a8   :  { %8174 = vrcp.f32 %v2730_v14 }
 0x7aa   :  { %v8171_v6 = vpop.eup %8170 }
 0x7ab   :  { %v8173_v31 = vpop.eup %8172  ;;  %v2737_v10 = vmul.f32 %v8171_v6, %v8169_v23 }
 0x7ac   :  { %v2736_v16 = vmul.f32 %v8173_v31, %v2734_v25 }
 0x7ae   :  { %v8843_v19 = vadd.f32 %v2737_v10, %v2736_v16 }
 0x7b0   :  { %8176 = vtanh.f32 %v8843_v19  ;;  %v3061_v10 = vrot.slane %v8843_v19, 6 }
 0x7b2   :  { %v8175_v20 = vpop.eup %8174 }
 0x7ba   :  { %v8177_v28 = vpop.eup %8176 }
 0x7bb   :  { %v2740_v26 = vmul.f32 %v8177_v28, %v8175_v20 }
 0x7bd   :  { %v2742_v7 = vrot.slane %v2740_v26, 4  ;;  %v8850_v9 = vsel %vm93_vm5, %v3071_v30, %v2740_v26 }
 0x7bf   :  { %7066 = vmatmul.mubr.msk.f32.vlgmr.msra.gmra.mrb[32].mxu0 %vm441_vm9, %v2742_v7  ;;  %7077 = vmatmul.mubr.msk.f32.vlgmr.msra.gmra.mrb[32].mxu1 %vm441_vm9, %v2742_v7 }
 0x7c0   :  { %7711 = vmatpush3.bf16.msra.mxu0 %v8485_v15  ;;  %7717 = vmatpush3.bf16.msra.mxu1 %v8487_v17  ;;  %v8008_v15 = vpop.permute.xlu0 %8007 }
 0x7c1   :  { %7712 = vmatprep.subr.bf16.mxu0 %v8376_v3  ;;  %7718 = vmatprep.subr.bf16.mxu1 %v8376_v3  ;;  %v8010_v17 = vunpack.i.h.bf16 %v8008_v15  ;;  %v8009_v38 = vunpack.i.l.bf16 %v8008_v15 }
 0x7c2   :  { %7087 = vmatprep.mubr.msk.f32.mxu0 %vm8377_vm8, %v8378_v13  ;;  %7098 = vmatprep.mubr.msk.f32.mxu1 %vm8377_vm8, %v8378_v13 }
 0x7c3   :  { %v7729_v27 = vpack.c.bf16 %v8010_v17, %v8009_v38 }
 0x7c4   :  { %7714 = vmatpush3.bf16.msra.mxu0 %v8495_v21  ;;  %7720 = vmatpush3.bf16.msra.mxu1 %v8497_v22  ;;  %v7725_v21 = vpack.c.bf16 %v8818_v29, %v8814_v42  ;;  %v8015_v22 = vunpack.i.h.bf16 %v8013_v18  ;;  %v8018_v37 = vpop.permute.xlu0 %8017  ;;  %v8882_v42 = vrot.slane %v47_v8, %v102_v45 }
 0x7c5   :  { %7722 = vmatprep.subr.bf16.mxu0 %v7721_v24  ;;  %7730 = vmatprep.subr.bf16.mxu1 %v7729_v27  ;;  %v8020_v32 = vunpack.i.h.bf16 %v8018_v37  ;;  %v8019_v33 = vunpack.i.l.bf16 %v8018_v37 }
 0x7c6   :  { %v7733_v36 = vpack.c.bf16 %v8015_v22, %v8014_v34  ;;  %3176 = vrot.lane.b32.xlu0 %v8882_v42, %s8373_s6  ;;  %3266 = vrot.lane.b32.xlu1 %v8882_v42, %s8375_s0 }
 0x7c7   :  { %7088 = vmatmul.mubr.msk.f32.vlgmr.msra.gmra.mrb[34].mxu0 %vm441_vm9, %v2742_v7  ;;  %7099 = vmatmul.mubr.msk.f32.vlgmr.msra.gmra.mrb[34].mxu1 %vm441_vm9, %v2742_v7  ;;  %v8874_v48 = vpack.c.bf16 %v8020_v32, %v8019_v33 }
 0x7c8   :  { %7109 = vmatprep.mubr.msk.f32.mxu0 %vm441_vm9, %v8683_v58  ;;  %7120 = vmatprep.mubr.msk.f32.mxu1 %vm441_vm9, %v8683_v58  ;;  %v8028_v26 = vpop.permute.xlu0 %8027 }
 0x7c9   :  { %7724 = vmatpush3.bf16.msra.mxu0 %v7721_v24  ;;  %7732 = vmatpush3.bf16.msra.mxu1 %v7729_v27  ;;  %v8030_v17 = vunpack.i.h.bf16 %v8028_v26  ;;  %v8029_v38 = vunpack.i.l.bf16 %v8028_v26 }
 0x7ca   :  { %7726 = vmatprep.subr.bf16.mxu0 %v7725_v21  ;;  %7734 = vmatprep.subr.bf16.mxu1 %v7733_v36 }
 0x7cb   :  { %3356 = vrot.lane.b32.xlu0 %v8882_v42, %s8374_s7  ;;  %v7741_v19 = vpack.c.bf16 %v8030_v17, %v8029_v38 }
 0x7cd   :  { %7728 = vmatpush3.bf16.msra.mxu0 %v7725_v21  ;;  %7736 = vmatpush3.bf16.msra.mxu1 %v7733_v36  ;;  %v8038_v21 = vpop.permute.xlu0 %8037 }
 0x7ce   :  { %7738 = vmatprep.subr.bf16.mxu0 %v8874_v48  ;;  %7746 = vmatprep.subr.bf16.mxu1 %v8876_v0  ;;  %v8040_v36 = vunpack.i.h.bf16 %v8038_v21  ;;  %v8039_v37 = vunpack.i.l.bf16 %v8038_v21 }
 0x7d0   :  { %v8905_v32 = vpack.c.bf16 %v8040_v36, %v8039_v37 }
 0x892   :  { %v2811_v29 = vpop.f32.mrb[32].mxu0  ;;  %v2891_v49 = vpop.f32.mrb[32].mxu1 }
 0x893   :  { %v2816_v50 = vrot.slane %v2811_v29, 2  ;;  %v2896_v51 = vrot.slane %v2891_v49, 2  ;;  %v7067_v52 = vpop.f32.mrb[33].mxu0  ;;  %v7078_v47 = vpop.f32.mrb[33].mxu1 }
 0x895   :  { %v2818_v54 = vadd.f32 %v2816_v50, %v8715_v59  ;;  %v2898_v45 = vadd.f32 %v2896_v51, %v8719_v60 }
 0x897   :  { %v6285_v53 = vmul.f32 -1.442695, %v2818_v54  ;;  %v6287_v55 = vmul.f32 -1.442695, %v2898_v45 }
 0x899   :  { %8178 = vpow2.f32 %v6285_v53 }
 0x89a   :  { %8180 = vpow2.f32 %v6287_v55  ;;  %v2971_v56 = vpop.f32.mrb[34].mxu0  ;;  %v3046_v57 = vpop.f32.mrb[34].mxu1 }
 0x89b   :  { %v3051_v61 = vrot.slane %v3046_v57, 2  ;;  %v7089_v63 = vpop.f32.mrb[35].mxu0  ;;  %v7100_v1 = vpop.f32.mrb[35].mxu1  ;;  %v2976_v4 = vrot.slane %v2971_v56, 2 }
 0x89d   :  { %v3053_v5 = vadd.f32 %v3051_v61, %v8725_v46  ;;  %v2978_v62 = vadd.f32 %v2976_v4, %v8730_v12  ;;  %v8033_v12 = vpop.permute.xlu1 %8032 }
 0x89e   :  { %v8035_v7 = vunpack.i.h.bf16 %v8033_v12  ;;  %v8034_v15 = vunpack.i.l.bf16 %v8033_v12 }
 0x89f   :  { %v6290_v11 = vmul.f32 -1.442695, %v3053_v5 }
 0x8a0   :  { %v7749_v34 = vpack.c.bf16 %v8035_v7, %v8034_v15 }
 0x8a1   :  { %8182 = vpow2.f32 %v6290_v11  ;;  %v8043_v22 = vpop.permute.xlu1 %8042 }
 0x8a2   :  { %8184 = vtanh.f32 %v2978_v62  ;;  %v8045_v33 = vunpack.i.h.bf16 %v8043_v22  ;;  %v8044_v40 = vunpack.i.l.bf16 %v8043_v22 }
 0x8a3   :  { %v8179_v2 = vpop.eup %8178 }
 0x8a4   :  { %v8181_v23 = vpop.eup %8180  ;;  %v2822_v59 = vadd.f32 1.0, %v8179_v2  ;;  %v8911_v8 = vpack.c.bf16 %v8045_v33, %v8044_v40 }
 0x8a5   :  { %v2902_v60 = vadd.f32 1.0, %v8181_v23  ;;  %v8053_v39 = vpop.permute.xlu1 %8052 }
 0x8a6   :  { %8186 = vrcp.f32 %v2822_v59  ;;  %v8055_v41 = vunpack.i.h.bf16 %v8053_v39 }
 0x8a7   :  { %8188 = vrcp.f32 %v2902_v60 }
 0x8a9   :  { %v8063_v29 = vpop.permute.xlu1 %8062 }
 0x8aa   :  { %v8065_v52 = vunpack.i.h.bf16 %v8063_v29  ;;  %v8064_v47 = vunpack.i.l.bf16 %v8063_v29 }
 0x8ab   :  { %v8183_v6 = vpop.eup %8182 }
 0x8ac   :  { %v8185_v25 = vpop.eup %8184  ;;  %v3057_v20 = vadd.f32 1.0, %v8183_v6  ;;  %v8931_v53 = vpack.c.bf16 %v8065_v52, %v8064_v47 }
 0x8ad   :  { %v3267_v4 = vpop.permute.xlu1 %3266 }
 0x8ae   :  { %8190 = vrcp.f32 %v3057_v20 }
 0x8b0   :  { %v8187_v31 = vpop.eup %8186 }
 0x8b1   :  { %v8189_v14 = vpop.eup %8188  ;;  %v3064_v16 = vmul.f32 %v8187_v31, %v8185_v25 }
 0x8b2   :  { %v3063_v46 = vmul.f32 %v8189_v14, %v3061_v10 }
 0x8b4   :  { %v3065_v28 = vadd.f32 %v3064_v16, %v3063_v46 }
 0x8b6   :  { %8192 = vtanh.f32 %v3065_v28 }
 0x8b8   :  { %v8191_v30 = vpop.eup %8190 }
 0x8c0   :  { %v8193_v18 = vpop.eup %8192 }
 0x8c1   :  { %v3067_v24 = vmul.f32 %v8193_v18, %v8191_v30 }
 0x8c3   :  { %v3073_v27 = vsel %vm95_vm6, %v8850_v9, %v3067_v24  ;;  %v8048_v9 = vpop.permute.xlu0 %8047 }
 0x8c4   :  { %7110 = vmatmul.mubr.msk.f32.vlgmr.msra.gmra.mrb[36].mxu0 %vm441_vm9, %v3073_v27  ;;  %7121 = vmatmul.mubr.msk.f32.vlgmr.msra.gmra.mrb[36].mxu1 %vm441_vm9, %v3073_v27 }
 0x8c5   :  { %7740 = vmatpush3.bf16.msra.mxu0 %v8874_v48  ;;  %7748 = vmatpush3.bf16.msra.mxu1 %v8876_v0  ;;  %v8050_v48 = vunpack.i.h.bf16 %v8048_v9  ;;  %v8049_v0 = vunpack.i.l.bf16 %v8048_v9 }
 0x8c6   :  { %7131 = vmatprep.mubr.msk.f32.mxu0 %vm441_vm9, %v8683_v58  ;;  %7142 = vmatprep.mubr.msk.f32.mxu1 %vm441_vm9, %v8683_v58  ;;  %v8054_v58 = vunpack.i.l.bf16 %v8053_v39 }
 0x8c7   :  { %7742 = vmatprep.subr.bf16.mxu0 %v7741_v19  ;;  %7750 = vmatprep.subr.bf16.mxu1 %v7749_v34  ;;  %v8058_v49 = vpop.permute.xlu0 %8057  ;;  %v8923_v51 = vpack.c.bf16 %v8050_v48, %v8049_v0 }
 0x8c8   :  { %v8921_v50 = vpack.c.bf16 %v8055_v41, %v8054_v58  ;;  %v8060_v54 = vunpack.i.h.bf16 %v8058_v49  ;;  %v8059_v45 = vunpack.i.l.bf16 %v8058_v49 }
 0x8c9   :  { %7744 = vmatpush3.bf16.msra.mxu0 %v7741_v19  ;;  %7752 = vmatpush3.bf16.msra.mxu1 %v7749_v34 }
 0x8ca   :  { %7753 = vmatprep.subr.bf16.mxu0 %v8376_v3  ;;  %7759 = vmatprep.subr.bf16.mxu1 %v8376_v3  ;;  %v8933_v55 = vpack.c.bf16 %v8060_v54, %v8059_v45 }
 0x8cb   :  { %v8965_v1 = vpop.permute.xlu0 %3176 }
 0x8cc   :  { %7132 = vmatmul.mubr.msk.f32.vlgmr.msra.gmra.mrb[38].mxu0 %vm441_vm9, %v3073_v27  ;;  %7143 = vmatmul.mubr.msk.f32.vlgmr.msra.gmra.mrb[38].mxu1 %vm441_vm9, %v3073_v27 }
 0x8cd   :  { %7755 = vmatpush3.bf16.msra.mxu0 %v8823_v44  ;;  %7761 = vmatpush3.bf16.msra.mxu1 %v8905_v32 }
 0x8ce   :  { %7756 = vmatprep.subr.bf16.mxu0 %v8376_v3  ;;  %7762 = vmatprep.subr.bf16.mxu1 %v8376_v3 }
 0x8cf   :  { %7153 = vmatprep.mubr.msk.f32.mxu0 %vm8377_vm8, %v8378_v13  ;;  %7164 = vmatprep.mubr.msk.f32.mxu1 %vm8377_vm8, %v8378_v13  ;;  %v3357_v5 = vpop.permute.xlu0 %3356 }
 0x8d1   :  { %7758 = vmatpush3.bf16.msra.mxu0 %v8825_v35  ;;  %7764 = vmatpush3.bf16.msra.mxu1 %v8911_v8 }
 0x8d2   :  { %7765 = vmatprep.subr.bf16.mxu0 %v8376_v3  ;;  %7771 = vmatprep.subr.bf16.mxu1 %v8376_v3 }
 0x8d4   :  { %7154 = vmatmul.mubr.f32.vlgmr.msra.gmra.mrb[40].mxu0 %v8378_v13  ;;  %7165 = vmatmul.mubr.f32.vlgmr.msra.gmra.mrb[40].mxu1 %v8378_v13 }
 0x8d5   :  { %7767 = vmatpush3.bf16.msra.mxu0 %v8923_v51  ;;  %7773 = vmatpush3.bf16.msra.mxu1 %v8921_v50 }
 0x8d6   :  { %7768 = vmatprep.subr.bf16.mxu0 %v8376_v3  ;;  %7774 = vmatprep.subr.bf16.mxu1 %v8376_v3 }
 0x8d7   :  { %7175 = vmatprep.mubr.msk.f32.mxu0 %vm8377_vm8, %v8378_v13  ;;  %7186 = vmatprep.mubr.msk.f32.mxu1 %vm8377_vm8, %v8378_v13 }
 0x8d9   :  { %7770 = vmatpush3.bf16.msra.mxu0 %v8933_v55  ;;  %7776 = vmatpush3.bf16.msra.mxu1 %v8931_v53 }
 0x8da   :  { %7783 = vmatprep.subr.bf16.mxu1 %v8376_v3  ;;  %7777 = vmatprep.subr.bf16.mxu0 %v8376_v3 }
 0x8dc   :  { %7176 = vmatmul.mubr.f32.vlgmr.msra.gmra.mrb[42].mxu0 %v8378_v13  ;;  %7187 = vmatmul.mubr.f32.vlgmr.msra.gmra.mrb[42].mxu1 %v8378_v13 }
 0x8dd   :  { %7785 = vmatpush3.bf16.msra.mxu1 %v8905_v32  ;;  %7779 = vmatpush3.bf16.msra.mxu0 %v8823_v44 }
 0x8de   :  { %7786 = vmatprep.subr.bf16.mxu1 %v8376_v3  ;;  %7780 = vmatprep.subr.bf16.mxu0 %v8376_v3 }
 0x8df   :  { %7197 = vmatprep.mubr.msk.f32.mxu0 %vm8377_vm8, %v8378_v13  ;;  %7208 = vmatprep.mubr.msk.f32.mxu1 %vm8377_vm8, %v8378_v13 }
 0x8e1   :  { %7788 = vmatpush3.bf16.msra.mxu1 %v8911_v8  ;;  %7782 = vmatpush3.bf16.msra.mxu0 %v8825_v35 }
 0x8e2   :  { %7789 = vmatprep.subr.bf16.mxu0 %v8376_v3  ;;  %7795 = vmatprep.subr.bf16.mxu1 %v8376_v3 }
 0x997   :  { %v8961_v56 = vpop.f32.mrb[36].mxu0  ;;  %v8963_v57 = vpop.f32.mrb[36].mxu1 }
 0x998   :  { %v3150_v61 = vpop.f32.mrb[37].mxu0  ;;  %v3245_v63 = vpop.f32.mrb[37].mxu1 }
 0x999   :  { %v8972_v6 = vadd.f32 %v3150_v61, %v8882_v42  ;;  %v8975_v25 = vadd.f32 %v3245_v63, %v8965_v1 }
 0x99f   :  { %v7133_v11 = vpop.f32.mrb[38].mxu0  ;;  %v7144_v62 = vpop.f32.mrb[38].mxu1 }
 0x9a0   :  { %v8967_v2 = vadd.f32 %v7133_v11, %v3267_v4  ;;  %v8969_v23 = vadd.f32 %v7144_v62, %v3357_v5  ;;  %v3335_v59 = vpop.f32.mrb[39].mxu0  ;;  %v3425_v60 = vpop.f32.mrb[39].mxu1 }
 0x9a1   :  { %v8979_v26 = vadd.f32 %v3425_v60, %v3357_v5  ;;  %v8982_v18 = vadd.f32 %v3335_v59, %v3267_v4 }
 0x9a7   :  { %v3500_v31 = vpop.f32.mrb[40].mxu0  ;;  %v3593_v10 = vpop.f32.mrb[40].mxu1 }
 0x9a8   :  { %v3504_v14 = vadd.f32 %v3500_v31, %v8972_v6  ;;  %v3597_v16 = vadd.f32 %v3593_v10, %v8975_v25  ;;  %v7155_v20 = vpop.f32.mrb[41].mxu0  ;;  %v7166_v46 = vpop.f32.mrb[41].mxu1 }
 0x9aa   :  { %v6299_v28 = vmul.f32 -1.442695, %v3504_v14  ;;  %v6300_v12 = vmul.f32 -1.442695, %v3597_v16 }
 0x9ac   :  { %8194 = vpow2.f32 %v6299_v28 }
 0x9ad   :  { %8196 = vpow2.f32 %v6300_v12 }
 0x9af   :  { %v3682_v30 = vpop.f32.mrb[42].mxu0  ;;  %v3766_v7 = vpop.f32.mrb[42].mxu1 }
 0x9b0   :  { %v3770_v15 = vadd.f32 %v3766_v7, %v8979_v26  ;;  %v7177_v17 = vpop.f32.mrb[43].mxu0  ;;  %v7188_v38 = vpop.f32.mrb[43].mxu1  ;;  %v3686_v21 = vadd.f32 %v3682_v30, %v8982_v18 }
 0x9b2   :  { %v6301_v24 = vmul.f32 -1.442695, %v3770_v15 }
 0x9b4   :  { %8198 = vpow2.f32 %v6301_v24 }
 0x9b5   :  { %8200 = vtanh.f32 %v3686_v21 }
 0x9b6   :  { %v8195_v22 = vpop.eup %8194 }
 0x9b7   :  { %v8197_v34 = vpop.eup %8196  ;;  %v3508_v19 = vadd.f32 1.0, %v8195_v22 }
 0x9b8   :  { %v3601_v27 = vadd.f32 1.0, %v8197_v34 }
 0x9b9   :  { %8202 = vrcp.f32 %v3508_v19 }
 0x9ba   :  { %8204 = vrcp.f32 %v3601_v27 }
 0x9be   :  { %v8199_v36 = vpop.eup %8198 }
 0x9bf   :  { %v8201_v37 = vpop.eup %8200  ;;  %v3774_v40 = vadd.f32 1.0, %v8199_v36 }
 0x9c1   :  { %8206 = vrcp.f32 %v3774_v40 }
 0x9c3   :  { %v8203_v39 = vpop.eup %8202 }
 0x9c4   :  { %v8205_v9 = vpop.eup %8204  ;;  %v3778_v33 = vmul.f32 %v8203_v39, %v8201_v37 }
 0x9c5   :  { %v3777_v41 = vmul.f32 0.0, %v8205_v9 }
 0x9c7   :  { %v8985_v58 = vadd.f32 %v3778_v33, %v3777_v41 }
 0x9c9   :  { %8208 = vtanh.f32 %v8985_v58  ;;  %v4101_v24 = vrot.slane %v8985_v58, 6 }
 0x9cb   :  { %v8207_v48 = vpop.eup %8206 }
 0x9d3   :  { %v8209_v0 = vpop.eup %8208 }
 0x9d4   :  { %v3781_v29 = vmul.f32 %v8209_v0, %v8207_v48 }
 0x9d6   :  { %7198 = vmatmul.mubr.msk.f32.vlgmr.msra.gmra.mrb[44].mxu0 %vm441_vm9, %v3781_v29  ;;  %7209 = vmatmul.mubr.msk.f32.vlgmr.msra.gmra.mrb[44].mxu1 %vm441_vm9, %v3781_v29 }
 0x9d7   :  { %7791 = vmatpush3.bf16.msra.mxu0 %v8923_v51  ;;  %7797 = vmatpush3.bf16.msra.mxu1 %v8921_v50 }
 0x9d8   :  { %7792 = vmatprep.subr.bf16.mxu0 %v8376_v3  ;;  %7798 = vmatprep.subr.bf16.mxu1 %v8376_v3 }
 0x9d9   :  { %7219 = vmatprep.mubr.msk.f32.mxu0 %vm8377_vm8, %v8378_v13  ;;  %7230 = vmatprep.mubr.msk.f32.mxu1 %vm8377_vm8, %v8378_v13 }
 0x9db   :  { %7794 = vmatpush3.bf16.msra.mxu0 %v8933_v55  ;;  %7800 = vmatpush3.bf16.msra.mxu1 %v8931_v53 }
 0x9dc   :  { %7807 = vmatprep.subr.bf16.mxu1 %v8376_v3  ;;  %7801 = vmatprep.subr.bf16.mxu0 %v8376_v3 }
 0x9de   :  { %7220 = vmatmul.mubr.msk.f32.vlgmr.msra.gmra.mrb[46].mxu0 %vm441_vm9, %v3781_v29  ;;  %7231 = vmatmul.mubr.msk.f32.vlgmr.msra.gmra.mrb[46].mxu1 %vm441_vm9, %v3781_v29 }
 0x9df   :  { %7809 = vmatpush3.bf16.msra.mxu1 %v8905_v32  ;;  %7803 = vmatpush3.bf16.msra.mxu0 %v8823_v44 }
 0x9e0   :  { %7810 = vmatprep.subr.bf16.mxu1 %v8376_v3  ;;  %7804 = vmatprep.subr.bf16.mxu0 %v8376_v3 }
 0x9e1   :  { %7241 = vmatprep.mubr.msk.f32.mxu0 %vm8377_vm8, %v8378_v13  ;;  %7252 = vmatprep.mubr.msk.f32.mxu1 %vm8377_vm8, %v8378_v13 }
 0x9e3   :  { %7812 = vmatpush3.bf16.msra.mxu1 %v8911_v8  ;;  %7806 = vmatpush3.bf16.msra.mxu0 %v8825_v35 }
 0x9e4   :  { %7813 = vmatprep.subr.bf16.mxu0 %v8376_v3  ;;  %7819 = vmatprep.subr.bf16.mxu1 %v8376_v3 }
 0xaa9   :  { %v3851_v49 = vpop.f32.mrb[44].mxu0  ;;  %v3931_v52 = vpop.f32.mrb[44].mxu1 }
 0xaaa   :  { %v3856_v47 = vrot.slane %v3851_v49, 6  ;;  %v3936_v54 = vrot.slane %v3931_v52, 6  ;;  %v7199_v45 = vpop.f32.mrb[45].mxu0  ;;  %v7210_v61 = vpop.f32.mrb[45].mxu1 }
 0xaac   :  { %v3858_v63 = vadd.f32 %v3856_v47, %v8972_v6  ;;  %v3938_v4 = vadd.f32 %v3936_v54, %v8975_v25 }
 0xaae   :  { %v6303_v5 = vmul.f32 -1.442695, %v3858_v63  ;;  %v6305_v11 = vmul.f32 -1.442695, %v3938_v4 }
 0xab0   :  { %8210 = vpow2.f32 %v6303_v5 }
 0xab1   :  { %8212 = vpow2.f32 %v6305_v11  ;;  %v4011_v62 = vpop.f32.mrb[46].mxu0  ;;  %v4086_v59 = vpop.f32.mrb[46].mxu1 }
 0xab2   :  { %v4091_v60 = vrot.slane %v4086_v59, 6  ;;  %v7221_v31 = vpop.f32.mrb[47].mxu0  ;;  %v7232_v10 = vpop.f32.mrb[47].mxu1  ;;  %v4016_v14 = vrot.slane %v4011_v62, 6 }
 0xab4   :  { %v4093_v16 = vadd.f32 %v4091_v60, %v8979_v26  ;;  %v4018_v46 = vadd.f32 %v4016_v14, %v8982_v18 }
 0xab6   :  { %v6308_v20 = vmul.f32 -1.442695, %v4093_v16 }
 0xab8   :  { %8214 = vpow2.f32 %v6308_v20 }
 0xab9   :  { %8216 = vtanh.f32 %v4018_v46 }
 0xaba   :  { %v8211_v28 = vpop.eup %8210 }
 0xabb   :  { %v8213_v12 = vpop.eup %8212  ;;  %v3862_v30 = vadd.f32 1.0, %v8211_v28 }
 0xabc   :  { %v3942_v7 = vadd.f32 1.0, %v8213_v12 }
 0xabd   :  { %8218 = vrcp.f32 %v3862_v30 }
 0xabe   :  { %8220 = vrcp.f32 %v3942_v7 }
 0xac2   :  { %v8215_v15 = vpop.eup %8214 }
 0xac3   :  { %v8217_v17 = vpop.eup %8216  ;;  %v4097_v34 = vadd.f32 1.0, %v8215_v15 }
 0xac5   :  { %8222 = vrcp.f32 %v4097_v34 }
 0xac7   :  { %v8219_v38 = vpop.eup %8218 }
 0xac8   :  { %v8221_v21 = vpop.eup %8220  ;;  %v4104_v22 = vmul.f32 %v8219_v38, %v8217_v17 }
 0xac9   :  { %v4103_v19 = vmul.f32 %v8221_v21, %v4101_v24 }
 0xacb   :  { %v9021_v27 = vadd.f32 %v4104_v22, %v4103_v19 }
 0xacd   :  { %8224 = vtanh.f32 %v9021_v27  ;;  %v4428_v28 = vrot.slane %v9021_v27, 6 }
 0xacf   :  { %v8223_v36 = vpop.eup %8222 }
 0xad7   :  { %v8225_v37 = vpop.eup %8224 }
 0xad8   :  { %v4107_v39 = vmul.f32 %v8225_v37, %v8223_v36 }
 0xada   :  { %v4109_v9 = vrot.slane %v4107_v39, 2 }
 0xadc   :  { %7242 = vmatmul.mubr.msk.f32.vlgmr.msra.gmra.mrb[48].mxu0 %vm441_vm9, %v4109_v9  ;;  %7253 = vmatmul.mubr.msk.f32.vlgmr.msra.gmra.mrb[48].mxu1 %vm441_vm9, %v4109_v9 }
 0xadd   :  { %7815 = vmatpush3.bf16.msra.mxu0 %v8923_v51  ;;  %7821 = vmatpush3.bf16.msra.mxu1 %v8921_v50 }
 0xade   :  { %7816 = vmatprep.subr.bf16.mxu0 %v8376_v3  ;;  %7822 = vmatprep.subr.bf16.mxu1 %v8376_v3 }
 0xadf   :  { %7263 = vmatprep.mubr.msk.f32.mxu0 %vm8377_vm8, %v8378_v13  ;;  %7274 = vmatprep.mubr.msk.f32.mxu1 %vm8377_vm8, %v8378_v13 }
 0xae1   :  { %7818 = vmatpush3.bf16.msra.mxu0 %v8933_v55  ;;  %7824 = vmatpush3.bf16.msra.mxu1 %v8931_v53 }
 0xae2   :  { %7831 = vmatprep.subr.bf16.mxu1 %v8376_v3  ;;  %7825 = vmatprep.subr.bf16.mxu0 %v8376_v3 }
 0xae4   :  { %7264 = vmatmul.mubr.msk.f32.vlgmr.msra.gmra.mrb[50].mxu0 %vm441_vm9, %v4109_v9  ;;  %7275 = vmatmul.mubr.msk.f32.vlgmr.msra.gmra.mrb[50].mxu1 %vm441_vm9, %v4109_v9 }
 0xae5   :  { %7833 = vmatpush3.bf16.msra.mxu1 %v8905_v32  ;;  %7827 = vmatpush3.bf16.msra.mxu0 %v8823_v44 }
 0xae6   :  { %7834 = vmatprep.subr.bf16.mxu1 %v8376_v3  ;;  %7828 = vmatprep.subr.bf16.mxu0 %v8376_v3 }
 0xae7   :  { %7285 = vmatprep.mubr.msk.f32.mxu0 %vm8377_vm8, %v8378_v13  ;;  %7296 = vmatprep.mubr.msk.f32.mxu1 %vm8377_vm8, %v8378_v13 }
 0xae9   :  { %7836 = vmatpush3.bf16.msra.mxu1 %v8911_v8  ;;  %7830 = vmatpush3.bf16.msra.mxu0 %v8825_v35 }
 0xaea   :  { %7837 = vmatprep.subr.bf16.mxu0 %v8376_v3  ;;  %7843 = vmatprep.subr.bf16.mxu1 %v8376_v3 }
 0xbaf   :  { %v4178_v33 = vpop.f32.mrb[48].mxu0  ;;  %v4258_v40 = vpop.f32.mrb[48].mxu1 }
 0xbb0   :  { %v4183_v41 = vrot.slane %v4178_v33, 4  ;;  %v4263_v58 = vrot.slane %v4258_v40, 4  ;;  %v7243_v48 = vpop.f32.mrb[49].mxu0  ;;  %v7254_v0 = vpop.f32.mrb[49].mxu1 }
 0xbb2   :  { %v4185_v29 = vadd.f32 %v4183_v41, %v8972_v6  ;;  %v4265_v49 = vadd.f32 %v4263_v58, %v8975_v25 }
 0xbb4   :  { %v6310_v52 = vmul.f32 -1.442695, %v4185_v29  ;;  %v6312_v47 = vmul.f32 -1.442695, %v4265_v49 }
 0xbb6   :  { %8226 = vpow2.f32 %v6310_v52 }
 0xbb7   :  { %8228 = vpow2.f32 %v6312_v47  ;;  %v4338_v54 = vpop.f32.mrb[50].mxu0  ;;  %v4413_v45 = vpop.f32.mrb[50].mxu1 }
 0xbb8   :  { %v4418_v61 = vrot.slane %v4413_v45, 4  ;;  %v7265_v63 = vpop.f32.mrb[51].mxu0  ;;  %v7276_v4 = vpop.f32.mrb[51].mxu1  ;;  %v4343_v5 = vrot.slane %v4338_v54, 4 }
 0xbba   :  { %v4420_v11 = vadd.f32 %v4418_v61, %v8979_v26  ;;  %v4345_v59 = vadd.f32 %v4343_v5, %v8982_v18 }
 0xbbc   :  { %v6315_v62 = vmul.f32 -1.442695, %v4420_v11 }
 0xbbe   :  { %8230 = vpow2.f32 %v6315_v62 }
 0xbbf   :  { %8232 = vtanh.f32 %v4345_v59 }
 0xbc0   :  { %v8227_v60 = vpop.eup %8226 }
 0xbc1   :  { %v8229_v31 = vpop.eup %8228  ;;  %v4189_v10 = vadd.f32 1.0, %v8227_v60 }
 0xbc2   :  { %v4269_v14 = vadd.f32 1.0, %v8229_v31 }
 0xbc3   :  { %8234 = vrcp.f32 %v4189_v10 }
 0xbc4   :  { %8236 = vrcp.f32 %v4269_v14 }
 0xbc8   :  { %v8231_v16 = vpop.eup %8230 }
 0xbc9   :  { %v8233_v20 = vpop.eup %8232  ;;  %v4424_v7 = vadd.f32 1.0, %v8231_v16 }
 0xbcb   :  { %8238 = vrcp.f32 %v4424_v7 }
 0xbcd   :  { %v8235_v46 = vpop.eup %8234 }
 0xbce   :  { %v8237_v12 = vpop.eup %8236  ;;  %v4431_v30 = vmul.f32 %v8235_v46, %v8233_v20  ;;  %v9126_v46 = vadd.f32 %v8961_v56, %v8882_v42 }
 0xbcf   :  { %v4430_v15 = vmul.f32 %v8237_v12, %v4428_v28  ;;  %v9130_v28 = vadd.f32 %v8963_v57, %v8965_v1 }
 0xbd1   :  { %v9057_v17 = vadd.f32 %v4431_v30, %v4430_v15 }
 0xbd3   :  { %8240 = vtanh.f32 %v9057_v17  ;;  %v4755_v62 = vrot.slane %v9057_v17, 6 }
 0xbd5   :  { %v8239_v38 = vpop.eup %8238 }
 0xbdd   :  { %v8241_v24 = vpop.eup %8240 }
 0xbde   :  { %v4434_v21 = vmul.f32 %v8241_v24, %v8239_v38 }
 0xbe0   :  { %v4436_v22 = vrot.slane %v4434_v21, 4 }
 0xbe2   :  { %7286 = vmatmul.mubr.msk.f32.vlgmr.msra.gmra.mrb[52].mxu0 %vm441_vm9, %v4436_v22  ;;  %7297 = vmatmul.mubr.msk.f32.vlgmr.msra.gmra.mrb[52].mxu1 %vm441_vm9, %v4436_v22 }
 0xbe3   :  { %7839 = vmatpush3.bf16.msra.mxu0 %v8923_v51  ;;  %7845 = vmatpush3.bf16.msra.mxu1 %v8921_v50 }
 0xbe4   :  { %7840 = vmatprep.subr.bf16.mxu0 %v8376_v3  ;;  %7846 = vmatprep.subr.bf16.mxu1 %v8376_v3 }
 0xbe5   :  { %7307 = vmatprep.mubr.msk.f32.mxu0 %vm8377_vm8, %v8378_v13  ;;  %7318 = vmatprep.mubr.msk.f32.mxu1 %vm8377_vm8, %v8378_v13 }
 0xbe7   :  { %7842 = vmatpush3.bf16.msra.mxu0 %v8933_v55  ;;  %7848 = vmatpush3.bf16.msra.mxu1 %v8931_v53 }
 0xbe8   :  { %7855 = vmatprep.subr.bf16.mxu1 %v8376_v3  ;;  %7849 = vmatprep.subr.bf16.mxu0 %v8376_v3 }
 0xbea   :  { %7308 = vmatmul.mubr.msk.f32.vlgmr.msra.gmra.mrb[54].mxu0 %vm441_vm9, %v4436_v22  ;;  %7319 = vmatmul.mubr.msk.f32.vlgmr.msra.gmra.mrb[54].mxu1 %vm441_vm9, %v4436_v22 }
 0xbeb   :  { %7857 = vmatpush3.bf16.msra.mxu1 %v8905_v32  ;;  %7851 = vmatpush3.bf16.msra.mxu0 %v8823_v44 }
 0xbec   :  { %7858 = vmatprep.subr.bf16.mxu1 %v8376_v3  ;;  %7852 = vmatprep.subr.bf16.mxu0 %v8376_v3 }
 0xbed   :  { %7329 = vmatprep.mubr.msk.f32.mxu0 %vm8377_vm8, %v8378_v13  ;;  %7340 = vmatprep.mubr.msk.f32.mxu1 %vm8377_vm8, %v8378_v13 }
 0xbef   :  { %7860 = vmatpush3.bf16.msra.mxu1 %v8911_v8  ;;  %7854 = vmatpush3.bf16.msra.mxu0 %v8825_v35 }
 0xbf0   :  { %7861 = vmatprep.subr.bf16.mxu0 %v8376_v3  ;;  %7867 = vmatprep.subr.bf16.mxu1 %v8376_v3 }
 0xcb5   :  { %v4505_v34 = vpop.f32.mrb[52].mxu0  ;;  %v4585_v19 = vpop.f32.mrb[52].mxu1 }
 0xcb6   :  { %v4510_v27 = vrot.slane %v4505_v34, 2  ;;  %v4590_v36 = vrot.slane %v4585_v19, 2  ;;  %v7287_v37 = vpop.f32.mrb[53].mxu0  ;;  %v7298_v39 = vpop.f32.mrb[53].mxu1 }
 0xcb8   :  { %v4512_v9 = vadd.f32 %v4510_v27, %v8972_v6  ;;  %v4592_v33 = vadd.f32 %v4590_v36, %v8975_v25 }
 0xcba   :  { %v6317_v40 = vmul.f32 -1.442695, %v4512_v9  ;;  %v6319_v41 = vmul.f32 -1.442695, %v4592_v33 }
 0xcbc   :  { %8242 = vpow2.f32 %v6317_v40 }
 0xcbd   :  { %8244 = vpow2.f32 %v6319_v41  ;;  %v4665_v58 = vpop.f32.mrb[54].mxu0  ;;  %v4740_v48 = vpop.f32.mrb[54].mxu1 }
 0xcbe   :  { %v4745_v0 = vrot.slane %v4740_v48, 2  ;;  %v7309_v29 = vpop.f32.mrb[55].mxu0  ;;  %v7320_v49 = vpop.f32.mrb[55].mxu1  ;;  %v4670_v52 = vrot.slane %v4665_v58, 2 }
 0xcc0   :  { %v4747_v47 = vadd.f32 %v4745_v0, %v8979_v26  ;;  %v4672_v45 = vadd.f32 %v4670_v52, %v8982_v18 }
 0xcc2   :  { %v6322_v54 = vmul.f32 -1.442695, %v4747_v47 }
 0xcc4   :  { %8246 = vpow2.f32 %v6322_v54 }
 0xcc5   :  { %8248 = vtanh.f32 %v4672_v45 }
 0xcc6   :  { %v8243_v61 = vpop.eup %8242 }
 0xcc7   :  { %v8245_v63 = vpop.eup %8244  ;;  %v4516_v6 = vadd.f32 1.0, %v8243_v61 }
 0xcc8   :  { %v4596_v25 = vadd.f32 1.0, %v8245_v63 }
 0xcc9   :  { %8250 = vrcp.f32 %v4516_v6 }
 0xcca   :  { %8252 = vrcp.f32 %v4596_v25 }
 0xcce   :  { %v8247_v4 = vpop.eup %8246 }
 0xccf   :  { %v8249_v5 = vpop.eup %8248  ;;  %v4751_v31 = vadd.f32 1.0, %v8247_v4 }
 0xcd1   :  { %8254 = vrcp.f32 %v4751_v31 }
 0xcd3   :  { %v8251_v11 = vpop.eup %8250 }
 0xcd4   :  { %v8253_v59 = vpop.eup %8252  ;;  %v4758_v60 = vmul.f32 %v8251_v11, %v8249_v5 }
 0xcd5   :  { %v4757_v26 = vmul.f32 %v8253_v59, %v4755_v62 }
 0xcd7   :  { %v9093_v10 = vadd.f32 %v4758_v60, %v4757_v26 }
 0xcd9   :  { %8256 = vtanh.f32 %v9093_v10  ;;  %v5070_v41 = vrot.slane %v9093_v10, 6 }
 0xcdb   :  { %v8255_v18 = vpop.eup %8254 }
 0xce3   :  { %v8257_v14 = vpop.eup %8256 }
 0xce4   :  { %v4761_v16 = vmul.f32 %v8257_v14, %v8255_v18 }
 0xce6   :  { %v4763_v20 = vrot.slane %v4761_v16, 6 }
 0xce8   :  { %7330 = vmatmul.mubr.msk.f32.vlgmr.msra.gmra.mrb[56].mxu0 %vm441_vm9, %v4763_v20  ;;  %7341 = vmatmul.mubr.msk.f32.vlgmr.msra.gmra.mrb[56].mxu1 %vm441_vm9, %v4763_v20 }
 0xce9   :  { %7863 = vmatpush3.bf16.msra.mxu0 %v8923_v51  ;;  %7869 = vmatpush3.bf16.msra.mxu1 %v8921_v50 }
 0xcea   :  { %7864 = vmatprep.subr.bf16.mxu0 %v8376_v3  ;;  %7870 = vmatprep.subr.bf16.mxu1 %v8376_v3 }
 0xceb   :  { %7351 = vmatprep.mubr.msk.f32.mxu0 %vm8377_vm8, %v8378_v13  ;;  %7362 = vmatprep.mubr.msk.f32.mxu1 %vm8377_vm8, %v8378_v13 }
 0xced   :  { %7866 = vmatpush3.bf16.msra.mxu0 %v8933_v55  ;;  %7872 = vmatpush3.bf16.msra.mxu1 %v8931_v53 }
 0xcee   :  { %7879 = vmatprep.subr.bf16.mxu1 %v8376_v3  ;;  %7873 = vmatprep.subr.bf16.mxu0 %v8376_v3 }
 0xcf0   :  { %7352 = vmatmul.mubr.msk.f32.vlgmr.msra.gmra.mrb[58].mxu0 %vm441_vm9, %v4763_v20  ;;  %7363 = vmatmul.mubr.msk.f32.vlgmr.msra.gmra.mrb[58].mxu1 %vm441_vm9, %v4763_v20 }
 0xcf1   :  { %7881 = vmatpush3.bf16.msra.mxu1 %v8905_v32  ;;  %7875 = vmatpush3.bf16.msra.mxu0 %v8823_v44 }
 0xcf2   :  { %7882 = vmatprep.subr.bf16.mxu1 %v8376_v3  ;;  %7876 = vmatprep.subr.bf16.mxu0 %v8376_v3 }
 0xcf3   :  { %7373 = vmatprep.mubr.msk.f32.mxu0 %vm8377_vm8, %v8378_v13  ;;  %7384 = vmatprep.mubr.msk.f32.mxu1 %vm8377_vm8, %v8378_v13 }
 0xcf5   :  { %7884 = vmatpush3.bf16.msra.mxu1 %v8911_v8  ;;  %7878 = vmatpush3.bf16.msra.mxu0 %v8825_v35 }
 0xcf6   :  { %7885 = vmatprep.subr.bf16.mxu0 %v8376_v3  ;;  %7891 = vmatprep.subr.bf16.mxu1 %v8376_v3 }
 0xdbb   :  { %v4832_v12 = vpop.f32.mrb[56].mxu0  ;;  %v4909_v30 = vpop.f32.mrb[56].mxu1 }
 0xdbc   :  { %v4836_v7 = vadd.f32 %v4832_v12, %v9126_v46  ;;  %v4913_v15 = vadd.f32 %v4909_v30, %v9130_v28  ;;  %v7331_v17 = vpop.f32.mrb[57].mxu0  ;;  %v7342_v38 = vpop.f32.mrb[57].mxu1 }
 0xdbe   :  { %v6324_v24 = vmul.f32 -1.442695, %v4836_v7  ;;  %v6326_v21 = vmul.f32 -1.442695, %v4913_v15 }
 0xdc0   :  { %8258 = vpow2.f32 %v6324_v24 }
 0xdc1   :  { %8260 = vpow2.f32 %v6326_v21 }
 0xdc3   :  { %v4986_v22 = vpop.f32.mrb[58].mxu0  ;;  %v5058_v34 = vpop.f32.mrb[58].mxu1 }
 0xdc4   :  { %v5062_v42 = vadd.f32 %v5058_v34, %v8969_v23  ;;  %v7353_v56 = vpop.f32.mrb[59].mxu0  ;;  %v7364_v19 = vpop.f32.mrb[59].mxu1  ;;  %v4990_v1 = vadd.f32 %v4986_v22, %v8967_v2 }
 0xdc6   :  { %v6329_v57 = vmul.f32 -1.442695, %v5062_v42 }
 0xdc8   :  { %8262 = vpow2.f32 %v6329_v57 }
 0xdc9   :  { %8264 = vtanh.f32 %v4990_v1 }
 0xdca   :  { %v8259_v27 = vpop.eup %8258 }
 0xdcb   :  { %v8261_v36 = vpop.eup %8260  ;;  %v4840_v37 = vadd.f32 1.0, %v8259_v27 }
 0xdcc   :  { %v4917_v39 = vadd.f32 1.0, %v8261_v36 }
 0xdcd   :  { %8266 = vrcp.f32 %v4840_v37 }
 0xdce   :  { %8268 = vrcp.f32 %v4917_v39 }
 0xdd2   :  { %v8263_v9 = vpop.eup %8262 }
 0xdd3   :  { %v8265_v33 = vpop.eup %8264  ;;  %v5066_v0 = vadd.f32 1.0, %v8263_v9 }
 0xdd5   :  { %8270 = vrcp.f32 %v5066_v0 }
 0xdd7   :  { %v8267_v40 = vpop.eup %8266 }
 0xdd8   :  { %v8269_v58 = vpop.eup %8268  ;;  %v5073_v48 = vmul.f32 %v8267_v40, %v8265_v33 }
 0xdd9   :  { %v5072_v29 = vmul.f32 %v8269_v58, %v5070_v41 }
 0xddb   :  { %v9137_v49 = vadd.f32 %v5073_v48, %v5072_v29 }
 0xddd   :  { %8272 = vtanh.f32 %v9137_v49  ;;  %v5396_v22 = vrot.slane %v9137_v49, 6 }
 0xddf   :  { %v8271_v52 = vpop.eup %8270 }
 0xde7   :  { %v8273_v47 = vpop.eup %8272 }
 0xde8   :  { %v5076_v54 = vmul.f32 %v8273_v47, %v8271_v52 }
 0xdea   :  { %7374 = vmatmul.mubr.msk.f32.vlgmr.msra.gmra.mrb[60].mxu0 %vm441_vm9, %v5076_v54  ;;  %7385 = vmatmul.mubr.msk.f32.vlgmr.msra.gmra.mrb[60].mxu1 %vm441_vm9, %v5076_v54 }
 0xdeb   :  { %7887 = vmatpush3.bf16.msra.mxu0 %v8923_v51  ;;  %7893 = vmatpush3.bf16.msra.mxu1 %v8921_v50 }
 0xdec   :  { %7888 = vmatprep.subr.bf16.mxu0 %v8376_v3  ;;  %7894 = vmatprep.subr.bf16.mxu1 %v8376_v3 }
 0xded   :  { %7395 = vmatprep.mubr.msk.f32.mxu0 %vm8377_vm8, %v8378_v13  ;;  %7406 = vmatprep.mubr.msk.f32.mxu1 %vm8377_vm8, %v8378_v13 }
 0xdef   :  { %7890 = vmatpush3.bf16.msra.mxu0 %v8933_v55  ;;  %7896 = vmatpush3.bf16.msra.mxu1 %v8931_v53 }
 0xdf0   :  { %7903 = vmatprep.subr.bf16.mxu1 %v8376_v3  ;;  %7897 = vmatprep.subr.bf16.mxu0 %v8376_v3 }
 0xdf2   :  { %7396 = vmatmul.mubr.msk.f32.vlgmr.msra.gmra.mrb[62].mxu0 %vm441_vm9, %v5076_v54  ;;  %7407 = vmatmul.mubr.msk.f32.vlgmr.msra.gmra.mrb[62].mxu1 %vm441_vm9, %v5076_v54 }
 0xdf3   :  { %7905 = vmatpush3.bf16.msra.mxu1 %v8905_v32  ;;  %7899 = vmatpush3.bf16.msra.mxu0 %v8823_v44 }
 0xdf4   :  { %7906 = vmatprep.subr.bf16.mxu1 %v8376_v3  ;;  %7900 = vmatprep.subr.bf16.mxu0 %v8376_v3 }
 0xdf5   :  { %7417 = vmatprep.mubr.msk.f32.mxu0 %vm8377_vm8, %v8378_v13  ;;  %7428 = vmatprep.mubr.msk.f32.mxu1 %vm8377_vm8, %v8378_v13 }
 0xdf7   :  { %7908 = vmatpush3.bf16.msra.mxu1 %v8911_v8  ;;  %7902 = vmatpush3.bf16.msra.mxu0 %v8825_v35 }
 0xdf8   :  { %7909 = vmatprep.subr.bf16.mxu0 %v8376_v3  ;;  %7915 = vmatprep.subr.bf16.mxu1 %v8376_v3 }
 0xebd   :  { %v5146_v45 = vpop.f32.mrb[60].mxu0  ;;  %v5226_v61 = vpop.f32.mrb[60].mxu1 }
 0xebe   :  { %v5151_v63 = vrot.slane %v5146_v45, 6  ;;  %v5231_v6 = vrot.slane %v5226_v61, 6  ;;  %v7375_v25 = vpop.f32.mrb[61].mxu0  ;;  %v7386_v4 = vpop.f32.mrb[61].mxu1 }
 0xec0   :  { %v5153_v5 = vadd.f32 %v5151_v63, %v9126_v46  ;;  %v5233_v11 = vadd.f32 %v5231_v6, %v9130_v28 }
 0xec2   :  { %v6331_v62 = vmul.f32 -1.442695, %v5153_v5  ;;  %v6333_v59 = vmul.f32 -1.442695, %v5233_v11 }
 0xec4   :  { %8274 = vpow2.f32 %v6331_v62 }
 0xec5   :  { %8276 = vpow2.f32 %v6333_v59  ;;  %v5306_v60 = vpop.f32.mrb[62].mxu0  ;;  %v5381_v31 = vpop.f32.mrb[62].mxu1 }
 0xec6   :  { %v5386_v26 = vrot.slane %v5381_v31, 6  ;;  %v7397_v10 = vpop.f32.mrb[63].mxu0  ;;  %v7408_v18 = vpop.f32.mrb[63].mxu1  ;;  %v5311_v14 = vrot.slane %v5306_v60, 6 }
 0xec8   :  { %v5388_v16 = vadd.f32 %v5386_v26, %v8969_v23  ;;  %v5313_v12 = vadd.f32 %v5311_v14, %v8967_v2 }
 0xeca   :  { %v6336_v20 = vmul.f32 -1.442695, %v5388_v16 }
 0xecc   :  { %8278 = vpow2.f32 %v6336_v20 }
 0xecd   :  { %8280 = vtanh.f32 %v5313_v12 }
 0xece   :  { %v8275_v30 = vpop.eup %8274 }
 0xecf   :  { %v8277_v7 = vpop.eup %8276  ;;  %v5157_v15 = vadd.f32 1.0, %v8275_v30  ;;  %v51_v30 = vld [vmem:[%s9274_s3 + $0x18] sm:$0xff] }
 0xed0   :  { %v5237_v17 = vadd.f32 1.0, %v8277_v7  ;;  %v6057_v7 = vld [vmem:[%s9272_s1] sm:$0x3]  ;;  %s8379_s1 = smov [#allocation5]  }
 0xed1   :  { %8282 = vrcp.f32 %v5157_v15 }
 0xed2   :  { %8284 = vrcp.f32 %v5237_v17 }
 0xed6   :  { %v8279_v38 = vpop.eup %8278 }
 0xed7   :  { %v8281_v24 = vpop.eup %8280  ;;  %v5392_v56 = vadd.f32 1.0, %v8279_v38 }
 0xed9   :  { %8286 = vrcp.f32 %v5392_v56 }
 0xedb   :  { %v8283_v21 = vpop.eup %8282 }
 0xedc   :  { %v8285_v34 = vpop.eup %8284  ;;  %v5399_v42 = vmul.f32 %v8283_v21, %v8281_v24 }
 0xedd   :  { %v5398_v19 = vmul.f32 %v8285_v34, %v5396_v22 }
 0xedf   :  { %v9173_v57 = vadd.f32 %v5399_v42, %v5398_v19 }
 0xee1   :  { %8288 = vtanh.f32 %v9173_v57  ;;  %v5723_v59 = vrot.slane %v9173_v57, 6 }
 0xee3   :  { %v8287_v1 = vpop.eup %8286 }
 0xeeb   :  { %v8289_v27 = vpop.eup %8288 }
 0xeec   :  { %v5402_v36 = vmul.f32 %v8289_v27, %v8287_v1 }
 0xeee   :  { %v5404_v37 = vrot.slane %v5402_v36, 2 }
 0xef0   :  { %7418 = vmatmul.mubr.msk.f32.vlgmr.msra.gmra.mrb[64].mxu0 %vm441_vm9, %v5404_v37  ;;  %7429 = vmatmul.mubr.msk.f32.vlgmr.msra.gmra.mrb[64].mxu1 %vm441_vm9, %v5404_v37 }
 0xef1   :  { %7911 = vmatpush3.bf16.msra.mxu0 %v8923_v51  ;;  %7917 = vmatpush3.bf16.msra.mxu1 %v8921_v50 }
 0xef2   :  { %7912 = vmatprep.subr.bf16.mxu0 %v8376_v3  ;;  %7918 = vmatprep.subr.bf16.mxu1 %v8376_v3 }
 0xef3   :  { %7439 = vmatprep.mubr.msk.f32.mxu0 %vm8377_vm8, %v8378_v13  ;;  %7450 = vmatprep.mubr.msk.f32.mxu1 %vm8377_vm8, %v8378_v13 }
 0xef5   :  { %7914 = vmatpush3.bf16.msra.mxu0 %v8933_v55  ;;  %7920 = vmatpush3.bf16.msra.mxu1 %v8931_v53 }
 0xef6   :  { %7927 = vmatprep.subr.bf16.mxu1 %v8376_v3  ;;  %7921 = vmatprep.subr.bf16.mxu0 %v8376_v3 }
 0xef8   :  { %7440 = vmatmul.mubr.msk.f32.vlgmr.msra.gmra.mrb[66].mxu0 %vm441_vm9, %v5404_v37  ;;  %7451 = vmatmul.mubr.msk.f32.vlgmr.msra.gmra.mrb[66].mxu1 %vm441_vm9, %v5404_v37 }
 0xef9   :  { %7929 = vmatpush3.bf16.msra.mxu1 %v8905_v32  ;;  %7923 = vmatpush3.bf16.msra.mxu0 %v8823_v44 }
 0xefa   :  { %7930 = vmatprep.subr.bf16.mxu1 %v8376_v3  ;;  %7924 = vmatprep.subr.bf16.mxu0 %v8376_v3 }
 0xefb   :  { %7461 = vmatprep.mubr.msk.f32.mxu0 %vm8377_vm8, %v8378_v13  ;;  %7472 = vmatprep.mubr.msk.f32.mxu1 %vm8377_vm8, %v8378_v13 }
 0xefd   :  { %7932 = vmatpush3.bf16.msra.mxu1 %v8911_v8  ;;  %7926 = vmatpush3.bf16.msra.mxu0 %v8825_v35 }
 0xefe   :  { %7933 = vmatprep.subr.bf16.mxu0 %v8376_v3  ;;  %7939 = vmatprep.subr.bf16.mxu1 %v8376_v3 }
 0xfc3   :  { %v5473_v32 = vpop.f32.mrb[64].mxu0  ;;  %v5553_v44 = vpop.f32.mrb[64].mxu1 }
 0xfc4   :  { %v5478_v39 = vrot.slane %v5473_v32, 4  ;;  %v5558_v9 = vrot.slane %v5553_v44, 4  ;;  %v7419_v33 = vpop.f32.mrb[65].mxu0  ;;  %v7430_v40 = vpop.f32.mrb[65].mxu1 }
 0xfc6   :  { %v5480_v41 = vadd.f32 %v5478_v39, %v9126_v46  ;;  %v5560_v58 = vadd.f32 %v5558_v9, %v9130_v28 }
 0xfc8   :  { %v6338_v48 = vmul.f32 -1.442695, %v5480_v41  ;;  %v6340_v0 = vmul.f32 -1.442695, %v5560_v58 }
 0xfca   :  { %8290 = vpow2.f32 %v6338_v48 }
 0xfcb   :  { %8292 = vpow2.f32 %v6340_v0  ;;  %v5633_v8 = vpop.f32.mrb[66].mxu0  ;;  %v5708_v35 = vpop.f32.mrb[66].mxu1 }
 0xfcc   :  { %v5713_v29 = vrot.slane %v5708_v35, 4  ;;  %v7441_v49 = vpop.f32.mrb[67].mxu0  ;;  %v7452_v52 = vpop.f32.mrb[67].mxu1  ;;  %v5638_v47 = vrot.slane %v5633_v8, 4 }
 0xfce   :  { %v5715_v54 = vadd.f32 %v5713_v29, %v8969_v23  ;;  %v5640_v61 = vadd.f32 %v5638_v47, %v8967_v2 }
 0xfd0   :  { %v6343_v45 = vmul.f32 -1.442695, %v5715_v54 }
 0xfd2   :  { %8294 = vpow2.f32 %v6343_v45 }
 0xfd3   :  { %8296 = vtanh.f32 %v5640_v61 }
 0xfd4   :  { %v8291_v63 = vpop.eup %8290 }
 0xfd5   :  { %v8293_v6 = vpop.eup %8292  ;;  %v5484_v25 = vadd.f32 1.0, %v8291_v63  ;;  %v6211_v63 = vsub.s32 2, %v8454_v43 }
 0xfd6   :  { %v5564_v4 = vadd.f32 1.0, %v8293_v6 }
 0xfd7   :  { %8298 = vrcp.f32 %v5484_v25 }
 0xfd8   :  { %8300 = vrcp.f32 %v5564_v4 }
 0xfdc   :  { %v8295_v5 = vpop.eup %8294 }
 0xfdd   :  { %v8297_v11 = vpop.eup %8296  ;;  %v5719_v26 = vadd.f32 1.0, %v8295_v5 }
 0xfdf   :  { %8302 = vrcp.f32 %v5719_v26 }
 0xfe1   :  { %v8299_v62 = vpop.eup %8298 }
 0xfe2   :  { %v8301_v60 = vpop.eup %8300  ;;  %v5726_v31 = vmul.f32 %v8299_v62, %v8297_v11 }
 0xfe3   :  { %v5725_v10 = vmul.f32 %v8301_v60, %v5723_v59 }
 0xfe5   :  { %v9209_v18 = vadd.f32 %v5726_v31, %v5725_v10 }
 0xfe7   :  { %8304 = vtanh.f32 %v9209_v18  ;;  %v6050_v0 = vrot.slane %v9209_v18, 6 }
 0xfe9   :  { %v8303_v14 = vpop.eup %8302 }
 0xff1   :  { %v8305_v16 = vpop.eup %8304 }
 0xff2   :  { %v5729_v20 = vmul.f32 %v8305_v16, %v8303_v14 }
 0xff4   :  { %v5731_v12 = vrot.slane %v5729_v20, 4 }
 0xff6   :  { %7462 = vmatmul.mubr.msk.f32.vlgmr.msra.gmra.mrb[68].mxu0 %vm441_vm9, %v5731_v12  ;;  %7473 = vmatmul.mubr.msk.f32.vlgmr.msra.gmra.mrb[68].mxu1 %vm441_vm9, %v5731_v12 }
 0xff7   :  { %7935 = vmatpush3.bf16.msra.mxu0 %v8923_v51  ;;  %7941 = vmatpush3.bf16.msra.mxu1 %v8921_v50  ;;  %v48_v50 = vld [vmem:[%s9274_s3] sm:$0xff]  ;;  %v49_v51 = vld [vmem:[%s9274_s3 + $0x8] sm:$0xff] }
 0xff8   :  { %7936 = vmatprep.subr.bf16.mxu0 %v8376_v3  ;;  %7942 = vmatprep.subr.bf16.mxu1 %v8376_v3 }
 0xff9   :  { %7483 = vmatprep.mubr.msk.f32.mxu0 %vm8377_vm8, %v8378_v13  ;;  %7494 = vmatprep.mubr.msk.f32.mxu1 %vm8377_vm8, %v8378_v13 }
 0xffb   :  { %7938 = vmatpush3.bf16.msra.mxu0 %v8933_v55  ;;  %7944 = vmatpush3.bf16.msra.mxu1 %v8931_v53  ;;  %v52_v53 = vld [vmem:[%s9274_s3 + $0x20] sm:$0x7]  ;;  %v7946_v55 = vpack.c.bf16 %v49_v51, %v48_v50 }
 0xffc   :  { %7945 = vmatprep.subr.bf16.mxu1 %v8376_v3  ;;  %7497 = vmatprep.subr.mxu0 %v8378_v13  ;;  %v6212_v6 = vrot.slane %v52_v53, %v6211_v63 }
 0xffe   :  { %7484 = vmatmul.mubr.msk.f32.vlgmr.msra.gmra.mrb[70].mxu0 %vm441_vm9, %v5731_v12  ;;  %7495 = vmatmul.mubr.msk.f32.vlgmr.msra.gmra.mrb[70].mxu1 %vm441_vm9, %v5731_v12 }
 0xfff   :  { %7499 = vmatprep.mubr.msk.f32.mxu0 %vm8377_vm8, %v8378_v13  ;;  %7510 = vmatprep.mubr.msk.f32.mxu1 %vm8377_vm8, %v8378_v13  ;;  %v50_v13 = vld [vmem:[%s9274_s3 + $0x10] sm:$0xff]  ;;  %s6222_s3 = sshll.u32 %s8379_s1, 4  ;;  %s6223_s3 = int_to_ptr.vmem [resolvable:$true] %s6222_s3 }
0x1000   :  { %7498 = vmatpush3.msk.msra.mxu0 %vm91_vm4, %v52_v53  ;;  %7947 = vmatpush3.bf16.msra.mxu1 %v7946_v55  ;;  %v7949_v15 = vpack.c.bf16 %v51_v30, %v50_v13  ;;  %s8344_s20 = scalar_lea.vmem %s6223_s3, 32  ;;  %p8349_p9 = scmp.lt.s32.totalorder %s6223_s3, %s6223_s3 }
0x1001   :  { %7948 = vmatprep.subr.bf16.mxu1 %v8376_v3  ;;  %p8345_p8 = scmp.ne.s32.totalorder %s6223_s3, %s8344_s20  ;;  %p8350_p10 = scmp.lt.s32.totalorder %s8344_s20, %s8344_s20 }
0x1002   :  { %7500 = vmatmul.mubr.msk.f32.vlgmr.msra.gmra.mrb[72].mxu0 %vm6058_vm10, %v6057_v7 }
0x1003   :  { %p8351_p11 = por %p8350_p10, %p8349_p9 }
0x1004   :  { %7950 = vmatpush3.bf16.msra.mxu1 %v7949_v15 }
0x1005   :  { %p8352_p12 = pnand %p8351_p11, %p8345_p8 }
0x10c9   :  { %v5800_v17 = vpop.f32.mrb[68].mxu0  ;;  %v5880_v38 = vpop.f32.mrb[68].mxu1 }
0x10ca   :  { %v5805_v24 = vrot.slane %v5800_v17, 2  ;;  %v5885_v21 = vrot.slane %v5880_v38, 2  ;;  %v7463_v22 = vpop.f32.mrb[69].mxu0  ;;  %v7474_v34 = vpop.f32.mrb[69].mxu1 }
0x10cc   :  { %v5807_v42 = vadd.f32 %v5805_v24, %v9126_v46  ;;  %v5887_v56 = vadd.f32 %v5885_v21, %v9130_v28 }
0x10ce   :  { %v6345_v19 = vmul.f32 -1.442695, %v5807_v42  ;;  %v6347_v57 = vmul.f32 -1.442695, %v5887_v56 }
0x10d0   :  { %8306 = vpow2.f32 %v6345_v19 }
0x10d1   :  { %8308 = vpow2.f32 %v6347_v57  ;;  %v5960_v1 = vpop.f32.mrb[70].mxu0  ;;  %v6035_v27 = vpop.f32.mrb[70].mxu1 }
0x10d2   :  { %v6040_v36 = vrot.slane %v6035_v27, 2  ;;  %v7485_v37 = vpop.f32.mrb[71].mxu0  ;;  %v7496_v3 = vpop.f32.mrb[71].mxu1  ;;  %v5965_v32 = vrot.slane %v5960_v1, 2 }
0x10d4   :  { %v6042_v44 = vadd.f32 %v6040_v36, %v8969_v23  ;;  %v5967_v9 = vadd.f32 %v5965_v32, %v8967_v2 }
0x10d5   :  { %v6131_v45 = vpop.f32.mrb[72].mxu0 }
0x10d6   :  { %v6350_v39 = vmul.f32 -1.442695, %v6042_v44  ;;  %v7501_v61 = vpop.f32.mrb[73].mxu0 }
0x10d8   :  { %8310 = vpow2.f32 %v6350_v39 }
0x10d9   :  { %8312 = vtanh.f32 %v5967_v9 }
0x10da   :  { %v8307_v33 = vpop.eup %8306 }
0x10db   :  { %v8309_v40 = vpop.eup %8308  ;;  %v5811_v46 = vadd.f32 1.0, %v8307_v33 }
0x10dc   :  { %v5891_v28 = vadd.f32 1.0, %v8309_v40 }
0x10dd   :  { %8314 = vrcp.f32 %v5811_v46 }
0x10de   :  { %8316 = vrcp.f32 %v5891_v28 }
0x10e2   :  { %v8311_v41 = vpop.eup %8310 }
0x10e3   :  { %v8313_v58 = vpop.eup %8312  ;;  %v6046_v29 = vadd.f32 1.0, %v8311_v41 }
0x10e5   :  { %8318 = vrcp.f32 %v6046_v29 }
0x10e7   :  { %v8315_v48 = vpop.eup %8314 }
0x10e8   :  { %v8317_v8 = vpop.eup %8316  ;;  %v6053_v35 = vmul.f32 %v8315_v48, %v8313_v58 }
0x10e9   :  { %v6052_v23 = vmul.f32 %v8317_v8, %v6050_v0 }
0x10eb   :  { %v6054_v49 = vadd.f32 %v6053_v35, %v6052_v23 }
0x10ed   :  { %8320 = vtanh.f32 %v6054_v49 }
0x10ef   :  { %v8319_v2 = vpop.eup %8318 }
0x10f7   :  { %v8321_v52 = vpop.eup %8320 }
0x10f8   :  { %v6056_v47 = vmul.f32 %v8321_v52, %v8319_v2 }
0x10fa   :  { %v6136_v54 = vrot.slane %v6056_v47, 6 }
0x10fc   :  { %7511 = vmatmul.mubr.msk.f32.vlgmr.msra.gmra.mrb[72].mxu1 %vm441_vm9, %v6136_v54 }
0x11cf   :  { %v6205_v25 = vpop.f32.mrb[72].mxu1 }
0x11d0   :  { %v6206_v4 = vadd.f32 %v6205_v25, %v6131_v45  ;;  %v7512_v5 = vpop.f32.mrb[73].mxu1 }
0x11d2   :  { %v6213_v11 = vadd.f32 %v6212_v6, %v6206_v4 }
0x11d4   :  { %6215 = vst.msk [vmem:[#allocation5] sm:$0x3] %vm6214_vm11, %v6213_v11 }
0x11d5   :  { %8355 = shalt.err (!%p8352_p12)
}
0x11d6   :  { %s8356_s23 = scalar_lea.hbm %s9275_s4, 32 }
0x11d7   :  { %p8357_p13 = scmp.ne.s32.totalorder %s9275_s4, %s8356_s23  ;;  %p8360_p0 = scmp.lt.u32.totalorder %s8356_s23, %s9275_s4 }
0x11d9   :  { %p8362_p1 = pnand %p8360_p0, %p8357_p13 }
0x11db   :  { %8365 = shalt.err (!%p8362_p1)
}
0x11dc   :  { %6225 = dma.vmem_to_hbm [thread:$0]  %s6223_s3, 32, %s9275_s4, [#allocation4]  }
0x11dd   :  { %8368 = dma.done.wait [#allocation4], 32  }
0x11de   :  { %8369 = vsyncadd [#allocation4], 4294967264 }
0x11df   :  { %6229 = vsyncpa [#allocation3], 1 }
0x11e0   :  { %6230 = vsyncpa [#allocation4], 1 }

</bundles_post_ra>
